<compile_context>
chip_gen: v7x
topology: tpu7x:2x2x1
jax: 0.10.0
libtpu: 0.0.40
codegen_flags: <defaults>
</compile_context>

<pallas_src>
import jax
import jax.numpy as jnp
from jax.experimental import pallas as pl
from jax.experimental.pallas import tpu as pltpu

BN_EPS = 1e-5
LANE = 128

# (name, in_dim, out_dim, has_batchnorm) -- slot order is fixed; fc21/fc22 must
# stay adjacent (slots 4,5) so their weights can be consumed as one [128,256].
def _layer_dims(d_in, h, h2, latent):
    return [
        ("linear1", d_in, h, True),      # slot 0
        ("linear2", h, h2, True),        # slot 1
        ("linear3", h2, h2, True),       # slot 2
        ("fc1", h2, latent, True),       # slot 3
        ("fc21", latent, latent, False), # slot 4  (fused with slot 5)
        ("fc22", latent, latent, False), # slot 5
        ("fc3", latent, latent, True),   # slot 6
        ("fc4", latent, h2, True),       # slot 7
        ("linear4", h2, h2, True),       # slot 8
        ("linear5", h2, h, True),        # slot 9
        ("linear6", h, d_in, True),      # slot 10
    ]


N_SLOTS = 11


# --------------------------------------------------------------------------
# Kernel
# --------------------------------------------------------------------------
def vae_forward_kernel(act_ref, w_ref, v_ref, out_ref):
    x = act_ref[0, :, :]    # [N, 128]  input, zero-padded lanes >= D_in
    eps = act_ref[1, :, :]  # [N, 128]  noise, zero-padded lanes >= latent

    def w(s, width=1):      # [128, width*128] weight block(s), lane-aligned view
        return w_ref[:, s * LANE:(s + width) * LANE]

    def b(s, width=1):      # [1, width*128] bias
        return v_ref[0:1, s * LANE:(s + width) * LANE]

    def g(s):               # [1, 128] BN gamma (zero on padded lanes)
        return v_ref[1:2, s * LANE:(s + 1) * LANE]

    def be(s):              # [1, 128] BN beta (zero on padded lanes)
        return v_ref[2:3, s * LANE:(s + 1) * LANE]

    def linear(h, s, width=1):
        # precision=HIGHEST: negligible cost at these tiny sizes, matches f32 torch.
        return jnp.dot(h, w(s, width),
                       preferred_element_type=jnp.float32,
                       precision=jax.lax.Precision.HIGHEST) + b(s, width)

    def bn(h, s):
        # training-mode BatchNorm1d, fused-affine form, single reduction pass:
        #   inv = rsqrt(var + eps); scale = gamma*inv; shift = beta - mean*scale
        mean = jnp.mean(h, axis=0, keepdims=True)
        var = jnp.mean(h * h, axis=0, keepdims=True) - mean * mean
        inv = jax.lax.rsqrt(var + BN_EPS)
        scale = g(s) * inv
        shift = be(s) - mean * scale
        return h * scale + shift

    def relu(h):
        return jnp.maximum(h, 0.0)

    # ---- encode ----
    h = relu(bn(linear(x, 0), 0))        # linear1 + lin_bn1
    h = relu(bn(linear(h, 1), 1))        # linear2 + lin_bn2
    h = relu(bn(linear(h, 2), 2))        # linear3 + lin_bn3
    h = relu(bn(linear(h, 3), 3))        # fc1 + bn1
    mu_lv = linear(h, 4, width=2)        # fused fc21 | fc22  -> [N, 256]
    mu = mu_lv[:, :LANE]                 # 128-lane aligned static slices
    logvar = mu_lv[:, LANE:]

    # ---- reparameterize (training mode): z = eps * exp(0.5*logvar) + mu ----
    z = eps * jnp.exp(0.5 * logvar) + mu

    # ---- decode ----
    h = relu(bn(linear(z, 6), 6))        # fc3 + fc_bn3
    h = relu(bn(linear(h, 7), 7))        # fc4 + fc_bn4
    h = relu(bn(linear(h, 8), 8))        # linear4 + lin_bn4
    h = relu(bn(linear(h, 9), 9))        # linear5 + lin_bn5
    recon = bn(linear(h, 10), 10)        # linear6 + lin_bn6 (no ReLU)

    # single lane-dense output slab: [3, N, 128]
    out_ref[0, :, :] = recon
    out_ref[1, :, :] = mu
    out_ref[2, :, :] = logvar


# --------------------------------------------------------------------------
# Parameter construction / packing (wrapper side)
# --------------------------------------------------------------------------
def _init_linear(key, d_in, d_out):
    """PyTorch-style Linear init: U(-1/sqrt(in), 1/sqrt(in)); weight stored [in, out]."""
    kw, kb = jax.random.split(key)
    bound = 1.0 / jnp.sqrt(float(d_in))
    w_t = jax.random.uniform(kw, (d_in, d_out), jnp.float32, -bound, bound)
    bias = jax.random.uniform(kb, (d_out,), jnp.float32, -bound, bound)
    return w_t, bias


def build_params(key, d_in, h, h2, latent):
    dims = _layer_dims(d_in, h, h2, latent)
    keys = jax.random.split(key, len(dims))
    layers = []
    for k, (_, din, dout, has_bn) in zip(keys, dims):
        w_t, bias = _init_linear(k, din, dout)
        layer = {"w": w_t, "b": bias}
        if has_bn:
            layer["gamma"] = jnp.ones((dout,), jnp.float32)
            layer["beta"] = jnp.zeros((dout,), jnp.float32)
        layers.append(layer)
    return layers


def pack_params(layers, d_in, h, h2, latent):
    """Pack per-layer params into two pre-padded lane-dense slabs."""
    dims = _layer_dims(d_in, h, h2, latent)
    w_slab = jnp.zeros((LANE, N_SLOTS * LANE), jnp.float32)
    v_slab = jnp.zeros((3, N_SLOTS * LANE), jnp.float32)
    for s, ((_, din, dout, has_bn), p) in enumerate(zip(dims, layers)):
        off = s * LANE
        w_slab = w_slab.at[:din, off:off + dout].set(p["w"])
        v_slab = v_slab.at[0, off:off + dout].set(p["b"])
        if has_bn:
            v_slab = v_slab.at[1, off:off + dout].set(p["gamma"])
            v_slab = v_slab.at[2, off:off + dout].set(p["beta"])
    return w_slab, v_slab


# --------------------------------------------------------------------------
# Forward wrapper
# --------------------------------------------------------------------------
def autoencoder_forward(x, eps, w_slab, v_slab):
    n, d_in = x.shape
    latent = eps.shape[1]
    # BN uses batch statistics over axis 0; keep the true batch (no row padding).
    assert n % 8 == 0, "batch must be a multiple of 8 (sublane alignment)"

    # Single lane-dense activation slab: [2, N, 128]  (x | eps), one input DMA.
    act_slab = jnp.zeros((2, n, LANE), jnp.float32)
    act_slab = act_slab.at[0, :, :d_in].set(x)
    act_slab = act_slab.at[1, :, :latent].set(eps)

    vmem = pl.BlockSpec(memory_space=pltpu.MemorySpace.VMEM)
    bytes_accessed = 4 * (act_slab.size + w_slab.size + v_slab.size + 3 * n * LANE)
    cost = pl.CostEstimate(
        flops=2 * n * LANE * LANE * (N_SLOTS + 1),   # 10 matmuls + one double-width fused
        transcendentals=n * LANE + 9 * LANE,         # exp (reparam) + rsqrt (9 BNs)
        bytes_accessed=bytes_accessed,
    )

    out = pl.pallas_call(
        vae_forward_kernel,
        out_shape=jax.ShapeDtypeStruct((3, n, LANE), jnp.float32),
        in_specs=[vmem, vmem, vmem],
        out_specs=vmem,
        cost_estimate=cost,
    )(act_slab, w_slab, v_slab)

    recon = out[0, :, :d_in]
    mu = out[1, :, :latent]
    logvar = out[2, :, :latent]
    return recon, mu, logvar


# --------------------------------------------------------------------------
if __name__ == "__main__":
    # Sizes implied by the module: H=50, H2=12, latent=10; D_in from the data.
    N = 16
    D_IN = 32
    H = 50
    H2 = 12
    LATENT = 10

    key = jax.random.PRNGKey(0)
    k_x, k_eps, k_params = jax.random.split(key, 3)

    x = jax.random.normal(k_x, (N, D_IN), jnp.float32)
    eps = jax.random.normal(k_eps, (N, LATENT), jnp.float32)

    layers = build_params(k_params, D_IN, H, H2, LATENT)
    w_slab, v_slab = pack_params(layers, D_IN, H, H2, LATENT)

    recon, mu, logvar = autoencoder_forward(x, eps, w_slab, v_slab)
    jax.block_until_ready((recon, mu, logvar))

    assert recon.shape == (N, D_IN)
    assert mu.shape == (N, LATENT)
    assert logvar.shape == (N, LATENT)
    print("KERNEL_OK")
</pallas_src>

<mosaic_0001>
module attributes {stable_mosaic.version = 11 : i64} {
  func.func @vae_forward_kernel(%arg0: memref<2x16x128xf32, #tpu.memory_space<vmem>>, %arg1: memref<128x1408xf32, #tpu.memory_space<vmem>>, %arg2: memref<3x1408xf32, #tpu.memory_space<vmem>>, %arg3: memref<3x16x128xf32, #tpu.memory_space<vmem>>) attributes {dimension_semantics = [], scalar_prefetch = 0 : i64, scratch_operands = 0 : i64, tpu.core_type = #tpu.core_type<tc>} {
    %c0 = arith.constant 0 : index
    %c0_0 = arith.constant 0 : index
    %c0_1 = arith.constant 0 : index
    %0 = vector.load %arg0[%c0, %c0_0, %c0_1] : memref<2x16x128xf32, #tpu.memory_space<vmem>>, vector<1x16x128xf32>
    %1 = vector.shape_cast %0 : vector<1x16x128xf32> to vector<16x128xf32>
    %c1 = arith.constant 1 : index
    %c0_2 = arith.constant 0 : index
    %c0_3 = arith.constant 0 : index
    %2 = vector.load %arg0[%c1, %c0_2, %c0_3] : memref<2x16x128xf32, #tpu.memory_space<vmem>>, vector<1x16x128xf32>
    %3 = vector.shape_cast %2 : vector<1x16x128xf32> to vector<16x128xf32>
    %c0_4 = arith.constant 0 : index
    %c0_5 = arith.constant 0 : index
    %4 = vector.load %arg1[%c0_4, %c0_5] : memref<128x1408xf32, #tpu.memory_space<vmem>>, vector<128x128xf32>
    %cst = arith.constant dense<0.000000e+00> : vector<16x128xf32>
    %5 = tpu.matmul %1, %4, %cst {dimension_numbers = #tpu.dot_dimension_numbers<[1], [0], [0], [1], [0, 0, 1, 1], [], []>, precision = #tpu.contract_precision<fp32>} : vector<16x128xf32>, vector<128x128xf32>, vector<16x128xf32> -> vector<16x128xf32>
    %c0_6 = arith.constant 0 : index
    %c0_7 = arith.constant 0 : index
    %6 = vector.load %arg2[%c0_6, %c0_7] : memref<3x1408xf32, #tpu.memory_space<vmem>>, vector<1x128xf32>
    %7 = vector.broadcast %6 : vector<1x128xf32> to vector<16x128xf32>
    %8 = arith.addf %5, %7 : vector<16x128xf32>
    %cst_8 = arith.constant dense<0.000000e+00> : vector<128xf32>
    %9 = vector.multi_reduction <add>, %8, %cst_8 [0] : vector<16x128xf32> to vector<128xf32>
    %10 = vector.shape_cast %9 : vector<128xf32> to vector<1x128xf32>
    %cst_9 = arith.constant 1.600000e+01 : f32
    %11 = vector.broadcast %cst_9 : f32 to vector<1x128xf32>
    %12 = arith.divf %10, %11 : vector<1x128xf32>
    %13 = arith.mulf %8, %8 : vector<16x128xf32>
    %cst_10 = arith.constant dense<0.000000e+00> : vector<128xf32>
    %14 = vector.multi_reduction <add>, %13, %cst_10 [0] : vector<16x128xf32> to vector<128xf32>
    %15 = vector.shape_cast %14 : vector<128xf32> to vector<1x128xf32>
    %cst_11 = arith.constant 1.600000e+01 : f32
    %16 = vector.broadcast %cst_11 : f32 to vector<1x128xf32>
    %17 = arith.divf %15, %16 : vector<1x128xf32>
    %18 = arith.mulf %12, %12 : vector<1x128xf32>
    %19 = arith.subf %17, %18 : vector<1x128xf32>
    %cst_12 = arith.constant 9.99999974E-6 : f32
    %20 = vector.broadcast %cst_12 : f32 to vector<1x128xf32>
    %21 = arith.addf %19, %20 : vector<1x128xf32>
    %22 = math.rsqrt %21 : vector<1x128xf32>
    %c1_13 = arith.constant 1 : index
    %c0_14 = arith.constant 0 : index
    %23 = vector.load %arg2[%c1_13, %c0_14] : memref<3x1408xf32, #tpu.memory_space<vmem>>, vector<1x128xf32>
    %24 = arith.mulf %23, %22 : vector<1x128xf32>
    %c2 = arith.constant 2 : index
    %c0_15 = arith.constant 0 : index
    %25 = vector.load %arg2[%c2, %c0_15] : memref<3x1408xf32, #tpu.memory_space<vmem>>, vector<1x128xf32>
    %26 = arith.mulf %12, %24 : vector<1x128xf32>
    %27 = arith.subf %25, %26 : vector<1x128xf32>
    %28 = vector.broadcast %24 : vector<1x128xf32> to vector<16x128xf32>
    %29 = arith.mulf %8, %28 : vector<16x128xf32>
    %30 = vector.broadcast %27 : vector<1x128xf32> to vector<16x128xf32>
    %31 = arith.addf %29, %30 : vector<16x128xf32>
    %cst_16 = arith.constant 0.000000e+00 : f32
    %32 = vector.broadcast %cst_16 : f32 to vector<16x128xf32>
    %33 = arith.maximumf %31, %32 : vector<16x128xf32>
    %c0_17 = arith.constant 0 : index
    %c128 = arith.constant 128 : index
    %34 = vector.load %arg1[%c0_17, %c128] : memref<128x1408xf32, #tpu.memory_space<vmem>>, vector<128x128xf32>
    %cst_18 = arith.constant dense<0.000000e+00> : vector<16x128xf32>
    %35 = tpu.matmul %33, %34, %cst_18 {dimension_numbers = #tpu.dot_dimension_numbers<[1], [0], [0], [1], [0, 0, 1, 1], [], []>, precision = #tpu.contract_precision<fp32>} : vector<16x128xf32>, vector<128x128xf32>, vector<16x128xf32> -> vector<16x128xf32>
    %c0_19 = arith.constant 0 : index
    %c128_20 = arith.constant 128 : index
    %36 = vector.load %arg2[%c0_19, %c128_20] : memref<3x1408xf32, #tpu.memory_space<vmem>>, vector<1x128xf32>
    %37 = vector.broadcast %36 : vector<1x128xf32> to vector<16x128xf32>
    %38 = arith.addf %35, %37 : vector<16x128xf32>
    %cst_21 = arith.constant dense<0.000000e+00> : vector<128xf32>
    %39 = vector.multi_reduction <add>, %38, %cst_21 [0] : vector<16x128xf32> to vector<128xf32>
    %40 = vector.shape_cast %39 : vector<128xf32> to vector<1x128xf32>
    %cst_22 = arith.constant 1.600000e+01 : f32
    %41 = vector.broadcast %cst_22 : f32 to vector<1x128xf32>
    %42 = arith.divf %40, %41 : vector<1x128xf32>
    %43 = arith.mulf %38, %38 : vector<16x128xf32>
    %cst_23 = arith.constant dense<0.000000e+00> : vector<128xf32>
    %44 = vector.multi_reduction <add>, %43, %cst_23 [0] : vector<16x128xf32> to vector<128xf32>
    %45 = vector.shape_cast %44 : vector<128xf32> to vector<1x128xf32>
    %cst_24 = arith.constant 1.600000e+01 : f32
    %46 = vector.broadcast %cst_24 : f32 to vector<1x128xf32>
    %47 = arith.divf %45, %46 : vector<1x128xf32>
    %48 = arith.mulf %42, %42 : vector<1x128xf32>
    %49 = arith.subf %47, %48 : vector<1x128xf32>
    %cst_25 = arith.constant 9.99999974E-6 : f32
    %50 = vector.broadcast %cst_25 : f32 to vector<1x128xf32>
    %51 = arith.addf %49, %50 : vector<1x128xf32>
    %52 = math.rsqrt %51 : vector<1x128xf32>
    %c1_26 = arith.constant 1 : index
    %c128_27 = arith.constant 128 : index
    %53 = vector.load %arg2[%c1_26, %c128_27] : memref<3x1408xf32, #tpu.memory_space<vmem>>, vector<1x128xf32>
    %54 = arith.mulf %53, %52 : vector<1x128xf32>
    %c2_28 = arith.constant 2 : index
    %c128_29 = arith.constant 128 : index
    %55 = vector.load %arg2[%c2_28, %c128_29] : memref<3x1408xf32, #tpu.memory_space<vmem>>, vector<1x128xf32>
    %56 = arith.mulf %42, %54 : vector<1x128xf32>
    %57 = arith.subf %55, %56 : vector<1x128xf32>
    %58 = vector.broadcast %54 : vector<1x128xf32> to vector<16x128xf32>
    %59 = arith.mulf %38, %58 : vector<16x128xf32>
    %60 = vector.broadcast %57 : vector<1x128xf32> to vector<16x128xf32>
    %61 = arith.addf %59, %60 : vector<16x128xf32>
    %cst_30 = arith.constant 0.000000e+00 : f32
    %62 = vector.broadcast %cst_30 : f32 to vector<16x128xf32>
    %63 = arith.maximumf %61, %62 : vector<16x128xf32>
    %c0_31 = arith.constant 0 : index
    %c256 = arith.constant 256 : index
    %64 = vector.load %arg1[%c0_31, %c256] : memref<128x1408xf32, #tpu.memory_space<vmem>>, vector<128x128xf32>
    %cst_32 = arith.constant dense<0.000000e+00> : vector<16x128xf32>
    %65 = tpu.matmul %63, %64, %cst_32 {dimension_numbers = #tpu.dot_dimension_numbers<[1], [0], [0], [1], [0, 0, 1, 1], [], []>, precision = #tpu.contract_precision<fp32>} : vector<16x128xf32>, vector<128x128xf32>, vector<16x128xf32> -> vector<16x128xf32>
    %c0_33 = arith.constant 0 : index
    %c256_34 = arith.constant 256 : index
    %66 = vector.load %arg2[%c0_33, %c256_34] : memref<3x1408xf32, #tpu.memory_space<vmem>>, vector<1x128xf32>
    %67 = vector.broadcast %66 : vector<1x128xf32> to vector<16x128xf32>
    %68 = arith.addf %65, %67 : vector<16x128xf32>
    %cst_35 = arith.constant dense<0.000000e+00> : vector<128xf32>
    %69 = vector.multi_reduction <add>, %68, %cst_35 [0] : vector<16x128xf32> to vector<128xf32>
    %70 = vector.shape_cast %69 : vector<128xf32> to vector<1x128xf32>
    %cst_36 = arith.constant 1.600000e+01 : f32
    %71 = vector.broadcast %cst_36 : f32 to vector<1x128xf32>
    %72 = arith.divf %70, %71 : vector<1x128xf32>
    %73 = arith.mulf %68, %68 : vector<16x128xf32>
    %cst_37 = arith.constant dense<0.000000e+00> : vector<128xf32>
    %74 = vector.multi_reduction <add>, %73, %cst_37 [0] : vector<16x128xf32> to vector<128xf32>
    %75 = vector.shape_cast %74 : vector<128xf32> to vector<1x128xf32>
    %cst_38 = arith.constant 1.600000e+01 : f32
    %76 = vector.broadcast %cst_38 : f32 to vector<1x128xf32>
    %77 = arith.divf %75, %76 : vector<1x128xf32>
    %78 = arith.mulf %72, %72 : vector<1x128xf32>
    %79 = arith.subf %77, %78 : vector<1x128xf32>
    %cst_39 = arith.constant 9.99999974E-6 : f32
    %80 = vector.broadcast %cst_39 : f32 to vector<1x128xf32>
    %81 = arith.addf %79, %80 : vector<1x128xf32>
    %82 = math.rsqrt %81 : vector<1x128xf32>
    %c1_40 = arith.constant 1 : index
    %c256_41 = arith.constant 256 : index
    %83 = vector.load %arg2[%c1_40, %c256_41] : memref<3x1408xf32, #tpu.memory_space<vmem>>, vector<1x128xf32>
    %84 = arith.mulf %83, %82 : vector<1x128xf32>
    %c2_42 = arith.constant 2 : index
    %c256_43 = arith.constant 256 : index
    %85 = vector.load %arg2[%c2_42, %c256_43] : memref<3x1408xf32, #tpu.memory_space<vmem>>, vector<1x128xf32>
    %86 = arith.mulf %72, %84 : vector<1x128xf32>
    %87 = arith.subf %85, %86 : vector<1x128xf32>
    %88 = vector.broadcast %84 : vector<1x128xf32> to vector<16x128xf32>
    %89 = arith.mulf %68, %88 : vector<16x128xf32>
    %90 = vector.broadcast %87 : vector<1x128xf32> to vector<16x128xf32>
    %91 = arith.addf %89, %90 : vector<16x128xf32>
    %cst_44 = arith.constant 0.000000e+00 : f32
    %92 = vector.broadcast %cst_44 : f32 to vector<16x128xf32>
    %93 = arith.maximumf %91, %92 : vector<16x128xf32>
    %c0_45 = arith.constant 0 : index
    %c384 = arith.constant 384 : index
    %94 = vector.load %arg1[%c0_45, %c384] : memref<128x1408xf32, #tpu.memory_space<vmem>>, vector<128x128xf32>
    %cst_46 = arith.constant dense<0.000000e+00> : vector<16x128xf32>
    %95 = tpu.matmul %93, %94, %cst_46 {dimension_numbers = #tpu.dot_dimension_numbers<[1], [0], [0], [1], [0, 0, 1, 1], [], []>, precision = #tpu.contract_precision<fp32>} : vector<16x128xf32>, vector<128x128xf32>, vector<16x128xf32> -> vector<16x128xf32>
    %c0_47 = arith.constant 0 : index
    %c384_48 = arith.constant 384 : index
    %96 = vector.load %arg2[%c0_47, %c384_48] : memref<3x1408xf32, #tpu.memory_space<vmem>>, vector<1x128xf32>
    %97 = vector.broadcast %96 : vector<1x128xf32> to vector<16x128xf32>
    %98 = arith.addf %95, %97 : vector<16x128xf32>
    %cst_49 = arith.constant dense<0.000000e+00> : vector<128xf32>
    %99 = vector.multi_reduction <add>, %98, %cst_49 [0] : vector<16x128xf32> to vector<128xf32>
    %100 = vector.shape_cast %99 : vector<128xf32> to vector<1x128xf32>
    %cst_50 = arith.constant 1.600000e+01 : f32
    %101 = vector.broadcast %cst_50 : f32 to vector<1x128xf32>
    %102 = arith.divf %100, %101 : vector<1x128xf32>
    %103 = arith.mulf %98, %98 : vector<16x128xf32>
    %cst_51 = arith.constant dense<0.000000e+00> : vector<128xf32>
    %104 = vector.multi_reduction <add>, %103, %cst_51 [0] : vector<16x128xf32> to vector<128xf32>
    %105 = vector.shape_cast %104 : vector<128xf32> to vector<1x128xf32>
    %cst_52 = arith.constant 1.600000e+01 : f32
    %106 = vector.broadcast %cst_52 : f32 to vector<1x128xf32>
    %107 = arith.divf %105, %106 : vector<1x128xf32>
    %108 = arith.mulf %102, %102 : vector<1x128xf32>
    %109 = arith.subf %107, %108 : vector<1x128xf32>
    %cst_53 = arith.constant 9.99999974E-6 : f32
    %110 = vector.broadcast %cst_53 : f32 to vector<1x128xf32>
    %111 = arith.addf %109, %110 : vector<1x128xf32>
    %112 = math.rsqrt %111 : vector<1x128xf32>
    %c1_54 = arith.constant 1 : index
    %c384_55 = arith.constant 384 : index
    %113 = vector.load %arg2[%c1_54, %c384_55] : memref<3x1408xf32, #tpu.memory_space<vmem>>, vector<1x128xf32>
    %114 = arith.mulf %113, %112 : vector<1x128xf32>
    %c2_56 = arith.constant 2 : index
    %c384_57 = arith.constant 384 : index
    %115 = vector.load %arg2[%c2_56, %c384_57] : memref<3x1408xf32, #tpu.memory_space<vmem>>, vector<1x128xf32>
    %116 = arith.mulf %102, %114 : vector<1x128xf32>
    %117 = arith.subf %115, %116 : vector<1x128xf32>
    %118 = vector.broadcast %114 : vector<1x128xf32> to vector<16x128xf32>
    %119 = arith.mulf %98, %118 : vector<16x128xf32>
    %120 = vector.broadcast %117 : vector<1x128xf32> to vector<16x128xf32>
    %121 = arith.addf %119, %120 : vector<16x128xf32>
    %cst_58 = arith.constant 0.000000e+00 : f32
    %122 = vector.broadcast %cst_58 : f32 to vector<16x128xf32>
    %123 = arith.maximumf %121, %122 : vector<16x128xf32>
    %c0_59 = arith.constant 0 : index
    %c512 = arith.constant 512 : index
    %124 = vector.load %arg1[%c0_59, %c512] : memref<128x1408xf32, #tpu.memory_space<vmem>>, vector<128x256xf32>
    %cst_60 = arith.constant dense<0.000000e+00> : vector<16x256xf32>
    %125 = tpu.matmul %123, %124, %cst_60 {dimension_numbers = #tpu.dot_dimension_numbers<[1], [0], [0], [1], [0, 0, 1, 1], [], []>, precision = #tpu.contract_precision<fp32>} : vector<16x128xf32>, vector<128x256xf32>, vector<16x256xf32> -> vector<16x256xf32>
    %c0_61 = arith.constant 0 : index
    %c512_62 = arith.constant 512 : index
    %126 = vector.load %arg2[%c0_61, %c512_62] : memref<3x1408xf32, #tpu.memory_space<vmem>>, vector<1x256xf32>
    %127 = vector.broadcast %126 : vector<1x256xf32> to vector<16x256xf32>
    %128 = arith.addf %125, %127 : vector<16x256xf32>
    %129 = vector.extract_strided_slice %128 {offsets = [0, 0], sizes = [16, 128], strides = [1, 1]} : vector<16x256xf32> to vector<16x128xf32>
    %130 = vector.extract_strided_slice %128 {offsets = [0, 128], sizes = [16, 128], strides = [1, 1]} : vector<16x256xf32> to vector<16x128xf32>
    %cst_63 = arith.constant 5.000000e-01 : f32
    %131 = vector.broadcast %cst_63 : f32 to vector<16x128xf32>
    %132 = arith.mulf %131, %130 : vector<16x128xf32>
    %133 = math.exp %132 : vector<16x128xf32>
    %134 = arith.mulf %3, %133 : vector<16x128xf32>
    %135 = arith.addf %134, %129 : vector<16x128xf32>
    %c0_64 = arith.constant 0 : index
    %c768 = arith.constant 768 : index
    %136 = vector.load %arg1[%c0_64, %c768] : memref<128x1408xf32, #tpu.memory_space<vmem>>, vector<128x128xf32>
    %cst_65 = arith.constant dense<0.000000e+00> : vector<16x128xf32>
    %137 = tpu.matmul %135, %136, %cst_65 {dimension_numbers = #tpu.dot_dimension_numbers<[1], [0], [0], [1], [0, 0, 1, 1], [], []>, precision = #tpu.contract_precision<fp32>} : vector<16x128xf32>, vector<128x128xf32>, vector<16x128xf32> -> vector<16x128xf32>
    %c0_66 = arith.constant 0 : index
    %c768_67 = arith.constant 768 : index
    %138 = vector.load %arg2[%c0_66, %c768_67] : memref<3x1408xf32, #tpu.memory_space<vmem>>, vector<1x128xf32>
    %139 = vector.broadcast %138 : vector<1x128xf32> to vector<16x128xf32>
    %140 = arith.addf %137, %139 : vector<16x128xf32>
    %cst_68 = arith.constant dense<0.000000e+00> : vector<128xf32>
    %141 = vector.multi_reduction <add>, %140, %cst_68 [0] : vector<16x128xf32> to vector<128xf32>
    %142 = vector.shape_cast %141 : vector<128xf32> to vector<1x128xf32>
    %cst_69 = arith.constant 1.600000e+01 : f32
    %143 = vector.broadcast %cst_69 : f32 to vector<1x128xf32>
    %144 = arith.divf %142, %143 : vector<1x128xf32>
    %145 = arith.mulf %140, %140 : vector<16x128xf32>
    %cst_70 = arith.constant dense<0.000000e+00> : vector<128xf32>
    %146 = vector.multi_reduction <add>, %145, %cst_70 [0] : vector<16x128xf32> to vector<128xf32>
    %147 = vector.shape_cast %146 : vector<128xf32> to vector<1x128xf32>
    %cst_71 = arith.constant 1.600000e+01 : f32
    %148 = vector.broadcast %cst_71 : f32 to vector<1x128xf32>
    %149 = arith.divf %147, %148 : vector<1x128xf32>
    %150 = arith.mulf %144, %144 : vector<1x128xf32>
    %151 = arith.subf %149, %150 : vector<1x128xf32>
    %cst_72 = arith.constant 9.99999974E-6 : f32
    %152 = vector.broadcast %cst_72 : f32 to vector<1x128xf32>
    %153 = arith.addf %151, %152 : vector<1x128xf32>
    %154 = math.rsqrt %153 : vector<1x128xf32>
    %c1_73 = arith.constant 1 : index
    %c768_74 = arith.constant 768 : index
    %155 = vector.load %arg2[%c1_73, %c768_74] : memref<3x1408xf32, #tpu.memory_space<vmem>>, vector<1x128xf32>
    %156 = arith.mulf %155, %154 : vector<1x128xf32>
    %c2_75 = arith.constant 2 : index
    %c768_76 = arith.constant 768 : index
    %157 = vector.load %arg2[%c2_75, %c768_76] : memref<3x1408xf32, #tpu.memory_space<vmem>>, vector<1x128xf32>
    %158 = arith.mulf %144, %156 : vector<1x128xf32>
    %159 = arith.subf %157, %158 : vector<1x128xf32>
    %160 = vector.broadcast %156 : vector<1x128xf32> to vector<16x128xf32>
    %161 = arith.mulf %140, %160 : vector<16x128xf32>
    %162 = vector.broadcast %159 : vector<1x128xf32> to vector<16x128xf32>
    %163 = arith.addf %161, %162 : vector<16x128xf32>
    %cst_77 = arith.constant 0.000000e+00 : f32
    %164 = vector.broadcast %cst_77 : f32 to vector<16x128xf32>
    %165 = arith.maximumf %163, %164 : vector<16x128xf32>
    %c0_78 = arith.constant 0 : index
    %c896 = arith.constant 896 : index
    %166 = vector.load %arg1[%c0_78, %c896] : memref<128x1408xf32, #tpu.memory_space<vmem>>, vector<128x128xf32>
    %cst_79 = arith.constant dense<0.000000e+00> : vector<16x128xf32>
    %167 = tpu.matmul %165, %166, %cst_79 {dimension_numbers = #tpu.dot_dimension_numbers<[1], [0], [0], [1], [0, 0, 1, 1], [], []>, precision = #tpu.contract_precision<fp32>} : vector<16x128xf32>, vector<128x128xf32>, vector<16x128xf32> -> vector<16x128xf32>
    %c0_80 = arith.constant 0 : index
    %c896_81 = arith.constant 896 : index
    %168 = vector.load %arg2[%c0_80, %c896_81] : memref<3x1408xf32, #tpu.memory_space<vmem>>, vector<1x128xf32>
    %169 = vector.broadcast %168 : vector<1x128xf32> to vector<16x128xf32>
    %170 = arith.addf %167, %169 : vector<16x128xf32>
    %cst_82 = arith.constant dense<0.000000e+00> : vector<128xf32>
    %171 = vector.multi_reduction <add>, %170, %cst_82 [0] : vector<16x128xf32> to vector<128xf32>
    %172 = vector.shape_cast %171 : vector<128xf32> to vector<1x128xf32>
    %cst_83 = arith.constant 1.600000e+01 : f32
    %173 = vector.broadcast %cst_83 : f32 to vector<1x128xf32>
    %174 = arith.divf %172, %173 : vector<1x128xf32>
    %175 = arith.mulf %170, %170 : vector<16x128xf32>
    %cst_84 = arith.constant dense<0.000000e+00> : vector<128xf32>
    %176 = vector.multi_reduction <add>, %175, %cst_84 [0] : vector<16x128xf32> to vector<128xf32>
    %177 = vector.shape_cast %176 : vector<128xf32> to vector<1x128xf32>
    %cst_85 = arith.constant 1.600000e+01 : f32
    %178 = vector.broadcast %cst_85 : f32 to vector<1x128xf32>
    %179 = arith.divf %177, %178 : vector<1x128xf32>
    %180 = arith.mulf %174, %174 : vector<1x128xf32>
    %181 = arith.subf %179, %180 : vector<1x128xf32>
    %cst_86 = arith.constant 9.99999974E-6 : f32
    %182 = vector.broadcast %cst_86 : f32 to vector<1x128xf32>
    %183 = arith.addf %181, %182 : vector<1x128xf32>
    %184 = math.rsqrt %183 : vector<1x128xf32>
    %c1_87 = arith.constant 1 : index
    %c896_88 = arith.constant 896 : index
    %185 = vector.load %arg2[%c1_87, %c896_88] : memref<3x1408xf32, #tpu.memory_space<vmem>>, vector<1x128xf32>
    %186 = arith.mulf %185, %184 : vector<1x128xf32>
    %c2_89 = arith.constant 2 : index
    %c896_90 = arith.constant 896 : index
    %187 = vector.load %arg2[%c2_89, %c896_90] : memref<3x1408xf32, #tpu.memory_space<vmem>>, vector<1x128xf32>
    %188 = arith.mulf %174, %186 : vector<1x128xf32>
    %189 = arith.subf %187, %188 : vector<1x128xf32>
    %190 = vector.broadcast %186 : vector<1x128xf32> to vector<16x128xf32>
    %191 = arith.mulf %170, %190 : vector<16x128xf32>
    %192 = vector.broadcast %189 : vector<1x128xf32> to vector<16x128xf32>
    %193 = arith.addf %191, %192 : vector<16x128xf32>
    %cst_91 = arith.constant 0.000000e+00 : f32
    %194 = vector.broadcast %cst_91 : f32 to vector<16x128xf32>
    %195 = arith.maximumf %193, %194 : vector<16x128xf32>
    %c0_92 = arith.constant 0 : index
    %c1024 = arith.constant 1024 : index
    %196 = vector.load %arg1[%c0_92, %c1024] : memref<128x1408xf32, #tpu.memory_space<vmem>>, vector<128x128xf32>
    %cst_93 = arith.constant dense<0.000000e+00> : vector<16x128xf32>
    %197 = tpu.matmul %195, %196, %cst_93 {dimension_numbers = #tpu.dot_dimension_numbers<[1], [0], [0], [1], [0, 0, 1, 1], [], []>, precision = #tpu.contract_precision<fp32>} : vector<16x128xf32>, vector<128x128xf32>, vector<16x128xf32> -> vector<16x128xf32>
    %c0_94 = arith.constant 0 : index
    %c1024_95 = arith.constant 1024 : index
    %198 = vector.load %arg2[%c0_94, %c1024_95] : memref<3x1408xf32, #tpu.memory_space<vmem>>, vector<1x128xf32>
    %199 = vector.broadcast %198 : vector<1x128xf32> to vector<16x128xf32>
    %200 = arith.addf %197, %199 : vector<16x128xf32>
    %cst_96 = arith.constant dense<0.000000e+00> : vector<128xf32>
    %201 = vector.multi_reduction <add>, %200, %cst_96 [0] : vector<16x128xf32> to vector<128xf32>
    %202 = vector.shape_cast %201 : vector<128xf32> to vector<1x128xf32>
    %cst_97 = arith.constant 1.600000e+01 : f32
    %203 = vector.broadcast %cst_97 : f32 to vector<1x128xf32>
    %204 = arith.divf %202, %203 : vector<1x128xf32>
    %205 = arith.mulf %200, %200 : vector<16x128xf32>
    %cst_98 = arith.constant dense<0.000000e+00> : vector<128xf32>
    %206 = vector.multi_reduction <add>, %205, %cst_98 [0] : vector<16x128xf32> to vector<128xf32>
    %207 = vector.shape_cast %206 : vector<128xf32> to vector<1x128xf32>
    %cst_99 = arith.constant 1.600000e+01 : f32
    %208 = vector.broadcast %cst_99 : f32 to vector<1x128xf32>
    %209 = arith.divf %207, %208 : vector<1x128xf32>
    %210 = arith.mulf %204, %204 : vector<1x128xf32>
    %211 = arith.subf %209, %210 : vector<1x128xf32>
    %cst_100 = arith.constant 9.99999974E-6 : f32
    %212 = vector.broadcast %cst_100 : f32 to vector<1x128xf32>
    %213 = arith.addf %211, %212 : vector<1x128xf32>
    %214 = math.rsqrt %213 : vector<1x128xf32>
    %c1_101 = arith.constant 1 : index
    %c1024_102 = arith.constant 1024 : index
    %215 = vector.load %arg2[%c1_101, %c1024_102] : memref<3x1408xf32, #tpu.memory_space<vmem>>, vector<1x128xf32>
    %216 = arith.mulf %215, %214 : vector<1x128xf32>
    %c2_103 = arith.constant 2 : index
    %c1024_104 = arith.constant 1024 : index
    %217 = vector.load %arg2[%c2_103, %c1024_104] : memref<3x1408xf32, #tpu.memory_space<vmem>>, vector<1x128xf32>
    %218 = arith.mulf %204, %216 : vector<1x128xf32>
    %219 = arith.subf %217, %218 : vector<1x128xf32>
    %220 = vector.broadcast %216 : vector<1x128xf32> to vector<16x128xf32>
    %221 = arith.mulf %200, %220 : vector<16x128xf32>
    %222 = vector.broadcast %219 : vector<1x128xf32> to vector<16x128xf32>
    %223 = arith.addf %221, %222 : vector<16x128xf32>
    %cst_105 = arith.constant 0.000000e+00 : f32
    %224 = vector.broadcast %cst_105 : f32 to vector<16x128xf32>
    %225 = arith.maximumf %223, %224 : vector<16x128xf32>
    %c0_106 = arith.constant 0 : index
    %c1152 = arith.constant 1152 : index
    %226 = vector.load %arg1[%c0_106, %c1152] : memref<128x1408xf32, #tpu.memory_space<vmem>>, vector<128x128xf32>
    %cst_107 = arith.constant dense<0.000000e+00> : vector<16x128xf32>
    %227 = tpu.matmul %225, %226, %cst_107 {dimension_numbers = #tpu.dot_dimension_numbers<[1], [0], [0], [1], [0, 0, 1, 1], [], []>, precision = #tpu.contract_precision<fp32>} : vector<16x128xf32>, vector<128x128xf32>, vector<16x128xf32> -> vector<16x128xf32>
    %c0_108 = arith.constant 0 : index
    %c1152_109 = arith.constant 1152 : index
    %228 = vector.load %arg2[%c0_108, %c1152_109] : memref<3x1408xf32, #tpu.memory_space<vmem>>, vector<1x128xf32>
    %229 = vector.broadcast %228 : vector<1x128xf32> to vector<16x128xf32>
    %230 = arith.addf %227, %229 : vector<16x128xf32>
    %cst_110 = arith.constant dense<0.000000e+00> : vector<128xf32>
    %231 = vector.multi_reduction <add>, %230, %cst_110 [0] : vector<16x128xf32> to vector<128xf32>
    %232 = vector.shape_cast %231 : vector<128xf32> to vector<1x128xf32>
    %cst_111 = arith.constant 1.600000e+01 : f32
    %233 = vector.broadcast %cst_111 : f32 to vector<1x128xf32>
    %234 = arith.divf %232, %233 : vector<1x128xf32>
    %235 = arith.mulf %230, %230 : vector<16x128xf32>
    %cst_112 = arith.constant dense<0.000000e+00> : vector<128xf32>
    %236 = vector.multi_reduction <add>, %235, %cst_112 [0] : vector<16x128xf32> to vector<128xf32>
    %237 = vector.shape_cast %236 : vector<128xf32> to vector<1x128xf32>
    %cst_113 = arith.constant 1.600000e+01 : f32
    %238 = vector.broadcast %cst_113 : f32 to vector<1x128xf32>
    %239 = arith.divf %237, %238 : vector<1x128xf32>
    %240 = arith.mulf %234, %234 : vector<1x128xf32>
    %241 = arith.subf %239, %240 : vector<1x128xf32>
    %cst_114 = arith.constant 9.99999974E-6 : f32
    %242 = vector.broadcast %cst_114 : f32 to vector<1x128xf32>
    %243 = arith.addf %241, %242 : vector<1x128xf32>
    %244 = math.rsqrt %243 : vector<1x128xf32>
    %c1_115 = arith.constant 1 : index
    %c1152_116 = arith.constant 1152 : index
    %245 = vector.load %arg2[%c1_115, %c1152_116] : memref<3x1408xf32, #tpu.memory_space<vmem>>, vector<1x128xf32>
    %246 = arith.mulf %245, %244 : vector<1x128xf32>
    %c2_117 = arith.constant 2 : index
    %c1152_118 = arith.constant 1152 : index
    %247 = vector.load %arg2[%c2_117, %c1152_118] : memref<3x1408xf32, #tpu.memory_space<vmem>>, vector<1x128xf32>
    %248 = arith.mulf %234, %246 : vector<1x128xf32>
    %249 = arith.subf %247, %248 : vector<1x128xf32>
    %250 = vector.broadcast %246 : vector<1x128xf32> to vector<16x128xf32>
    %251 = arith.mulf %230, %250 : vector<16x128xf32>
    %252 = vector.broadcast %249 : vector<1x128xf32> to vector<16x128xf32>
    %253 = arith.addf %251, %252 : vector<16x128xf32>
    %cst_119 = arith.constant 0.000000e+00 : f32
    %254 = vector.broadcast %cst_119 : f32 to vector<16x128xf32>
    %255 = arith.maximumf %253, %254 : vector<16x128xf32>
    %c0_120 = arith.constant 0 : index
    %c1280 = arith.constant 1280 : index
    %256 = vector.load %arg1[%c0_120, %c1280] : memref<128x1408xf32, #tpu.memory_space<vmem>>, vector<128x128xf32>
    %cst_121 = arith.constant dense<0.000000e+00> : vector<16x128xf32>
    %257 = tpu.matmul %255, %256, %cst_121 {dimension_numbers = #tpu.dot_dimension_numbers<[1], [0], [0], [1], [0, 0, 1, 1], [], []>, precision = #tpu.contract_precision<fp32>} : vector<16x128xf32>, vector<128x128xf32>, vector<16x128xf32> -> vector<16x128xf32>
    %c0_122 = arith.constant 0 : index
    %c1280_123 = arith.constant 1280 : index
    %258 = vector.load %arg2[%c0_122, %c1280_123] : memref<3x1408xf32, #tpu.memory_space<vmem>>, vector<1x128xf32>
    %259 = vector.broadcast %258 : vector<1x128xf32> to vector<16x128xf32>
    %260 = arith.addf %257, %259 : vector<16x128xf32>
    %cst_124 = arith.constant dense<0.000000e+00> : vector<128xf32>
    %261 = vector.multi_reduction <add>, %260, %cst_124 [0] : vector<16x128xf32> to vector<128xf32>
    %262 = vector.shape_cast %261 : vector<128xf32> to vector<1x128xf32>
    %cst_125 = arith.constant 1.600000e+01 : f32
    %263 = vector.broadcast %cst_125 : f32 to vector<1x128xf32>
    %264 = arith.divf %262, %263 : vector<1x128xf32>
    %265 = arith.mulf %260, %260 : vector<16x128xf32>
    %cst_126 = arith.constant dense<0.000000e+00> : vector<128xf32>
    %266 = vector.multi_reduction <add>, %265, %cst_126 [0] : vector<16x128xf32> to vector<128xf32>
    %267 = vector.shape_cast %266 : vector<128xf32> to vector<1x128xf32>
    %cst_127 = arith.constant 1.600000e+01 : f32
    %268 = vector.broadcast %cst_127 : f32 to vector<1x128xf32>
    %269 = arith.divf %267, %268 : vector<1x128xf32>
    %270 = arith.mulf %264, %264 : vector<1x128xf32>
    %271 = arith.subf %269, %270 : vector<1x128xf32>
    %cst_128 = arith.constant 9.99999974E-6 : f32
    %272 = vector.broadcast %cst_128 : f32 to vector<1x128xf32>
    %273 = arith.addf %271, %272 : vector<1x128xf32>
    %274 = math.rsqrt %273 : vector<1x128xf32>
    %c1_129 = arith.constant 1 : index
    %c1280_130 = arith.constant 1280 : index
    %275 = vector.load %arg2[%c1_129, %c1280_130] : memref<3x1408xf32, #tpu.memory_space<vmem>>, vector<1x128xf32>
    %276 = arith.mulf %275, %274 : vector<1x128xf32>
    %c2_131 = arith.constant 2 : index
    %c1280_132 = arith.constant 1280 : index
    %277 = vector.load %arg2[%c2_131, %c1280_132] : memref<3x1408xf32, #tpu.memory_space<vmem>>, vector<1x128xf32>
    %278 = arith.mulf %264, %276 : vector<1x128xf32>
    %279 = arith.subf %277, %278 : vector<1x128xf32>
    %280 = vector.broadcast %276 : vector<1x128xf32> to vector<16x128xf32>
    %281 = arith.mulf %260, %280 : vector<16x128xf32>
    %282 = vector.broadcast %279 : vector<1x128xf32> to vector<16x128xf32>
    %283 = arith.addf %281, %282 : vector<16x128xf32>
    %c0_133 = arith.constant 0 : index
    %c0_134 = arith.constant 0 : index
    %c0_135 = arith.constant 0 : index
    %284 = vector.load %arg3[%c0_133, %c0_134, %c0_135] : memref<3x16x128xf32, #tpu.memory_space<vmem>>, vector<1x16x128xf32>
    %285 = vector.shape_cast %284 : vector<1x16x128xf32> to vector<16x128xf32>
    %286 = vector.shape_cast %283 : vector<16x128xf32> to vector<1x16x128xf32>
    tpu.vector_store %arg3[%c0_133, %c0_134, %c0_135], %286 {strides = array<i32>} : memref<3x16x128xf32, #tpu.memory_space<vmem>>, vector<1x16x128xf32>,
    %c1_136 = arith.constant 1 : index
    %c0_137 = arith.constant 0 : index
    %c0_138 = arith.constant 0 : index
    %287 = vector.load %arg3[%c1_136, %c0_137, %c0_138] : memref<3x16x128xf32, #tpu.memory_space<vmem>>, vector<1x16x128xf32>
    %288 = vector.shape_cast %287 : vector<1x16x128xf32> to vector<16x128xf32>
    %289 = vector.shape_cast %129 : vector<16x128xf32> to vector<1x16x128xf32>
    tpu.vector_store %arg3[%c1_136, %c0_137, %c0_138], %289 {strides = array<i32>} : memref<3x16x128xf32, #tpu.memory_space<vmem>>, vector<1x16x128xf32>,
    %c2_139 = arith.constant 2 : index
    %c0_140 = arith.constant 0 : index
    %c0_141 = arith.constant 0 : index
    %290 = vector.load %arg3[%c2_139, %c0_140, %c0_141] : memref<3x16x128xf32, #tpu.memory_space<vmem>>, vector<1x16x128xf32>
    %291 = vector.shape_cast %290 : vector<1x16x128xf32> to vector<16x128xf32>
    %292 = vector.shape_cast %130 : vector<16x128xf32> to vector<1x16x128xf32>
    tpu.vector_store %arg3[%c2_139, %c0_140, %c0_141], %292 {strides = array<i32>} : memref<3x16x128xf32, #tpu.memory_space<vmem>>, vector<1x16x128xf32>,
    return
  }
}

</mosaic_0001>

<bundles_post_ra>
// kernel: tpu_custom_call.1
= control target key start
LH: loop header
LB: loop body
LE: loop exit
PB: predicated region body
PF: predicated region fallthrough
CT: control target
= control target key end

     0   :  { %8 = vsyncpa [#allocation3], 0  ;;  %s16441_s0 = inlined_call_operand.hbm [shape: f32[2,16,128], index: 0, kind: input, shape index: {}]   ;;  %s16442_s1 = inlined_call_operand.hbm [shape: f32[128,1408], index: 1, kind: input, shape index: {}]   ;;  %s16443_s2 = inlined_call_operand.hbm [shape: f32[3,1408], index: 2, kind: input, shape index: {}]   ;;  %s16444_s3 = inlined_call_operand.hbm [shape: f32[3,16,128], index: 3, kind: output, shape index: {}]  }
   0x1   :  { %9 = vsyncpa [#allocation6], 0 }
   0x2   :  { %10 = vsyncpa [#allocation4], 0  ;;  %s12805_s12 = smov [#allocation5]   ;;  %s12711_s16 = scalar_lea.hbm %s16442_s1, 22528 }
   0x3   :  { %s28_s13 = sshll.u32 %s12805_s12, 4  ;;  %p12712_p0 = scmp.ne.s32.totalorder %s16442_s1, %s12711_s16  ;;  %s29_s13 = int_to_ptr.vmem [resolvable:$true] %s28_s13 }
   0x4   :  { %p12715_p1 = scmp.lt.u32.totalorder %s12711_s16, %s16442_s1 }
   0x6   :  { %p12717_p2 = pnand %p12715_p1, %p12712_p0 }
   0x8   :  { %12720 = shalt.err (!%p12717_p2)
}
   0x9   :  { %s12721_s21 = scalar_lea.vmem %s29_s13, 22528  ;;  %p12726_p4 = scmp.lt.s32.totalorder %s29_s13, %s29_s13 }
   0xa   :  { %p12722_p3 = scmp.ne.s32.totalorder %s29_s13, %s12721_s21  ;;  %p12727_p5 = scmp.lt.s32.totalorder %s12721_s21, %s12721_s21 }
   0xc   :  { %p12728_p6 = por %p12727_p5, %p12726_p4 }
   0xe   :  { %p12729_p7 = pnand %p12728_p6, %p12722_p3 }
  0x10   :  { %12732 = shalt.err (!%p12729_p7)
}
  0x11   :  { %s12806_s22 = smov 1408   ;;  %s12807_s23 = smov 88  }
  0x12   :  { %34 = dma.hbm_to_vmem [thread:$0]  %s16442_s1, 22528, %s29_s13, [#allocation6], %s12806_s22, %s12806_s22, %s12807_s23  }
  0x13   :  { %s12808_s26 = smov [#allocation2]   ;;  %s12733_s30 = scalar_lea.hbm %s16441_s0, 512 }
  0x14   :  { %s16_s27 = sshll.u32 %s12808_s26, 4  ;;  %p12734_p8 = scmp.ne.s32.totalorder %s16441_s0, %s12733_s30  ;;  %s17_s27 = int_to_ptr.vmem [resolvable:$true] %s16_s27 }
  0x15   :  { %p12737_p9 = scmp.lt.u32.totalorder %s12733_s30, %s16441_s0 }
  0x17   :  { %p12739_p10 = pnand %p12737_p9, %p12734_p8 }
  0x19   :  { %12742 = shalt.err (!%p12739_p10)
}
  0x1a   :  { %s12743_s8 = scalar_lea.vmem %s17_s27, 512  ;;  %p12748_p12 = scmp.lt.s32.totalorder %s17_s27, %s17_s27 }
  0x1b   :  { %p12744_p11 = scmp.ne.s32.totalorder %s17_s27, %s12743_s8  ;;  %p12749_p13 = scmp.lt.s32.totalorder %s12743_s8, %s12743_s8 }
  0x1d   :  { %p12750_p0 = por %p12749_p13, %p12748_p12 }
  0x1f   :  { %p12751_p1 = pnand %p12750_p0, %p12744_p11 }
  0x21   :  { %12754 = shalt.err (!%p12751_p1)
}
  0x22   :  { %s12809_s1 = smov 128   ;;  %s12810_s9 = smov 8  }
  0x23   :  { %22 = dma.hbm_to_vmem [thread:$0]  %s16441_s0, 512, %s17_s27, [#allocation3], %s12809_s1, %s12809_s1, %s12810_s9  }
  0x24   :  { %s12811_s12 = smov [#allocation7]   ;;  %s12755_s16 = scalar_lea.hbm %s16443_s2, 704 }
  0x25   :  { %s41_s13 = sshll.u32 %s12811_s12, 4  ;;  %p12756_p2 = scmp.ne.s32.totalorder %s16443_s2, %s12755_s16  ;;  %s42_s13 = int_to_ptr.vmem [resolvable:$true] %s41_s13 }
  0x26   :  { %p12759_p3 = scmp.lt.u32.totalorder %s12755_s16, %s16443_s2 }
  0x28   :  { %p12761_p4 = pnand %p12759_p3, %p12756_p2 }
  0x2a   :  { %12764 = shalt.err (!%p12761_p4)
}
  0x2b   :  { %s12765_s21 = scalar_lea.vmem %s42_s13, 704  ;;  %p12770_p6 = scmp.lt.s32.totalorder %s42_s13, %s42_s13 }
  0x2c   :  { %p12766_p5 = scmp.ne.s32.totalorder %s42_s13, %s12765_s21  ;;  %p12771_p7 = scmp.lt.s32.totalorder %s12765_s21, %s12765_s21 }
  0x2e   :  { %p12772_p8 = por %p12771_p7, %p12770_p6 }
  0x30   :  { %p12773_p9 = pnand %p12772_p8, %p12766_p5 }
  0x32   :  { %12776 = shalt.err (!%p12773_p9)
}
  0x33   :  { %44 = dma.hbm_to_vmem [thread:$0]  %s16443_s2, 704, %s42_s13, [#allocation6]  }
  0x34   :  { %12799 = dma.done.wait [#allocation3], 512  }
  0x35   :  { %12800 = vsyncadd [#allocation3], 4294966784 }
  0x36   :  { %12801 = dma.done.wait [#allocation6], 23232  }
  0x37   :  { %12802 = vsyncadd [#allocation6], 4294944064  ;;  %v59_v0 = vld [vmem:[#allocation5] sm:$0xff]  ;;  %v60_v1 = vld [vmem:[#allocation5 + $0x58] sm:$0xff]  ;;  %s12813_s2 = smov [#allocation8]  }
  0x38   :  { %v61_v2 = vld [vmem:[#allocation5 + $0xb0] sm:$0xff]  ;;  %v81_v3 = vand.u32 4294901760, %v59_v0  ;;  %v84_v4 = vand.u32 4294901760, %v60_v1  ;;  %v62_v5 = vld [vmem:[#allocation5 + $0x108] sm:$0xff]  ;;  %v63_v7 = vld [vmem:[#allocation5 + $0x160] sm:$0xff]  ;;  %s7744_s23 = sshll.u32 %s12813_s2, 4  ;;  %s7745_s23 = int_to_ptr.vmem [resolvable:$true] %s7744_s23 }
  0x39   :  { %v87_v6 = vand.u32 4294901760, %v61_v2  ;;  %v64_v8 = vld [vmem:[#allocation5 + $0x1b8] sm:$0xff]  ;;  %v90_v9 = vand.u32 4294901760, %v62_v5  ;;  %v93_v11 = vand.u32 4294901760, %v63_v7  ;;  %v12877_v14 = vld [vmem:[#allocation5 + $0x210] sm:$0xff]  ;;  %v12879_v15 = vld [vmem:[#allocation5 + $0x268] sm:$0xff]  ;;  %p12782_p11 = scmp.lt.s32.totalorder %s7745_s23, %s7745_s23 }
  0x3a   :  { %v12873_v10 = vpack.c.bf16 %v84_v4, %v81_v3  ;;  %v96_v12 = vand.u32 4294901760, %v64_v8  ;;  %v54_v16 = vld [vmem:[#allocation2] sm:$0xff]  ;;  %v99_v19 = vand.u32 4294901760, %v12877_v14  ;;  %v102_v20 = vand.u32 4294901760, %v12879_v15  ;;  %v68_v22 = vld [vmem:[#allocation5 + $0x318] sm:$0xff]  ;;  %v55_v29 = vld [vmem:[#allocation2 + $0x8] sm:$0xff] }
  0x3b   :  { %v12875_v13 = vpack.c.bf16 %v90_v9, %v87_v6  ;;  %v12883_v17 = vand.u32 4294901760, %v54_v16  ;;  %v67_v21 = vld [vmem:[#allocation5 + $0x2c0] sm:$0xff]  ;;  %v12895_v25 = vsub.f32 %v59_v0, %v81_v3  ;;  %v108_v28 = vand.u32 4294901760, %v68_v22  ;;  %v69_v30 = vld [vmem:[#allocation5 + $0x370] sm:$0xff]  ;;  %v70_v31 = vld [vmem:[#allocation5 + $0x3c8] sm:$0xff]  ;;  %s12777_s24 = scalar_lea.vmem %s7745_s23, 768 }
  0x3c   :  { %10629 = vmatprep.subr.bf16.mxu0 %v12873_v10  ;;  %v12886_v18 = vpack.c.bf16 %v96_v12, %v93_v11  ;;  %v12898_v26 = vpack.c.bf16 %v102_v20, %v99_v19  ;;  %v105_v27 = vand.u32 4294901760, %v67_v21  ;;  %v71_v33 = vld [vmem:[#allocation5 + $0x420] sm:$0xff]  ;;  %v72_v34 = vld [vmem:[#allocation5 + $0x478] sm:$0xff]  ;;  %v73_v35 = vld [vmem:[#allocation5 + $0x4d0] sm:$0xff]  ;;  %v12903_v36 = vsub.f32 %v60_v1, %v84_v4  ;;  %p12778_p10 = scmp.ne.s32.totalorder %s7745_s23, %s12777_s24  ;;  %p12783_p12 = scmp.lt.s32.totalorder %s12777_s24, %s12777_s24 }
  0x3d   :  { %10631 = vmatpush3.bf16.msra.mxu0 %v12873_v10  ;;  %v12891_v23 = vsub.f32 %v54_v16, %v12883_v17  ;;  %v74_v37 = vld [vmem:[#allocation5 + $0x528] sm:$0xff]  ;;  %v184_v39 = vand.u32 4294901760, %v12895_v25  ;;  %v12907_v40 = vand.u32 4294901760, %v55_v29  ;;  %v12909_v41 = vsub.f32 %v61_v2, %v87_v6 }
  0x3e   :  { %10633 = vmatprep.subr.bf16.mxu0 %v12875_v13  ;;  %v12912_v42 = vpack.c.bf16 %v108_v28, %v105_v27  ;;  %v111_v43 = vand.u32 4294901760, %v69_v30  ;;  %v114_v44 = vand.u32 4294901760, %v70_v31  ;;  %v117_v45 = vand.u32 4294901760, %v71_v33  ;;  %p12784_p13 = por %p12783_p12, %p12782_p11 }
  0x3f   :  { %v163_v24 = vand.u32 4294901760, %v12891_v23  ;;  %v120_v46 = vand.u32 4294901760, %v72_v34  ;;  %v123_v47 = vand.u32 4294901760, %v73_v35  ;;  %v126_v48 = vand.u32 4294901760, %v74_v37 }
  0x40   :  { %v191_v49 = vand.u32 4294901760, %v12903_v36  ;;  %v12915_v50 = vsub.f32 %v62_v5, %v90_v9  ;;  %v12917_v51 = vsub.f32 %v63_v7, %v93_v11  ;;  %v185_v52 = vsub.f32 %v12895_v25, %v184_v39  ;;  %p12785_p0 = pnand %p12784_p13, %p12778_p10 }
  0x41   :  { %10635 = vmatpush3.bf16.msra.mxu0 %v12875_v13  ;;  %v164_v32 = vsub.f32 %v12891_v23, %v163_v24  ;;  %v12922_v53 = vsub.f32 %v55_v29, %v12907_v40  ;;  %v198_v54 = vand.u32 4294901760, %v12909_v41  ;;  %v12925_v55 = vsub.f32 %v64_v8, %v96_v12 }
  0x42   :  { %10637 = vmatprep.subr.bf16.mxu0 %v12886_v18  ;;  %v12928_v56 = vpack.c.bf16 %v114_v44, %v111_v43  ;;  %v12930_v57 = vpack.c.bf16 %v120_v46, %v117_v45  ;;  %v12932_v58 = vpack.c.bf16 %v126_v48, %v123_v47  ;;  %v192_v59 = vsub.f32 %v12903_v36, %v191_v49 }
  0x43   :  { %v165_v38 = vand.u32 4294901760, %v164_v32  ;;  %v205_v60 = vand.u32 4294901760, %v12915_v50  ;;  %v212_v61 = vand.u32 4294901760, %v12917_v51  ;;  %v186_v62 = vand.u32 4294901760, %v185_v52 }
  0x44   :  { %v173_v63 = vand.u32 4294901760, %v12922_v53  ;;  %v199_v0 = vsub.f32 %v12909_v41, %v198_v54  ;;  %v219_v1 = vand.u32 4294901760, %v12925_v55  ;;  %v12943_v2 = vsub.f32 %v12877_v14, %v99_v19 }
  0x45   :  { %10639 = vmatpush3.bf16.msra.mxu0 %v12886_v18  ;;  %8770 = vmatprep.mubr.f32.mxu0 %v165_v38  ;;  %v12946_v3 = vsub.f32 %v12879_v15, %v102_v20  ;;  %v12948_v4 = vsub.f32 %v67_v21, %v105_v27  ;;  %v12950_v5 = vsub.f32 %v68_v22, %v108_v28  ;;  %v193_v11 = vand.u32 4294901760, %v192_v59 }
  0x46   :  { %10641 = vmatprep.subr.bf16.mxu0 %v12898_v26  ;;  %v12952_v6 = vsub.f32 %v69_v30, %v111_v43  ;;  %v12954_v7 = vsub.f32 %v70_v31, %v114_v44  ;;  %v12956_v8 = vsub.f32 %v71_v33, %v117_v45  ;;  %v12958_v9 = vsub.f32 %v72_v34, %v120_v46 }
  0x47   :  { %v206_v12 = vsub.f32 %v12915_v50, %v205_v60  ;;  %v12961_v14 = vsub.f32 %v73_v35, %v123_v47  ;;  %v12963_v16 = vsub.f32 %v74_v37, %v126_v48  ;;  %v174_v15 = vsub.f32 %v12922_v53, %v173_v63 }
  0x48   :  { %v200_v19 = vand.u32 4294901760, %v199_v0  ;;  %v213_v20 = vsub.f32 %v12917_v51, %v212_v61  ;;  %v220_v21 = vsub.f32 %v12925_v55, %v219_v1  ;;  %v226_v22 = vand.u32 4294901760, %v12943_v2 }
  0x49   :  { %10643 = vmatpush3.bf16.msra.mxu0 %v12898_v26  ;;  %v233_v27 = vand.u32 4294901760, %v12946_v3  ;;  %v240_v28 = vand.u32 4294901760, %v12948_v4  ;;  %v247_v29 = vand.u32 4294901760, %v12950_v5  ;;  %v254_v30 = vand.u32 4294901760, %v12952_v6 }
  0x4a   :  { %10645 = vmatprep.subr.bf16.mxu0 %v12912_v42  ;;  %v261_v31 = vand.u32 4294901760, %v12954_v7  ;;  %v268_v32 = vand.u32 4294901760, %v12956_v8  ;;  %v275_v33 = vand.u32 4294901760, %v12958_v9  ;;  %v282_v34 = vand.u32 4294901760, %v12961_v14 }
  0x4b   :  { %v289_v35 = vand.u32 4294901760, %v12963_v16  ;;  %v12982_v37 = vpack.c.bf16 %v191_v49, %v184_v39  ;;  %v12984_v38 = vpack.c.bf16 %v205_v60, %v198_v54  ;;  %v10660_v43 = vpack.c.bf16 %v193_v11, %v186_v62 }
  0x4c   :  { %v12987_v44 = vpack.c.bf16 %v219_v1, %v212_v61  ;;  %v12989_v45 = vpack.c.bf16 %v233_v27, %v226_v22  ;;  %v12991_v46 = vpack.c.bf16 %v247_v29, %v240_v28  ;;  %v207_v47 = vand.u32 4294901760, %v206_v12 }
  0x4d   :  { %10647 = vmatpush3.bf16.msra.mxu0 %v12912_v42  ;;  %v12994_v48 = vpack.c.bf16 %v261_v31, %v254_v30  ;;  %v12996_v52 = vpack.c.bf16 %v275_v33, %v268_v32  ;;  %v12998_v39 = vpack.c.bf16 %v289_v35, %v282_v34  ;;  %v175_v49 = vand.u32 4294901760, %v174_v15 }
  0x4e   :  { %10649 = vmatprep.subr.bf16.mxu0 %v12928_v56  ;;  %v214_v54 = vand.u32 4294901760, %v213_v20  ;;  %v221_v59 = vand.u32 4294901760, %v220_v21  ;;  %v10664_v60 = vpack.c.bf16 %v207_v47, %v200_v19  ;;  %v227_v61 = vsub.f32 %v12943_v2, %v226_v22 }
  0x4f   :  { %v234_v62 = vsub.f32 %v12946_v3, %v233_v27  ;;  %v241_v12 = vsub.f32 %v12948_v4, %v240_v28  ;;  %v248_v15 = vsub.f32 %v12950_v5, %v247_v29  ;;  %v255_v20 = vsub.f32 %v12952_v6, %v254_v30 }
  0x50   :  { %v10668_v0 = vpack.c.bf16 %v221_v59, %v214_v54  ;;  %v228_v1 = vand.u32 4294901760, %v227_v61  ;;  %v262_v27 = vsub.f32 %v12954_v7, %v261_v31  ;;  %v276_v28 = vsub.f32 %v12958_v9, %v275_v33 }
  0x51   :  { %10651 = vmatpush3.bf16.msra.mxu0 %v12928_v56  ;;  %v235_v11 = vand.u32 4294901760, %v234_v62  ;;  %v242_v21 = vand.u32 4294901760, %v241_v12  ;;  %v249_v22 = vand.u32 4294901760, %v248_v15  ;;  %v290_v61 = vsub.f32 %v12963_v16, %v289_v35  ;;  %v13129_v12 = vld [vmem:[#allocation5 + $0x530] sm:$0xff] }
  0x52   :  { %10653 = vmatprep.subr.bf16.mxu0 %v12930_v57  ;;  %v263_v54 = vand.u32 4294901760, %v262_v27  ;;  %v277_v30 = vand.u32 4294901760, %v276_v28  ;;  %v10692_v33 = vpack.c.bf16 %v12903_v36, %v12895_v25  ;;  %v10700_v35 = vpack.c.bf16 %v12925_v55, %v12917_v51  ;;  %v810_v55 = vld [vmem:[#allocation5 + $0x168] sm:$0xff] }
  0x53   :  { %v10672_v19 = vpack.c.bf16 %v235_v11, %v228_v1  ;;  %v10676_v47 = vpack.c.bf16 %v249_v22, %v242_v21  ;;  %v10704_v1 = vpack.c.bf16 %v12946_v3, %v12943_v2  ;;  %v10708_v25 = vpack.c.bf16 %v12950_v5, %v12948_v4  ;;  %v813_v2 = vld [vmem:[#allocation5 + $0x270] sm:$0xff] }
  0x54   :  { %v10712_v36 = vpack.c.bf16 %v12954_v7, %v12952_v6  ;;  %v849_v4 = vand.u32 4294901760, %v813_v2  ;;  %v13101_v6 = vld [vmem:[#allocation5 + $0x2c8] sm:$0xff]  ;;  %v13103_v7 = vld [vmem:[#allocation5 + $0x320] sm:$0xff] }
  0x55   :  { %10655 = vmatpush3.bf16.msra.mxu0 %v12930_v57 }
  0x56   :  { %10657 = vmatprep.subr.bf16.mxu0 %v12932_v58 }
  0x59   :  { %10659 = vmatpush3.bf16.msra.mxu0 %v12932_v58 }
  0x5a   :  { %10661 = vmatprep.subr.bf16.mxu0 %v10660_v43 }
  0x5c   :  { %8771 = vmatmul.mubr.f32.vlgmr.msra.gmra.mrb[0].mxu0 %v175_v49  ;;  %v256_v49 = vand.u32 4294901760, %v255_v20  ;;  %v873_v20 = vand.u32 4294901760, %v13129_v12 }
  0x5d   :  { %10663 = vmatpush3.bf16.msra.mxu0 %v10660_v43  ;;  %8805 = vmatprep.mubr.f32.mxu0 %v12883_v17  ;;  %v269_v43 = vsub.f32 %v12956_v8, %v268_v32  ;;  %v291_v32 = vand.u32 4294901760, %v290_v61 }
  0x5e   :  { %10665 = vmatprep.subr.bf16.mxu0 %v10664_v60  ;;  %v10680_v59 = vpack.c.bf16 %v263_v54, %v256_v49 }
  0x5f   :  { %v270_v29 = vand.u32 4294901760, %v269_v43 }
  0x61   :  { %10667 = vmatpush3.bf16.msra.mxu0 %v10664_v60  ;;  %v283_v60 = vsub.f32 %v12961_v14, %v282_v34  ;;  %v10684_v31 = vpack.c.bf16 %v277_v30, %v270_v29  ;;  %v10696_v34 = vpack.c.bf16 %v12915_v50, %v12909_v41  ;;  %v10716_v41 = vpack.c.bf16 %v12958_v9, %v12956_v8 }
  0x62   :  { %10669 = vmatprep.subr.bf16.mxu0 %v10668_v0  ;;  %v10720_v50 = vpack.c.bf16 %v12963_v16, %v12961_v14  ;;  %v852_v8 = vand.u32 4294901760, %v13101_v6  ;;  %v855_v9 = vand.u32 4294901760, %v13103_v7  ;;  %v13111_v16 = vld [vmem:[#allocation5 + $0x378] sm:$0xff] }
  0x63   :  { %v284_v62 = vand.u32 4294901760, %v283_v60 }
  0x64   :  { %v13109_v14 = vpack.c.bf16 %v855_v9, %v852_v8 }
  0x65   :  { %10671 = vmatpush3.bf16.msra.mxu0 %v10668_v0  ;;  %v10688_v0 = vpack.c.bf16 %v291_v32, %v284_v62 }
  0x66   :  { %10673 = vmatprep.subr.bf16.mxu0 %v10672_v19 }
  0x69   :  { %10675 = vmatpush3.bf16.msra.mxu0 %v10672_v19 }
  0x6a   :  { %10677 = vmatprep.subr.bf16.mxu0 %v10676_v47 }
  0x6d   :  { %10679 = vmatpush3.bf16.msra.mxu0 %v10676_v47 }
  0x6e   :  { %10681 = vmatprep.subr.bf16.mxu0 %v10680_v59 }
  0x71   :  { %10683 = vmatpush3.bf16.msra.mxu0 %v10680_v59 }
  0x72   :  { %10685 = vmatprep.subr.bf16.mxu0 %v10684_v31 }
  0x75   :  { %10687 = vmatpush3.bf16.msra.mxu0 %v10684_v31 }
  0x76   :  { %10689 = vmatprep.subr.bf16.mxu0 %v10688_v0 }
  0x79   :  { %10691 = vmatpush3.bf16.msra.mxu0 %v10688_v0 }
  0x7a   :  { %10693 = vmatprep.subr.bf16.mxu0 %v10692_v33 }
  0x7c   :  { %8806 = vmatmul.mubr.f32.vlgmr.msra.gmra.mrb[0].mxu0 %v12907_v40 }
  0x7d   :  { %10695 = vmatpush3.bf16.msra.mxu0 %v10692_v33  ;;  %8840 = vmatprep.mubr.f32.mxu0 %v12891_v23 }
  0x7e   :  { %10697 = vmatprep.subr.bf16.mxu0 %v10696_v34 }
  0x81   :  { %10699 = vmatpush3.bf16.msra.mxu0 %v10696_v34 }
  0x82   :  { %10701 = vmatprep.subr.bf16.mxu0 %v10700_v35 }
  0x85   :  { %10703 = vmatpush3.bf16.msra.mxu0 %v10700_v35 }
  0x86   :  { %10705 = vmatprep.subr.bf16.mxu0 %v10704_v1 }
  0x89   :  { %10707 = vmatpush3.bf16.msra.mxu0 %v10704_v1 }
  0x8a   :  { %10709 = vmatprep.subr.bf16.mxu0 %v10708_v25 }
  0x8d   :  { %10711 = vmatpush3.bf16.msra.mxu0 %v10708_v25 }
  0x8e   :  { %10713 = vmatprep.subr.bf16.mxu0 %v10712_v36 }
  0x91   :  { %10715 = vmatpush3.bf16.msra.mxu0 %v10712_v36 }
  0x92   :  { %10717 = vmatprep.subr.bf16.mxu0 %v10716_v41 }
  0x95   :  { %10719 = vmatpush3.bf16.msra.mxu0 %v10716_v41 }
  0x96   :  { %10721 = vmatprep.subr.bf16.mxu0 %v10720_v50 }
  0x99   :  { %10723 = vmatpush3.bf16.msra.mxu0 %v10720_v50 }
  0x9a   :  { %10725 = vmatprep.subr.bf16.mxu0 %v12873_v10 }
  0x9c   :  { %8841 = vmatmul.mubr.f32.vlgmr.msra.gmra.mrb[0].mxu0 %v12922_v53 }
  0x9d   :  { %10727 = vmatpush3.bf16.msra.mxu0 %v12873_v10  ;;  %8875 = vmatprep.mubr.f32.mxu0 %v163_v24  ;;  %v808_v24 = vld [vmem:[#allocation5 + $0xb8] sm:$0xff] }
  0x9e   :  { %10729 = vmatprep.subr.bf16.mxu0 %v12875_v13 }
  0xa1   :  { %10731 = vmatpush3.bf16.msra.mxu0 %v12875_v13 }
  0xa2   :  { %10733 = vmatprep.subr.bf16.mxu0 %v12886_v18 }
  0xa5   :  { %10735 = vmatpush3.bf16.msra.mxu0 %v12886_v18 }
  0xa6   :  { %10737 = vmatprep.subr.bf16.mxu0 %v12898_v26 }
  0xa9   :  { %10739 = vmatpush3.bf16.msra.mxu0 %v12898_v26 }
  0xaa   :  { %10741 = vmatprep.subr.bf16.mxu0 %v12912_v42 }
  0xad   :  { %10743 = vmatpush3.bf16.msra.mxu0 %v12912_v42 }
  0xae   :  { %10745 = vmatprep.subr.bf16.mxu0 %v12928_v56 }
  0xb1   :  { %10747 = vmatpush3.bf16.msra.mxu0 %v12928_v56 }
  0xb2   :  { %10749 = vmatprep.subr.bf16.mxu0 %v12930_v57 }
  0xb5   :  { %10751 = vmatpush3.bf16.msra.mxu0 %v12930_v57 }
  0xb6   :  { %10753 = vmatprep.subr.bf16.mxu0 %v12932_v58 }
  0xb9   :  { %10755 = vmatpush3.bf16.msra.mxu0 %v12932_v58 }
  0xba   :  { %10757 = vmatprep.subr.bf16.mxu0 %v12982_v37 }
  0xbc   :  { %8876 = vmatmul.mubr.f32.vlgmr.msra.gmra.mrb[0].mxu0 %v173_v63  ;;  %v812_v63 = vld [vmem:[#allocation5 + $0x218] sm:$0xff] }
  0xbd   :  { %10759 = vmatpush3.bf16.msra.mxu0 %v12982_v37  ;;  %8910 = vmatprep.mubr.f32.mxu0 %v12883_v17  ;;  %v846_v3 = vand.u32 4294901760, %v812_v63  ;;  %v13113_v37 = vld [vmem:[#allocation5 + $0x3d0] sm:$0xff] }
  0xbe   :  { %10761 = vmatprep.subr.bf16.mxu0 %v12984_v38 }
  0xbf   :  { %v13099_v5 = vpack.c.bf16 %v849_v4, %v846_v3 }
  0xc1   :  { %10763 = vmatpush3.bf16.msra.mxu0 %v12984_v38  ;;  %v858_v38 = vand.u32 4294901760, %v13111_v16 }
  0xc2   :  { %10765 = vmatprep.subr.bf16.mxu0 %v12987_v44 }
  0xc5   :  { %10767 = vmatpush3.bf16.msra.mxu0 %v12987_v44  ;;  %v861_v44 = vand.u32 4294901760, %v13113_v37 }
  0xc6   :  { %10769 = vmatprep.subr.bf16.mxu0 %v12989_v45 }
  0xc9   :  { %10771 = vmatpush3.bf16.msra.mxu0 %v12989_v45  ;;  %v13119_v45 = vpack.c.bf16 %v861_v44, %v858_v38 }
  0xca   :  { %10773 = vmatprep.subr.bf16.mxu0 %v12991_v46 }
  0xcd   :  { %10775 = vmatpush3.bf16.msra.mxu0 %v12991_v46  ;;  %v13121_v46 = vld [vmem:[#allocation5 + $0x428] sm:$0xff] }
  0xce   :  { %10777 = vmatprep.subr.bf16.mxu0 %v12994_v48 }
  0xd1   :  { %10779 = vmatpush3.bf16.msra.mxu0 %v12994_v48  ;;  %v13123_v48 = vld [vmem:[#allocation5 + $0x480] sm:$0xff] }
  0xd2   :  { %10781 = vmatprep.subr.bf16.mxu0 %v12996_v52  ;;  %v867_v11 = vand.u32 4294901760, %v13123_v48 }
  0xd5   :  { %10783 = vmatpush3.bf16.msra.mxu0 %v12996_v52  ;;  %v13125_v52 = vld [vmem:[#allocation5 + $0x4d8] sm:$0xff] }
  0xd6   :  { %10785 = vmatprep.subr.bf16.mxu0 %v12998_v39  ;;  %v870_v15 = vand.u32 4294901760, %v13125_v52 }
  0xd8   :  { %v13145_v21 = vpack.c.bf16 %v873_v20, %v870_v15 }
  0xd9   :  { %10787 = vmatpush3.bf16.msra.mxu0 %v12998_v39  ;;  %v864_v39 = vand.u32 4294901760, %v13121_v46 }
  0xda   :  { %10789 = vmatprep.subr.bf16.mxu0 %v12873_v10 }
  0xdb   :  { %v13139_v19 = vpack.c.bf16 %v867_v11, %v864_v39 }
  0xdc   :  { %8911 = vmatmul.mubr.f32.vlgmr.msra.gmra.mrb[0].mxu0 %v12907_v40 }
  0xdd   :  { %10791 = vmatpush3.bf16.msra.mxu0 %v12873_v10  ;;  %8945 = vmatprep.mubr.f32.mxu0 %v12883_v17  ;;  %v806_v10 = vld [vmem:[#allocation5 + $0x8] sm:$0xff] }
  0xde   :  { %10793 = vmatprep.subr.bf16.mxu0 %v12875_v13  ;;  %v828_v17 = vand.u32 4294901760, %v806_v10 }
  0xe0   :  { %v13147_v22 = vsub.f32 %v806_v10, %v828_v17  ;;  %v13192_v10 = vsub.f32 %v812_v63, %v846_v3 }
  0xe1   :  { %10795 = vmatpush3.bf16.msra.mxu0 %v12875_v13  ;;  %v807_v13 = vld [vmem:[#allocation5 + $0x60] sm:$0xff] }
  0xe2   :  { %10797 = vmatprep.subr.bf16.mxu0 %v12886_v18  ;;  %v16460_v43 = vand.u32 4294901760, %v13147_v22 }
  0xe4   :  { %v932_v49 = vsub.f32 %v13147_v22, %v16460_v43  ;;  %v792_v43 = vlaneseq }
  0xe5   :  { %10799 = vmatpush3.bf16.msra.mxu0 %v12886_v18  ;;  %v831_v18 = vand.u32 4294901760, %v807_v13 }
  0xe6   :  { %10801 = vmatprep.subr.bf16.mxu0 %v12898_v26  ;;  %v933_v59 = vand.u32 4294901760, %v932_v49 }
  0xe7   :  { %v13087_v23 = vpack.c.bf16 %v831_v18, %v828_v17  ;;  %v13149_v27 = vsub.f32 %v807_v13, %v831_v18  ;;  %v13194_v13 = vsub.f32 %v813_v2, %v849_v4 }
  0xe9   :  { %10803 = vmatpush3.bf16.msra.mxu0 %v12898_v26  ;;  %v809_v26 = vld [vmem:[#allocation5 + $0x110] sm:$0xff]  ;;  %10821 = vmatprep.subr.bf16.mxu1 %v13087_v23  ;;  %v16459_v47 = vand.u32 4294901760, %v13149_v27 }
  0xea   :  { %10805 = vmatprep.subr.bf16.mxu0 %v12912_v42  ;;  %v837_v51 = vand.u32 4294901760, %v809_v26  ;;  %10823 = vmatpush3.bf16.msra.mxu1 %v13087_v23 }
  0xeb   :  { %v939_v54 = vsub.f32 %v13149_v27, %v16459_v47 }
  0xec   :  { %v13164_v29 = vsub.f32 %v809_v26, %v837_v51  ;;  %v16453_v26 = vand.u32 4294901760, %v13194_v13 }
  0xed   :  { %10807 = vmatpush3.bf16.msra.mxu0 %v12912_v42  ;;  %v834_v42 = vand.u32 4294901760, %v808_v24  ;;  %v940_v30 = vand.u32 4294901760, %v939_v54 }
  0xee   :  { %10809 = vmatprep.subr.bf16.mxu0 %v12928_v56  ;;  %v16457_v61 = vand.u32 4294901760, %v13164_v29 }
  0xef   :  { %v13091_v53 = vpack.c.bf16 %v837_v51, %v834_v42  ;;  %v13162_v28 = vsub.f32 %v808_v24, %v834_v42  ;;  %v13169_v31 = vpack.c.bf16 %v940_v30, %v933_v59  ;;  %v16454_v24 = vand.u32 4294901760, %v13192_v10 }
  0xf0   :  { %v953_v32 = vsub.f32 %v13164_v29, %v16457_v61 }
  0xf1   :  { %10811 = vmatpush3.bf16.msra.mxu0 %v12928_v56  ;;  %v811_v56 = vld [vmem:[#allocation5 + $0x1c0] sm:$0xff]  ;;  %10825 = vmatprep.subr.bf16.mxu1 %v13091_v53  ;;  %v16458_v60 = vand.u32 4294901760, %v13162_v28  ;;  %v974_v51 = vsub.f32 %v13192_v10, %v16454_v24 }
  0xf2   :  { %10813 = vmatprep.subr.bf16.mxu0 %v12930_v57  ;;  %10827 = vmatpush3.bf16.msra.mxu1 %v13091_v53  ;;  %v954_v35 = vand.u32 4294901760, %v953_v32 }
  0xf3   :  { %v946_v62 = vsub.f32 %v13162_v28, %v16458_v60 }
  0xf5   :  { %10815 = vmatpush3.bf16.msra.mxu0 %v12930_v57  ;;  %v843_v57 = vand.u32 4294901760, %v811_v56  ;;  %v947_v34 = vand.u32 4294901760, %v946_v62 }
  0xf6   :  { %10817 = vmatprep.subr.bf16.mxu0 %v12932_v58 }
  0xf7   :  { %v13179_v33 = vsub.f32 %v811_v56, %v843_v57  ;;  %v13184_v36 = vpack.c.bf16 %v954_v35, %v947_v34  ;;  %v13207_v56 = vsub.f32 %v13103_v7, %v855_v9  ;;  %v13221_v7 = vsub.f32 %v13111_v16, %v858_v38 }
  0xf8   :  { %v13246_v38 = vsub.f32 %v13123_v48, %v867_v11  ;;  %v13263_v48 = vsub.f32 %v13129_v12, %v873_v20 }
  0xf9   :  { %10819 = vmatpush3.bf16.msra.mxu0 %v12932_v58  ;;  %v16455_v25 = vand.u32 4294901760, %v13179_v33  ;;  %v16451_v2 = vand.u32 4294901760, %v13207_v56  ;;  %v16450_v59 = vand.u32 4294901760, %v13221_v7 }
  0xfa   :  { %16677 = vst [vmem:[#allocation12_spill] sm:$0xff] %v13263_v48 }
  0xfb   :  { %v967_v50 = vsub.f32 %v13179_v33, %v16455_v25  ;;  %v1002_v32 = vsub.f32 %v13221_v7, %v16450_v59 }
  0xfc   :  { %8946 = vmatmul.mubr.f32.vlgmr.msra.gmra.mrb[0].mxu0 %v12907_v40  ;;  %v840_v40 = vand.u32 4294901760, %v810_v55 }
  0xfd   :  { %v968_v18 = vand.u32 4294901760, %v967_v50 }
  0xfe   :  { %v13095_v58 = vpack.c.bf16 %v843_v57, %v840_v40  ;;  %v13177_v0 = vsub.f32 %v810_v55, %v840_v40  ;;  %v13204_v55 = vsub.f32 %v13101_v6, %v852_v8  ;;  %v981_v40 = vsub.f32 %v13194_v13, %v16453_v26 }
  0xff   :  { %v975_v57 = vand.u32 4294901760, %v974_v51  ;;  %v995_v6 = vsub.f32 %v13207_v56, %v16451_v2  ;;  %v13224_v8 = vsub.f32 %v13113_v37, %v861_v44  ;;  %v13241_v37 = vsub.f32 %v13121_v46, %v864_v39 }
 0x100   :  { %10829 = vmatprep.subr.bf16.mxu1 %v13095_v58  ;;  %v16456_v1 = vand.u32 4294901760, %v13177_v0  ;;  %v16452_v63 = vand.u32 4294901760, %v13204_v55  ;;  %v982_v3 = vand.u32 4294901760, %v981_v40  ;;  %v1003_v44 = vand.u32 4294901760, %v1002_v32 }
 0x101   :  { %10831 = vmatpush3.bf16.msra.mxu1 %v13095_v58  ;;  %v996_v54 = vand.u32 4294901760, %v995_v6  ;;  %v16449_v30 = vand.u32 4294901760, %v13224_v8  ;;  %v16448_v35 = vand.u32 4294901760, %v13241_v37  ;;  %v13258_v46 = vsub.f32 %v13125_v52, %v870_v15 }
 0x102   :  { %10833 = vmatprep.subr.bf16.mxu1 %v13099_v5  ;;  %v960_v41 = vsub.f32 %v13177_v0, %v16456_v1  ;;  %v988_v4 = vsub.f32 %v13204_v55, %v16452_v63  ;;  %v13226_v9 = vpack.c.bf16 %v982_v3, %v975_v57  ;;  %v16445_v51 = vand.u32 4294901760, %v13263_v48 }
 0x103   :  { %v1009_v16 = vsub.f32 %v13224_v8, %v16449_v30  ;;  %v13286_v6 = vpack.c.bf16 %v13164_v29, %v13162_v28  ;;  %v13298_v32 = vpack.c.bf16 %v13207_v56, %v13204_v55 }
 0x104   :  { %v961_v17 = vand.u32 4294901760, %v960_v41  ;;  %v989_v49 = vand.u32 4294901760, %v988_v4  ;;  %v16447_v41 = vand.u32 4294901760, %v13246_v38  ;;  %v1037_v15 = vsub.f32 %v13263_v48, %v16445_v51 }
 0x105   :  { %10835 = vmatpush3.bf16.msra.mxu1 %v13099_v5  ;;  %v1010_v34 = vand.u32 4294901760, %v1009_v16  ;;  %v13282_v4 = vpack.c.bf16 %v13149_v27, %v13147_v22  ;;  %v13302_v16 = vpack.c.bf16 %v13224_v8, %v13221_v7 }
 0x106   :  { %10837 = vmatprep.subr.bf16.mxu1 %v13109_v14  ;;  %v13198_v42 = vpack.c.bf16 %v968_v18, %v961_v17  ;;  %v13230_v62 = vpack.c.bf16 %v996_v54, %v989_v49  ;;  %v1016_v17 = vsub.f32 %v13241_v37, %v16448_v35  ;;  %v1023_v39 = vsub.f32 %v13246_v38, %v16447_v41 }
 0x107   :  { %v13250_v50 = vpack.c.bf16 %v1010_v34, %v1003_v44  ;;  %v16446_v18 = vand.u32 4294901760, %v13258_v46  ;;  %v1038_v57 = vand.u32 4294901760, %v1037_v15  ;;  %v13290_v49 = vpack.c.bf16 %v13179_v33, %v13177_v0 }
 0x108   :  { %v1017_v11 = vand.u32 4294901760, %v1016_v17  ;;  %v1024_v40 = vand.u32 4294901760, %v1023_v39  ;;  %v13294_v54 = vpack.c.bf16 %v13194_v13, %v13192_v10  ;;  %v13306_v44 = vpack.c.bf16 %v13246_v38, %v13241_v37  ;;  %v7757_v17 = vld [vmem:[#allocation7] ss:$0 sm:$0xff] }
 0x109   :  { %10839 = vmatpush3.bf16.msra.mxu1 %v13109_v14  ;;  %v1030_v52 = vsub.f32 %v13258_v46, %v16446_v18  ;;  %v13310_v34 = vpack.c.bf16 %v13263_v48, %v13258_v46  ;;  %v13312_v48 = vshrl.u32 %v792_v43, 7 }
 0x10a   :  { %10841 = vmatprep.subr.bf16.mxu1 %v13119_v45  ;;  %v13276_v12 = vpack.c.bf16 %v1024_v40, %v1017_v11 }
 0x10b   :  { %v1031_v20 = vand.u32 4294901760, %v1030_v52  ;;  %16678 = vst [vmem:[#allocation13_spill] sm:$0xff] %v13312_v48 }
 0x10d   :  { %10843 = vmatpush3.bf16.msra.mxu1 %v13119_v45  ;;  %v13278_v3 = vpack.c.bf16 %v1038_v57, %v1031_v20 }
 0x10e   :  { %10845 = vmatprep.subr.bf16.mxu1 %v13139_v19 }
 0x111   :  { %10847 = vmatpush3.bf16.msra.mxu1 %v13139_v19 }
 0x112   :  { %10849 = vmatprep.subr.bf16.mxu1 %v13145_v21 }
 0x115   :  { %10851 = vmatpush3.bf16.msra.mxu1 %v13145_v21 }
 0x116   :  { %10853 = vmatprep.subr.bf16.mxu1 %v13169_v31 }
 0x1cf   :  { %v8947_v39 = vpop.f32.mrb[0].mxu0 }
 0x1d0   :  { %v12548_v11 = vadd.f32 %v8947_v39, %v7757_v17  ;;  %v754_v40 = vpop.f32.mrb[1].mxu0 }
 0x1d1   :  { %v12549_v52 = vadd.f32 %v7757_v17, %v754_v40 }
 0x1d2   :  { %v774_v15 = vmul.f32 %v12548_v11, %v12548_v11 }
 0x1d3   :  { %v764_v20 = vadd.f32 %v12549_v52, %v12548_v11  ;;  %v773_v57 = vmul.f32 %v12549_v52, %v12549_v52 }
 0x1d5   :  { %v765_v51 = vrot.slane %v764_v20, 4  ;;  %v775_v18 = vadd.f32 %v774_v15, %v773_v57  ;;  %v13315_v15 = vsub.s32 0, %v13312_v48 }
 0x1d7   :  { %v766_v41 = vadd.f32 %v765_v51, %v764_v20  ;;  %v776_v35 = vrot.slane %v775_v18, 4  ;;  %v787_v51 = vld [vmem:[#allocation7 + $0x1] sm:$0x1] }
 0x1d9   :  { %v767_v30 = vrot.slane %v766_v41, 2  ;;  %v777_v59 = vadd.f32 %v776_v35, %v775_v18 }
 0x1db   :  { %v768_v2 = vadd.f32 %v767_v30, %v766_v41  ;;  %v778_v63 = vrot.slane %v777_v59, 2  ;;  %v789_v41 = vld [vmem:[#allocation7 + $0x2] sm:$0x1] }
 0x1dd   :  { %v769_v26 = vrot.slane %v768_v2, 1  ;;  %v779_v24 = vadd.f32 %v778_v63, %v777_v59 }
 0x1df   :  { %v770_v25 = vadd.f32 %v769_v26, %v768_v2  ;;  %v780_v1 = vrot.slane %v779_v24, 1 }
 0x1e1   :  { %v772_v61 = vmul.f32 0.0625, %v770_v25  ;;  %v781_v60 = vadd.f32 %v780_v1, %v779_v24 }
 0x1e3   :  { %v782_v39 = vmul.f32 0.0625, %v781_v60  ;;  %v783_v47 = vmul.f32 %v772_v61, %v772_v61 }
 0x1e5   :  { %v784_v17 = vsub.f32 %v782_v39, %v783_v47 }
 0x1e7   :  { %v785_v40 = vadd.f32 1e-05, %v784_v17 }
 0x1e9   :  { %12689 = vrsqrt.f32 %v785_v40 }
 0x1f3   :  { %v12690_v30 = vpop.eup %12689 }
 0x1f4   :  { %v788_v35 = vmul.f32 %v12690_v30, %v787_v51 }
 0x1f6   :  { %v790_v63 = vmul.f32 %v788_v35, %v772_v61  ;;  %v795_v26 = vrot.slane %v788_v35, %v13315_v15  ;;  %v1558_v35 = vld [vmem:[#allocation5 + $0x220] sm:$0xff] }
 0x1f8   :  { %v791_v25 = vsub.f32 %v789_v41, %v790_v63  ;;  %v796_v1 = vmul.f32 %v12549_v52, %v795_v26  ;;  %v797_v60 = vmul.f32 %v12548_v11, %v795_v26  ;;  %v1559_v41 = vld [vmem:[#allocation5 + $0x278] sm:$0xff]  ;;  %v1592_v63 = vand.u32 4294901760, %v1558_v35 }
 0x1f9   :  { %v1595_v26 = vand.u32 4294901760, %v1559_v41 }
 0x1fa   :  { %v801_v47 = vrot.slane %v791_v25, %v13315_v15 }
 0x1fb   :  { %v13443_v25 = vpack.c.bf16 %v1595_v26, %v1592_v63 }
 0x1fc   :  { %v802_v24 = vadd.f32 %v801_v47, %v796_v1  ;;  %v803_v2 = vadd.f32 %v801_v47, %v797_v60  ;;  %v13445_v1 = vld [vmem:[#allocation5 + $0x2d0] sm:$0xff]  ;;  %v13447_v60 = vld [vmem:[#allocation5 + $0x328] sm:$0xff] }
 0x1fd   :  { %v1598_v47 = vand.u32 4294901760, %v13445_v1 }
 0x1fe   :  { %v804_v59 = vmax.f32 %v802_v24, 0.0  ;;  %v805_v43 = vmax.f32 %v803_v2, 0.0  ;;  %v1601_v24 = vand.u32 4294901760, %v13447_v60 }
 0x200   :  { %v13319_v18 = vand.u32 4294901760, %v804_v59  ;;  %v13321_v20 = vand.u32 4294901760, %v805_v43  ;;  %v13453_v2 = vpack.c.bf16 %v1601_v24, %v1598_v47 }
 0x202   :  { %v909_v57 = vsub.f32 %v804_v59, %v13319_v18  ;;  %v13325_v39 = vsub.f32 %v805_v43, %v13321_v20  ;;  %v13455_v59 = vld [vmem:[#allocation5 + $0x380] sm:$0xff]  ;;  %v13457_v43 = vld [vmem:[#allocation5 + $0x3d8] sm:$0xff] }
 0x204   :  { %v910_v61 = vand.u32 4294901760, %v909_v57  ;;  %v920_v17 = vand.u32 4294901760, %v13325_v39 }
 0x206   :  { %v911_v52 = vsub.f32 %v909_v57, %v910_v61  ;;  %v921_v11 = vsub.f32 %v13325_v39, %v920_v17 }
 0x208   :  { %v912_v40 = vand.u32 4294901760, %v911_v52  ;;  %v922_v51 = vand.u32 4294901760, %v921_v11 }
 0x20a   :  { %8980 = vmatprep.mubr.f32.mxu1 %v912_v40  ;;  %v13479_v40 = vld [vmem:[#allocation5 + $0x4e0] sm:$0xff] }
 0x20b   :  { %8981 = vmatmul.mubr.f32.vlgmr.msra.gmra.mrb[0].mxu1 %v922_v51  ;;  %v13481_v51 = vld [vmem:[#allocation5 + $0x538] sm:$0xff] }
 0x20c   :  { %10855 = vmatpush3.bf16.msra.mxu1 %v13169_v31  ;;  %9015 = vmatprep.mubr.f32.mxu1 %v13319_v18  ;;  %v16679_v31 = vand.u32 4294901760, %v13147_v22  ;;  %v16684_v22 = vand.u32 4294901760, %v13179_v33  ;;  %v16690_v33 = vand.u32 4294901760, %v13224_v8  ;;  %v1555_v8 = vld [vmem:[#allocation5 + $0x118] sm:$0xff] }
 0x20d   :  { %10857 = vmatprep.subr.bf16.mxu1 %v13184_v36 }
 0x210   :  { %10859 = vmatpush3.bf16.msra.mxu1 %v13184_v36  ;;  %v16680_v36 = vand.u32 4294901760, %v13149_v27  ;;  %v16685_v27 = vand.u32 4294901760, %v13192_v10  ;;  %v16691_v10 = vand.u32 4294901760, %v13241_v37  ;;  %v1583_v37 = vand.u32 4294901760, %v1555_v8 }
 0x211   :  { %10861 = vmatprep.subr.bf16.mxu1 %v13198_v42 }
 0x214   :  { %10863 = vmatpush3.bf16.msra.mxu1 %v13198_v42  ;;  %v10948_v42 = vpack.c.bf16 %v16680_v36, %v16679_v31 }
 0x215   :  { %10865 = vmatprep.subr.bf16.mxu1 %v13226_v9 }
 0x218   :  { %10867 = vmatpush3.bf16.msra.mxu1 %v13226_v9  ;;  %v16681_v9 = vand.u32 4294901760, %v13162_v28 }
 0x219   :  { %10869 = vmatprep.subr.bf16.mxu1 %v13230_v62 }
 0x21c   :  { %10871 = vmatpush3.bf16.msra.mxu1 %v13230_v62  ;;  %v16682_v62 = vand.u32 4294901760, %v13164_v29  ;;  %v16687_v29 = vand.u32 4294901760, %v13204_v55  ;;  %v16693_v55 = vand.u32 4294901760, %v13258_v46 }
 0x21d   :  { %10873 = vmatprep.subr.bf16.mxu1 %v13250_v50 }
 0x220   :  { %10875 = vmatpush3.bf16.msra.mxu1 %v13250_v50  ;;  %v10952_v50 = vpack.c.bf16 %v16682_v62, %v16681_v9  ;;  %v1619_v9 = vand.u32 4294901760, %v13481_v51 }
 0x221   :  { %10877 = vmatprep.subr.bf16.mxu1 %v13276_v12 }
 0x224   :  { %10879 = vmatpush3.bf16.msra.mxu1 %v13276_v12  ;;  %v16683_v12 = vand.u32 4294901760, %v13177_v0  ;;  %v16689_v0 = vand.u32 4294901760, %v13221_v7 }
 0x225   :  { %10881 = vmatprep.subr.bf16.mxu1 %v13278_v3 }
 0x228   :  { %10883 = vmatpush3.bf16.msra.mxu1 %v13278_v3  ;;  %v10956_v3 = vpack.c.bf16 %v16684_v22, %v16683_v12 }
 0x229   :  { %10885 = vmatprep.subr.bf16.mxu1 %v13282_v4 }
 0x22b   :  { %9016 = vmatmul.mubr.f32.vlgmr.msra.gmra.mrb[0].mxu1 %v13321_v20 }
 0x22c   :  { %10887 = vmatpush3.bf16.msra.mxu1 %v13282_v4  ;;  %9050 = vmatprep.mubr.f32.mxu1 %v909_v57  ;;  %v16686_v4 = vand.u32 4294901760, %v13194_v13  ;;  %v16692_v13 = vand.u32 4294901760, %v13246_v38  ;;  %v1556_v38 = vld [vmem:[#allocation5 + $0x170] sm:$0xff] }
 0x22d   :  { %10889 = vmatprep.subr.bf16.mxu1 %v13286_v6  ;;  %v1586_v46 = vand.u32 4294901760, %v1556_v38 }
 0x22e   :  { %v10960_v28 = vpack.c.bf16 %v16686_v4, %v16685_v27  ;;  %v13508_v4 = vsub.f32 %v1555_v8, %v1583_v37 }
 0x230   :  { %10891 = vmatpush3.bf16.msra.mxu1 %v13286_v6  ;;  %v16688_v6 = vand.u32 4294901760, %v13207_v56  ;;  %v16694_v56 = vld [vmem:[#allocation12_spill] sm:$0xff] }
 0x231   :  { %10893 = vmatprep.subr.bf16.mxu1 %v13290_v49 }
 0x234   :  { %10895 = vmatpush3.bf16.msra.mxu1 %v13290_v49  ;;  %v10964_v49 = vpack.c.bf16 %v16688_v6, %v16687_v29 }
 0x235   :  { %10897 = vmatprep.subr.bf16.mxu1 %v13294_v54 }
 0x238   :  { %10899 = vmatpush3.bf16.msra.mxu1 %v13294_v54  ;;  %v10968_v54 = vpack.c.bf16 %v16690_v33, %v16689_v0 }
 0x239   :  { %10901 = vmatprep.subr.bf16.mxu1 %v13298_v32 }
 0x23c   :  { %10903 = vmatpush3.bf16.msra.mxu1 %v13298_v32  ;;  %v10972_v32 = vpack.c.bf16 %v16692_v13, %v16691_v10  ;;  %v13521_v10 = vsub.f32 %v1556_v38, %v1586_v46 }
 0x23d   :  { %10905 = vmatprep.subr.bf16.mxu1 %v13302_v16 }
 0x240   :  { %10907 = vmatpush3.bf16.msra.mxu1 %v13302_v16  ;;  %v16695_v16 = vand.u32 4294901760, %v16694_v56  ;;  %v16473_v56 = vand.u32 4294901760, %v13521_v10 }
 0x241   :  { %10909 = vmatprep.subr.bf16.mxu1 %v13306_v44 }
 0x244   :  { %10911 = vmatpush3.bf16.msra.mxu1 %v13306_v44  ;;  %v10976_v44 = vpack.c.bf16 %v16695_v16, %v16693_v55 }
 0x245   :  { %10913 = vmatprep.subr.bf16.mxu1 %v13310_v34 }
 0x248   :  { %10915 = vmatpush3.bf16.msra.mxu1 %v13310_v34 }
 0x249   :  { %10917 = vmatprep.subr.bf16.mxu1 %v13087_v23 }
 0x24b   :  { %9051 = vmatmul.mubr.f32.vlgmr.msra.gmra.mrb[0].mxu1 %v13325_v39  ;;  %v13465_v39 = vld [vmem:[#allocation5 + $0x430] sm:$0xff] }
 0x24c   :  { %10919 = vmatpush3.bf16.msra.mxu1 %v13087_v23  ;;  %9085 = vmatprep.mubr.f32.mxu1 %v910_v61  ;;  %v13467_v61 = vld [vmem:[#allocation5 + $0x488] sm:$0xff] }
 0x24d   :  { %10921 = vmatprep.subr.bf16.mxu1 %v13091_v53  ;;  %v1613_v52 = vand.u32 4294901760, %v13467_v61 }
 0x250   :  { %10923 = vmatpush3.bf16.msra.mxu1 %v13091_v53 }
 0x251   :  { %10925 = vmatprep.subr.bf16.mxu1 %v13095_v58 }
 0x254   :  { %10927 = vmatpush3.bf16.msra.mxu1 %v13095_v58 }
 0x255   :  { %10929 = vmatprep.subr.bf16.mxu1 %v13099_v5 }
 0x258   :  { %10931 = vmatpush3.bf16.msra.mxu1 %v13099_v5 }
 0x259   :  { %10933 = vmatprep.subr.bf16.mxu1 %v13109_v14 }
 0x25c   :  { %10935 = vmatpush3.bf16.msra.mxu1 %v13109_v14 }
 0x25d   :  { %10937 = vmatprep.subr.bf16.mxu1 %v13119_v45 }
 0x260   :  { %10939 = vmatpush3.bf16.msra.mxu1 %v13119_v45 }
 0x261   :  { %10941 = vmatprep.subr.bf16.mxu1 %v13139_v19 }
 0x264   :  { %10943 = vmatpush3.bf16.msra.mxu1 %v13139_v19 }
 0x265   :  { %10945 = vmatprep.subr.bf16.mxu1 %v13145_v21 }
 0x268   :  { %10947 = vmatpush3.bf16.msra.mxu1 %v13145_v21 }
 0x269   :  { %10949 = vmatprep.subr.bf16.mxu1 %v10948_v42 }
 0x26b   :  { %9086 = vmatmul.mubr.f32.vlgmr.msra.gmra.mrb[0].mxu1 %v920_v17  ;;  %v1610_v17 = vand.u32 4294901760, %v13465_v39 }
 0x26c   :  { %10951 = vmatpush3.bf16.msra.mxu1 %v10948_v42  ;;  %9120 = vmatprep.mubr.f32.mxu1 %v13319_v18  ;;  %v1616_v42 = vand.u32 4294901760, %v13479_v40 }
 0x26d   :  { %10953 = vmatprep.subr.bf16.mxu1 %v10952_v50  ;;  %v13477_v11 = vpack.c.bf16 %v1613_v52, %v1610_v17 }
 0x26e   :  { %v13497_v12 = vpack.c.bf16 %v1619_v9, %v1616_v42 }
 0x270   :  { %10955 = vmatpush3.bf16.msra.mxu1 %v10952_v50 }
 0x271   :  { %10957 = vmatprep.subr.bf16.mxu1 %v10956_v3 }
 0x274   :  { %10959 = vmatpush3.bf16.msra.mxu1 %v10956_v3 }
 0x275   :  { %10961 = vmatprep.subr.bf16.mxu1 %v10960_v28 }
 0x278   :  { %10963 = vmatpush3.bf16.msra.mxu1 %v10960_v28 }
 0x279   :  { %10965 = vmatprep.subr.bf16.mxu1 %v10964_v49 }
 0x27c   :  { %10967 = vmatpush3.bf16.msra.mxu1 %v10964_v49  ;;  %v16474_v49 = vand.u32 4294901760, %v13508_v4 }
 0x27d   :  { %10969 = vmatprep.subr.bf16.mxu1 %v10968_v54 }
 0x280   :  { %10971 = vmatpush3.bf16.msra.mxu1 %v10968_v54  ;;  %v1699_v54 = vsub.f32 %v13508_v4, %v16474_v49 }
 0x281   :  { %10973 = vmatprep.subr.bf16.mxu1 %v10972_v32 }
 0x282   :  { %v1700_v55 = vand.u32 4294901760, %v1699_v54 }
 0x284   :  { %10975 = vmatpush3.bf16.msra.mxu1 %v10972_v32 }
 0x285   :  { %10977 = vmatprep.subr.bf16.mxu1 %v10976_v44 }
 0x288   :  { %10979 = vmatpush3.bf16.msra.mxu1 %v10976_v44 }
 0x289   :  { %10981 = vmatprep.subr.bf16.mxu1 %v13087_v23 }
 0x28b   :  { %9121 = vmatmul.mubr.f32.vlgmr.msra.gmra.mrb[0].mxu1 %v13321_v20 }
 0x28c   :  { %10983 = vmatpush3.bf16.msra.mxu1 %v13087_v23  ;;  %9155 = vmatprep.mubr.f32.mxu1 %v13319_v18  ;;  %v1552_v23 = vld [vmem:[#allocation5 + $0x10] sm:$0xff]  ;;  %v1604_v18 = vand.u32 4294901760, %v13455_v59 }
 0x28d   :  { %10985 = vmatprep.subr.bf16.mxu1 %v13091_v53 }
 0x290   :  { %10987 = vmatpush3.bf16.msra.mxu1 %v13091_v53  ;;  %v1553_v53 = vld [vmem:[#allocation5 + $0x68] sm:$0xff] }
 0x291   :  { %10989 = vmatprep.subr.bf16.mxu1 %v13095_v58 }
 0x294   :  { %10991 = vmatpush3.bf16.msra.mxu1 %v13095_v58  ;;  %v1574_v58 = vand.u32 4294901760, %v1552_v23 }
 0x295   :  { %10993 = vmatprep.subr.bf16.mxu1 %v13099_v5 }
 0x296   :  { %v13483_v31 = vsub.f32 %v1552_v23, %v1574_v58  ;;  %v1706_v23 = vsub.f32 %v13521_v10, %v16473_v56 }
 0x298   :  { %10995 = vmatpush3.bf16.msra.mxu1 %v13099_v5  ;;  %v1577_v5 = vand.u32 4294901760, %v1553_v53  ;;  %v16477_v62 = vand.u32 4294901760, %v13483_v31 }
 0x299   :  { %10997 = vmatprep.subr.bf16.mxu1 %v13109_v14 }
 0x29a   :  { %v13431_v7 = vpack.c.bf16 %v1577_v5, %v1574_v58  ;;  %v13485_v36 = vsub.f32 %v1553_v53, %v1577_v5  ;;  %v1678_v22 = vsub.f32 %v13483_v31, %v16477_v62  ;;  %v13536_v58 = vsub.f32 %v1558_v35, %v1592_v63 }
 0x29b   :  { %v13538_v5 = vsub.f32 %v1559_v41, %v1595_v26 }
 0x29c   :  { %10999 = vmatpush3.bf16.msra.mxu1 %v13109_v14  ;;  %v1554_v14 = vld [vmem:[#allocation5 + $0xc0] sm:$0xff]  ;;  %11013 = vmatprep.subr.bf16.mxu0 %v13431_v7  ;;  %v16476_v50 = vand.u32 4294901760, %v13485_v36  ;;  %v1679_v28 = vand.u32 4294901760, %v1678_v22 }
 0x29d   :  { %11001 = vmatprep.subr.bf16.mxu1 %v13119_v45  ;;  %11015 = vmatpush3.bf16.msra.mxu0 %v13431_v7 }
 0x29e   :  { %v1685_v3 = vsub.f32 %v13485_v36, %v16476_v50 }
 0x2a0   :  { %11003 = vmatpush3.bf16.msra.mxu1 %v13119_v45  ;;  %v1580_v45 = vand.u32 4294901760, %v1554_v14  ;;  %v1686_v29 = vand.u32 4294901760, %v1685_v3 }
 0x2a1   :  { %11005 = vmatprep.subr.bf16.mxu1 %v13139_v19 }
 0x2a2   :  { %v13506_v27 = vsub.f32 %v1554_v14, %v1580_v45  ;;  %v13513_v0 = vpack.c.bf16 %v1686_v29, %v1679_v28  ;;  %v1707_v14 = vand.u32 4294901760, %v1706_v23 }
 0x2a4   :  { %11007 = vmatpush3.bf16.msra.mxu1 %v13139_v19  ;;  %v13435_v19 = vpack.c.bf16 %v1583_v37, %v1580_v45  ;;  %v16475_v6 = vand.u32 4294901760, %v13506_v27  ;;  %v16471_v45 = vand.u32 4294901760, %v13536_v58  ;;  %v16470_v37 = vand.u32 4294901760, %v13538_v5 }
 0x2a5   :  { %11009 = vmatprep.subr.bf16.mxu1 %v13145_v21 }
 0x2a6   :  { %11017 = vmatprep.subr.bf16.mxu0 %v13435_v19  ;;  %v1692_v33 = vsub.f32 %v13506_v27, %v16475_v6  ;;  %v1727_v35 = vsub.f32 %v13538_v5, %v16470_v37 }
 0x2a7   :  { %11019 = vmatpush3.bf16.msra.mxu0 %v13435_v19 }
 0x2a8   :  { %11011 = vmatpush3.bf16.msra.mxu1 %v13145_v21  ;;  %v1557_v21 = vld [vmem:[#allocation5 + $0x1c8] sm:$0xff]  ;;  %v1693_v32 = vand.u32 4294901760, %v1692_v33  ;;  %v1728_v22 = vand.u32 4294901760, %v1727_v35 }
 0x2a9   :  { %v1589_v34 = vand.u32 4294901760, %v1557_v21 }
 0x2aa   :  { %v13528_v44 = vpack.c.bf16 %v1700_v55, %v1693_v32 }
 0x2ab   :  { %9156 = vmatmul.mubr.f32.vlgmr.msra.gmra.mrb[0].mxu1 %v13321_v20  ;;  %v13439_v30 = vpack.c.bf16 %v1589_v34, %v1586_v46  ;;  %v1607_v20 = vand.u32 4294901760, %v13457_v43  ;;  %v13523_v13 = vsub.f32 %v1557_v21, %v1589_v34  ;;  %v1720_v21 = vsub.f32 %v13536_v58, %v16471_v45 }
 0x2ac   :  { %v13548_v46 = vsub.f32 %v13445_v1, %v1598_v47  ;;  %v13551_v34 = vsub.f32 %v13447_v60, %v1601_v24  ;;  %v13565_v60 = vsub.f32 %v13455_v59, %v1604_v18 }
 0x2ad   :  { %11021 = vmatprep.subr.bf16.mxu0 %v13439_v30  ;;  %v13463_v57 = vpack.c.bf16 %v1607_v20, %v1604_v18  ;;  %v16472_v16 = vand.u32 4294901760, %v13523_v13  ;;  %v1721_v41 = vand.u32 4294901760, %v1720_v21  ;;  %v13568_v47 = vsub.f32 %v13457_v43, %v1607_v20 }
 0x2ae   :  { %11023 = vmatpush3.bf16.msra.mxu0 %v13439_v30  ;;  %v16469_v63 = vand.u32 4294901760, %v13548_v46  ;;  %v16468_v26 = vand.u32 4294901760, %v13551_v34  ;;  %v16467_v33 = vand.u32 4294901760, %v13565_v60  ;;  %v13585_v43 = vsub.f32 %v13465_v39, %v1610_v17 }
 0x2af   :  { %11025 = vmatprep.subr.bf16.mxu0 %v13443_v25  ;;  %v1713_v53 = vsub.f32 %v13523_v13, %v16472_v16  ;;  %v13570_v24 = vpack.c.bf16 %v1728_v22, %v1721_v41  ;;  %v16466_v54 = vand.u32 4294901760, %v13568_v47  ;;  %v13590_v18 = vsub.f32 %v13467_v61, %v1613_v52 }
 0x2b0   :  { %v1734_v3 = vsub.f32 %v13548_v46, %v16469_v63  ;;  %v1741_v1 = vsub.f32 %v13551_v34, %v16468_v26  ;;  %v1748_v55 = vsub.f32 %v13565_v60, %v16467_v33  ;;  %v13602_v39 = vsub.f32 %v13479_v40, %v1616_v42 }
 0x2b1   :  { %v1714_v8 = vand.u32 4294901760, %v1713_v53  ;;  %v1755_v59 = vsub.f32 %v13568_v47, %v16466_v54  ;;  %v16465_v53 = vand.u32 4294901760, %v13585_v43  ;;  %v13607_v61 = vsub.f32 %v13481_v51, %v1619_v9 }
 0x2b2   :  { %11027 = vmatpush3.bf16.msra.mxu0 %v13443_v25  ;;  %v1735_v28 = vand.u32 4294901760, %v1734_v3  ;;  %v1742_v29 = vand.u32 4294901760, %v1741_v1  ;;  %v1749_v20 = vand.u32 4294901760, %v1748_v55  ;;  %16696 = vst [vmem:[#allocation12_spill] sm:$0xff] %v13602_v39  ;;  %v16463_v35 = vand.u32 4294901760, %v13602_v39 }
 0x2b3   :  { %11029 = vmatprep.subr.bf16.mxu0 %v13453_v2  ;;  %v13542_v38 = vpack.c.bf16 %v1714_v8, %v1707_v14  ;;  %v1756_v23 = vand.u32 4294901760, %v1755_v59  ;;  %v16464_v14 = vand.u32 4294901760, %v13590_v18  ;;  %v1762_v21 = vsub.f32 %v13585_v43, %v16465_v53  ;;  %16697 = vst [vmem:[#allocation14_spill] sm:$0xff] %v13607_v61 }
 0x2b4   :  { %v13574_v32 = vpack.c.bf16 %v1742_v29, %v1735_v28  ;;  %v16462_v41 = vand.u32 4294901760, %v13607_v61  ;;  %v1776_v40 = vsub.f32 %v13602_v39, %v16463_v35  ;;  %v13626_v28 = vpack.c.bf16 %v13485_v36, %v13483_v31 }
 0x2b5   :  { %v13594_v8 = vpack.c.bf16 %v1756_v23, %v1749_v20  ;;  %v1769_v17 = vsub.f32 %v13590_v18, %v16464_v14  ;;  %v1763_v52 = vand.u32 4294901760, %v1762_v21  ;;  %v13630_v29 = vpack.c.bf16 %v13508_v4, %v13506_v27 }
 0x2b6   :  { %11031 = vmatpush3.bf16.msra.mxu0 %v13453_v2  ;;  %v1783_v42 = vsub.f32 %v13607_v61, %v16462_v41  ;;  %v1777_v9 = vand.u32 4294901760, %v1776_v40  ;;  %v13634_v55 = vpack.c.bf16 %v13523_v13, %v13521_v10  ;;  %v13638_v59 = vpack.c.bf16 %v13538_v5, %v13536_v58 }
 0x2b7   :  { %11033 = vmatprep.subr.bf16.mxu0 %v13463_v57  ;;  %v1770_v22 = vand.u32 4294901760, %v1769_v17  ;;  %v13642_v20 = vpack.c.bf16 %v13551_v34, %v13548_v46  ;;  %v13646_v23 = vpack.c.bf16 %v13568_v47, %v13565_v60  ;;  %v13650_v21 = vpack.c.bf16 %v13590_v18, %v13585_v43 }
 0x2b8   :  { %v1784_v3 = vand.u32 4294901760, %v1783_v42  ;;  %v13654_v17 = vpack.c.bf16 %v13607_v61, %v13602_v39  ;;  %v1533_v61 = vld [vmem:[#allocation7 + $0x5] sm:$0x1] }
 0x2b9   :  { %v13620_v51 = vpack.c.bf16 %v1770_v22, %v1763_v52  ;;  %v7758_v52 = vld [vmem:[#allocation7 + $0x4] ss:$0 sm:$0xff] }
 0x2ba   :  { %11035 = vmatpush3.bf16.msra.mxu0 %v13463_v57  ;;  %v13622_v1 = vpack.c.bf16 %v1784_v3, %v1777_v9 }
 0x2bb   :  { %11037 = vmatprep.subr.bf16.mxu0 %v13477_v11 }
 0x2be   :  { %11039 = vmatpush3.bf16.msra.mxu0 %v13477_v11 }
 0x2bf   :  { %11041 = vmatprep.subr.bf16.mxu0 %v13497_v12 }
 0x2c2   :  { %11043 = vmatpush3.bf16.msra.mxu0 %v13497_v12 }
 0x2c3   :  { %11045 = vmatprep.subr.bf16.mxu0 %v13513_v0 }
 0x37e   :  { %v9157_v22 = vpop.f32.mrb[0].mxu1 }
 0x37f   :  { %v12550_v40 = vadd.f32 %v9157_v22, %v7758_v52  ;;  %v1501_v42 = vpop.f32.mrb[1].mxu1 }
 0x380   :  { %v12551_v9 = vadd.f32 %v7758_v52, %v1501_v42 }
 0x381   :  { %v1520_v3 = vmul.f32 %v12550_v40, %v12550_v40 }
 0x382   :  { %v1511_v41 = vadd.f32 %v12551_v9, %v12550_v40  ;;  %v1519_v35 = vmul.f32 %v12551_v9, %v12551_v9 }
 0x384   :  { %v1512_v14 = vrot.slane %v1511_v41, 4  ;;  %v1521_v53 = vadd.f32 %v1520_v3, %v1519_v35 }
 0x386   :  { %v1513_v54 = vadd.f32 %v1512_v14, %v1511_v41  ;;  %v1522_v33 = vrot.slane %v1521_v53, 4  ;;  %v1535_v14 = vld [vmem:[#allocation7 + $0x6] sm:$0x1] }
 0x388   :  { %v1514_v26 = vrot.slane %v1513_v54, 2  ;;  %v1523_v63 = vadd.f32 %v1522_v33, %v1521_v53 }
 0x38a   :  { %v1515_v37 = vadd.f32 %v1514_v26, %v1513_v54  ;;  %v1524_v45 = vrot.slane %v1523_v63, 2 }
 0x38c   :  { %v1516_v16 = vrot.slane %v1515_v37, 1  ;;  %v1525_v56 = vadd.f32 %v1524_v45, %v1523_v63 }
 0x38e   :  { %v1517_v49 = vadd.f32 %v1516_v16, %v1515_v37  ;;  %v1526_v6 = vrot.slane %v1525_v56, 1 }
 0x390   :  { %v1518_v50 = vmul.f32 0.0625, %v1517_v49  ;;  %v1527_v62 = vadd.f32 %v1526_v6, %v1525_v56 }
 0x392   :  { %v1528_v22 = vmul.f32 0.0625, %v1527_v62  ;;  %v1529_v48 = vmul.f32 %v1518_v50, %v1518_v50 }
 0x394   :  { %v1530_v52 = vsub.f32 %v1528_v22, %v1529_v48 }
 0x396   :  { %v1531_v42 = vadd.f32 1e-05, %v1530_v52 }
 0x398   :  { %12691 = vrsqrt.f32 %v1531_v42 }
 0x3a2   :  { %v12692_v39 = vpop.eup %12691 }
 0x3a3   :  { %v1534_v35 = vmul.f32 %v12692_v39, %v1533_v61 }
 0x3a5   :  { %v1536_v41 = vmul.f32 %v1534_v35, %v1518_v50  ;;  %v1541_v33 = vrot.slane %v1534_v35, %v13315_v15  ;;  %v2304_v35 = vld [vmem:[#allocation5 + $0x228] sm:$0xff] }
 0x3a7   :  { %v1537_v26 = vsub.f32 %v1535_v14, %v1536_v41  ;;  %v1542_v54 = vmul.f32 %v12551_v9, %v1541_v33  ;;  %v1543_v53 = vmul.f32 %v12550_v40, %v1541_v33  ;;  %v2305_v14 = vld [vmem:[#allocation5 + $0x280] sm:$0xff]  ;;  %v2338_v41 = vand.u32 4294901760, %v2304_v35 }
 0x3a8   :  { %v2341_v33 = vand.u32 4294901760, %v2305_v14 }
 0x3a9   :  { %v1547_v16 = vrot.slane %v1537_v26, %v13315_v15 }
 0x3aa   :  { %v13782_v26 = vpack.c.bf16 %v2341_v33, %v2338_v41 }
 0x3ab   :  { %v1548_v45 = vadd.f32 %v1547_v16, %v1542_v54  ;;  %v1549_v49 = vadd.f32 %v1547_v16, %v1543_v53  ;;  %v13784_v54 = vld [vmem:[#allocation5 + $0x2d8] sm:$0xff]  ;;  %v13786_v53 = vld [vmem:[#allocation5 + $0x330] sm:$0xff] }
 0x3ac   :  { %v2344_v16 = vand.u32 4294901760, %v13784_v54 }
 0x3ad   :  { %v1550_v6 = vmax.f32 %v1548_v45, 0.0  ;;  %v1551_v62 = vmax.f32 %v1549_v49, 0.0  ;;  %v2347_v45 = vand.u32 4294901760, %v13786_v53 }
 0x3af   :  { %v13658_v56 = vand.u32 4294901760, %v1550_v6  ;;  %v13660_v48 = vand.u32 4294901760, %v1551_v62  ;;  %v13792_v49 = vpack.c.bf16 %v2347_v45, %v2344_v16 }
 0x3b1   :  { %v1655_v37 = vsub.f32 %v1550_v6, %v13658_v56  ;;  %v13664_v63 = vsub.f32 %v1551_v62, %v13660_v48  ;;  %v13794_v6 = vld [vmem:[#allocation5 + $0x388] sm:$0xff]  ;;  %v13796_v62 = vld [vmem:[#allocation5 + $0x3e0] sm:$0xff] }
 0x3b3   :  { %v1656_v50 = vand.u32 4294901760, %v1655_v37  ;;  %v1666_v39 = vand.u32 4294901760, %v13664_v63 }
 0x3b5   :  { %v1657_v61 = vsub.f32 %v1655_v37, %v1656_v50  ;;  %v1667_v40 = vsub.f32 %v13664_v63, %v1666_v39 }
 0x3b7   :  { %v1658_v9 = vand.u32 4294901760, %v1657_v61  ;;  %v1668_v3 = vand.u32 4294901760, %v1667_v40 }
 0x3b9   :  { %9190 = vmatprep.mubr.f32.mxu0 %v1658_v9  ;;  %v13818_v9 = vld [vmem:[#allocation5 + $0x4e8] sm:$0xff] }
 0x3ba   :  { %9191 = vmatmul.mubr.f32.vlgmr.msra.gmra.mrb[2].mxu0 %v1668_v3  ;;  %v13820_v3 = vld [vmem:[#allocation5 + $0x540] sm:$0xff] }
 0x3bb   :  { %11047 = vmatpush3.bf16.msra.mxu0 %v13513_v0  ;;  %9225 = vmatprep.mubr.f32.mxu0 %v13658_v56  ;;  %v16698_v0 = vand.u32 4294901760, %v13483_v31  ;;  %v16703_v31 = vand.u32 4294901760, %v13523_v13  ;;  %v16709_v13 = vand.u32 4294901760, %v13568_v47  ;;  %v2301_v47 = vld [vmem:[#allocation5 + $0x120] sm:$0xff] }
 0x3bc   :  { %11049 = vmatprep.subr.bf16.mxu0 %v13528_v44 }
 0x3bf   :  { %11051 = vmatpush3.bf16.msra.mxu0 %v13528_v44  ;;  %v16699_v44 = vand.u32 4294901760, %v13485_v36  ;;  %v16704_v36 = vand.u32 4294901760, %v13536_v58  ;;  %v16710_v58 = vand.u32 4294901760, %v13585_v43  ;;  %v2329_v43 = vand.u32 4294901760, %v2301_v47 }
 0x3c0   :  { %11053 = vmatprep.subr.bf16.mxu0 %v13542_v38 }
 0x3c3   :  { %11055 = vmatpush3.bf16.msra.mxu0 %v13542_v38  ;;  %v11140_v38 = vpack.c.bf16 %v16699_v44, %v16698_v0 }
 0x3c4   :  { %11057 = vmatprep.subr.bf16.mxu0 %v13570_v24 }
 0x3c7   :  { %11059 = vmatpush3.bf16.msra.mxu0 %v13570_v24  ;;  %v16700_v24 = vand.u32 4294901760, %v13506_v27 }
 0x3c8   :  { %11061 = vmatprep.subr.bf16.mxu0 %v13574_v32 }
 0x3cb   :  { %11063 = vmatpush3.bf16.msra.mxu0 %v13574_v32  ;;  %v16701_v32 = vand.u32 4294901760, %v13508_v4  ;;  %v16706_v4 = vand.u32 4294901760, %v13548_v46  ;;  %v16712_v46 = vld [vmem:[#allocation12_spill] sm:$0xff] }
 0x3cc   :  { %11065 = vmatprep.subr.bf16.mxu0 %v13594_v8 }
 0x3cf   :  { %11067 = vmatpush3.bf16.msra.mxu0 %v13594_v8  ;;  %v11144_v8 = vpack.c.bf16 %v16701_v32, %v16700_v24  ;;  %v2365_v24 = vand.u32 4294901760, %v13820_v3 }
 0x3d0   :  { %11069 = vmatprep.subr.bf16.mxu0 %v13620_v51 }
 0x3d3   :  { %11071 = vmatpush3.bf16.msra.mxu0 %v13620_v51  ;;  %v16702_v51 = vand.u32 4294901760, %v13521_v10  ;;  %v16708_v10 = vand.u32 4294901760, %v13565_v60 }
 0x3d4   :  { %11073 = vmatprep.subr.bf16.mxu0 %v13622_v1 }
 0x3d7   :  { %11075 = vmatpush3.bf16.msra.mxu0 %v13622_v1  ;;  %v11148_v1 = vpack.c.bf16 %v16703_v31, %v16702_v51 }
 0x3d8   :  { %11077 = vmatprep.subr.bf16.mxu0 %v13626_v28 }
 0x3da   :  { %9226 = vmatmul.mubr.f32.vlgmr.msra.gmra.mrb[2].mxu0 %v13660_v48 }
 0x3db   :  { %11079 = vmatpush3.bf16.msra.mxu0 %v13626_v28  ;;  %9260 = vmatprep.mubr.f32.mxu0 %v1655_v37  ;;  %v16705_v28 = vand.u32 4294901760, %v13538_v5  ;;  %v16711_v5 = vand.u32 4294901760, %v13590_v18  ;;  %v2302_v18 = vld [vmem:[#allocation5 + $0x178] sm:$0xff] }
 0x3dc   :  { %11081 = vmatprep.subr.bf16.mxu0 %v13630_v29  ;;  %v2332_v22 = vand.u32 4294901760, %v2302_v18 }
 0x3dd   :  { %v11152_v27 = vpack.c.bf16 %v16705_v28, %v16704_v36  ;;  %v13847_v28 = vsub.f32 %v2301_v47, %v2329_v43 }
 0x3df   :  { %11083 = vmatpush3.bf16.msra.mxu0 %v13630_v29  ;;  %v16707_v29 = vand.u32 4294901760, %v13551_v34  ;;  %v16714_v34 = vld [vmem:[#allocation14_spill] sm:$0xff] }
 0x3e0   :  { %11085 = vmatprep.subr.bf16.mxu0 %v13634_v55 }
 0x3e3   :  { %11087 = vmatpush3.bf16.msra.mxu0 %v13634_v55  ;;  %v11156_v55 = vpack.c.bf16 %v16707_v29, %v16706_v4 }
 0x3e4   :  { %11089 = vmatprep.subr.bf16.mxu0 %v13638_v59 }
 0x3e7   :  { %11091 = vmatpush3.bf16.msra.mxu0 %v13638_v59  ;;  %v11160_v59 = vpack.c.bf16 %v16709_v13, %v16708_v10 }
 0x3e8   :  { %11093 = vmatprep.subr.bf16.mxu0 %v13642_v20 }
 0x3eb   :  { %11095 = vmatpush3.bf16.msra.mxu0 %v13642_v20  ;;  %v11164_v20 = vpack.c.bf16 %v16711_v5, %v16710_v58  ;;  %v13860_v58 = vsub.f32 %v2302_v18, %v2332_v22 }
 0x3ec   :  { %11097 = vmatprep.subr.bf16.mxu0 %v13646_v23 }
 0x3ef   :  { %11099 = vmatpush3.bf16.msra.mxu0 %v13646_v23  ;;  %v16713_v23 = vand.u32 4294901760, %v16712_v46 }
 0x3f0   :  { %11101 = vmatprep.subr.bf16.mxu0 %v13650_v21 }
 0x3f3   :  { %11103 = vmatpush3.bf16.msra.mxu0 %v13650_v21  ;;  %v16715_v21 = vand.u32 4294901760, %v16714_v34 }
 0x3f4   :  { %11105 = vmatprep.subr.bf16.mxu0 %v13654_v17 }
 0x3f7   :  { %11107 = vmatpush3.bf16.msra.mxu0 %v13654_v17  ;;  %v11168_v17 = vpack.c.bf16 %v16715_v21, %v16713_v23  ;;  %v16492_v23 = vand.u32 4294901760, %v13860_v58 }
 0x3f8   :  { %11109 = vmatprep.subr.bf16.mxu0 %v13431_v7 }
 0x3fa   :  { %9261 = vmatmul.mubr.f32.vlgmr.msra.gmra.mrb[2].mxu0 %v13664_v63  ;;  %v13804_v63 = vld [vmem:[#allocation5 + $0x438] sm:$0xff] }
 0x3fb   :  { %11111 = vmatpush3.bf16.msra.mxu0 %v13431_v7  ;;  %9295 = vmatprep.mubr.f32.mxu0 %v1656_v50  ;;  %v13806_v50 = vld [vmem:[#allocation5 + $0x490] sm:$0xff] }
 0x3fc   :  { %11113 = vmatprep.subr.bf16.mxu0 %v13435_v19  ;;  %v2359_v61 = vand.u32 4294901760, %v13806_v50 }
 0x3ff   :  { %11115 = vmatpush3.bf16.msra.mxu0 %v13435_v19 }
 0x400   :  { %11117 = vmatprep.subr.bf16.mxu0 %v13439_v30 }
 0x403   :  { %11119 = vmatpush3.bf16.msra.mxu0 %v13439_v30 }
 0x404   :  { %11121 = vmatprep.subr.bf16.mxu0 %v13443_v25 }
 0x407   :  { %11123 = vmatpush3.bf16.msra.mxu0 %v13443_v25 }
 0x408   :  { %11125 = vmatprep.subr.bf16.mxu0 %v13453_v2 }
 0x40b   :  { %11127 = vmatpush3.bf16.msra.mxu0 %v13453_v2 }
 0x40c   :  { %11129 = vmatprep.subr.bf16.mxu0 %v13463_v57 }
 0x40f   :  { %11131 = vmatpush3.bf16.msra.mxu0 %v13463_v57 }
 0x410   :  { %11133 = vmatprep.subr.bf16.mxu0 %v13477_v11 }
 0x413   :  { %11135 = vmatpush3.bf16.msra.mxu0 %v13477_v11 }
 0x414   :  { %11137 = vmatprep.subr.bf16.mxu0 %v13497_v12 }
 0x417   :  { %11139 = vmatpush3.bf16.msra.mxu0 %v13497_v12 }
 0x418   :  { %11141 = vmatprep.subr.bf16.mxu0 %v11140_v38 }
 0x41a   :  { %9296 = vmatmul.mubr.f32.vlgmr.msra.gmra.mrb[2].mxu0 %v1666_v39  ;;  %v2356_v39 = vand.u32 4294901760, %v13804_v63 }
 0x41b   :  { %11143 = vmatpush3.bf16.msra.mxu0 %v11140_v38  ;;  %9330 = vmatprep.mubr.f32.mxu0 %v13658_v56  ;;  %v2362_v38 = vand.u32 4294901760, %v13818_v9 }
 0x41c   :  { %11145 = vmatprep.subr.bf16.mxu0 %v11144_v8  ;;  %v13816_v40 = vpack.c.bf16 %v2359_v61, %v2356_v39 }
 0x41d   :  { %v13836_v51 = vpack.c.bf16 %v2365_v24, %v2362_v38 }
 0x41f   :  { %11147 = vmatpush3.bf16.msra.mxu0 %v11144_v8 }
 0x420   :  { %11149 = vmatprep.subr.bf16.mxu0 %v11148_v1 }
 0x423   :  { %11151 = vmatpush3.bf16.msra.mxu0 %v11148_v1 }
 0x424   :  { %11153 = vmatprep.subr.bf16.mxu0 %v11152_v27 }
 0x427   :  { %11155 = vmatpush3.bf16.msra.mxu0 %v11152_v27 }
 0x428   :  { %11157 = vmatprep.subr.bf16.mxu0 %v11156_v55 }
 0x42b   :  { %11159 = vmatpush3.bf16.msra.mxu0 %v11156_v55  ;;  %v16493_v55 = vand.u32 4294901760, %v13847_v28 }
 0x42c   :  { %11161 = vmatprep.subr.bf16.mxu0 %v11160_v59 }
 0x42f   :  { %11163 = vmatpush3.bf16.msra.mxu0 %v11160_v59  ;;  %v2445_v59 = vsub.f32 %v13847_v28, %v16493_v55 }
 0x430   :  { %11165 = vmatprep.subr.bf16.mxu0 %v11164_v20 }
 0x431   :  { %v2446_v46 = vand.u32 4294901760, %v2445_v59 }
 0x433   :  { %11167 = vmatpush3.bf16.msra.mxu0 %v11164_v20 }
 0x434   :  { %11169 = vmatprep.subr.bf16.mxu0 %v11168_v17 }
 0x437   :  { %11171 = vmatpush3.bf16.msra.mxu0 %v11168_v17  ;;  %v2452_v17 = vsub.f32 %v13860_v58, %v16492_v23 }
 0x438   :  { %11173 = vmatprep.subr.bf16.mxu0 %v13431_v7 }
 0x43a   :  { %9331 = vmatmul.mubr.f32.vlgmr.msra.gmra.mrb[2].mxu0 %v13660_v48 }
 0x43b   :  { %11175 = vmatpush3.bf16.msra.mxu0 %v13431_v7  ;;  %9365 = vmatprep.mubr.f32.mxu0 %v13658_v56  ;;  %v2298_v7 = vld [vmem:[#allocation5 + $0x18] sm:$0xff]  ;;  %v2350_v56 = vand.u32 4294901760, %v13794_v6 }
 0x43c   :  { %11177 = vmatprep.subr.bf16.mxu0 %v13435_v19 }
 0x43f   :  { %11179 = vmatpush3.bf16.msra.mxu0 %v13435_v19  ;;  %v2299_v19 = vld [vmem:[#allocation5 + $0x70] sm:$0xff] }
 0x440   :  { %11181 = vmatprep.subr.bf16.mxu0 %v13439_v30 }
 0x443   :  { %11183 = vmatpush3.bf16.msra.mxu0 %v13439_v30  ;;  %v2320_v30 = vand.u32 4294901760, %v2298_v7 }
 0x444   :  { %11185 = vmatprep.subr.bf16.mxu0 %v13443_v25 }
 0x445   :  { %v13822_v0 = vsub.f32 %v2298_v7, %v2320_v30 }
 0x447   :  { %11187 = vmatpush3.bf16.msra.mxu0 %v13443_v25  ;;  %v2323_v25 = vand.u32 4294901760, %v2299_v19  ;;  %v16496_v32 = vand.u32 4294901760, %v13822_v0 }
 0x448   :  { %11189 = vmatprep.subr.bf16.mxu0 %v13453_v2 }
 0x449   :  { %v13770_v60 = vpack.c.bf16 %v2323_v25, %v2320_v30  ;;  %v13824_v44 = vsub.f32 %v2299_v19, %v2323_v25  ;;  %v2424_v31 = vsub.f32 %v13822_v0, %v16496_v32  ;;  %v13875_v19 = vsub.f32 %v2304_v35, %v2338_v41 }
 0x44a   :  { %v13877_v30 = vsub.f32 %v2305_v14, %v2341_v33  ;;  %v2453_v25 = vand.u32 4294901760, %v2452_v17 }
 0x44b   :  { %11191 = vmatpush3.bf16.msra.mxu0 %v13453_v2  ;;  %v2300_v2 = vld [vmem:[#allocation5 + $0xc8] sm:$0xff]  ;;  %11205 = vmatprep.subr.bf16.mxu1 %v13770_v60  ;;  %v16495_v8 = vand.u32 4294901760, %v13824_v44  ;;  %v2425_v27 = vand.u32 4294901760, %v2424_v31  ;;  %v16490_v47 = vand.u32 4294901760, %v13875_v19 }
 0x44c   :  { %11193 = vmatprep.subr.bf16.mxu0 %v13463_v57  ;;  %11207 = vmatpush3.bf16.msra.mxu1 %v13770_v60 }
 0x44d   :  { %v2431_v1 = vsub.f32 %v13824_v44, %v16495_v8  ;;  %v2466_v18 = vsub.f32 %v13875_v19, %v16490_v47 }
 0x44f   :  { %11195 = vmatpush3.bf16.msra.mxu0 %v13463_v57  ;;  %v2326_v57 = vand.u32 4294901760, %v2300_v2  ;;  %v2432_v4 = vand.u32 4294901760, %v2431_v1  ;;  %v2467_v35 = vand.u32 4294901760, %v2466_v18 }
 0x450   :  { %11197 = vmatprep.subr.bf16.mxu0 %v13477_v11 }
 0x451   :  { %v13845_v36 = vsub.f32 %v2300_v2, %v2326_v57  ;;  %v13852_v10 = vpack.c.bf16 %v2432_v4, %v2425_v27 }
 0x453   :  { %11199 = vmatpush3.bf16.msra.mxu0 %v13477_v11  ;;  %v13774_v11 = vpack.c.bf16 %v2329_v43, %v2326_v57  ;;  %v16494_v29 = vand.u32 4294901760, %v13845_v36  ;;  %v16489_v57 = vand.u32 4294901760, %v13877_v30 }
 0x454   :  { %11201 = vmatprep.subr.bf16.mxu0 %v13497_v12 }
 0x455   :  { %11209 = vmatprep.subr.bf16.mxu1 %v13774_v11  ;;  %v2438_v13 = vsub.f32 %v13845_v36, %v16494_v29 }
 0x456   :  { %11211 = vmatpush3.bf16.msra.mxu1 %v13774_v11 }
 0x457   :  { %11203 = vmatpush3.bf16.msra.mxu0 %v13497_v12  ;;  %v2303_v12 = vld [vmem:[#allocation5 + $0x1d0] sm:$0xff]  ;;  %v2439_v20 = vand.u32 4294901760, %v2438_v13 }
 0x458   :  { %v2335_v52 = vand.u32 4294901760, %v2303_v12 }
 0x459   :  { %v13867_v21 = vpack.c.bf16 %v2446_v46, %v2439_v20 }
 0x45a   :  { %9366 = vmatmul.mubr.f32.vlgmr.msra.gmra.mrb[2].mxu0 %v13660_v48  ;;  %v13778_v42 = vpack.c.bf16 %v2335_v52, %v2332_v22  ;;  %v2353_v48 = vand.u32 4294901760, %v13796_v62  ;;  %v13862_v5 = vsub.f32 %v2303_v12, %v2335_v52  ;;  %v13887_v12 = vsub.f32 %v13784_v54, %v2344_v16 }
 0x45b   :  { %v13890_v22 = vsub.f32 %v13786_v53, %v2347_v45  ;;  %v2473_v52 = vsub.f32 %v13877_v30, %v16489_v57  ;;  %v13904_v53 = vsub.f32 %v13794_v6, %v2350_v56 }
 0x45c   :  { %11213 = vmatprep.subr.bf16.mxu1 %v13778_v42  ;;  %v13802_v37 = vpack.c.bf16 %v2353_v48, %v2350_v56  ;;  %v16491_v34 = vand.u32 4294901760, %v13862_v5  ;;  %v16488_v14 = vand.u32 4294901760, %v13887_v12  ;;  %v13907_v16 = vsub.f32 %v13796_v62, %v2353_v48 }
 0x45d   :  { %11215 = vmatpush3.bf16.msra.mxu1 %v13778_v42  ;;  %v16487_v41 = vand.u32 4294901760, %v13890_v22  ;;  %v2474_v33 = vand.u32 4294901760, %v2473_v52  ;;  %v16486_v4 = vand.u32 4294901760, %v13904_v53  ;;  %v13924_v62 = vsub.f32 %v13804_v63, %v2356_v39 }
 0x45e   :  { %11217 = vmatprep.subr.bf16.mxu1 %v13782_v26  ;;  %v2459_v7 = vsub.f32 %v13862_v5, %v16491_v34  ;;  %v2480_v31 = vsub.f32 %v13887_v12, %v16488_v14  ;;  %v16485_v13 = vand.u32 4294901760, %v13907_v16  ;;  %v13929_v56 = vsub.f32 %v13806_v50, %v2359_v61 }
 0x45f   :  { %v2487_v54 = vsub.f32 %v13890_v22, %v16487_v41  ;;  %v13909_v45 = vpack.c.bf16 %v2474_v33, %v2467_v35  ;;  %v2494_v20 = vsub.f32 %v13904_v53, %v16486_v4  ;;  %v16484_v17 = vand.u32 4294901760, %v13924_v62 }
 0x460   :  { %v2460_v2 = vand.u32 4294901760, %v2459_v7  ;;  %v2481_v1 = vand.u32 4294901760, %v2480_v31  ;;  %v2501_v6 = vsub.f32 %v13907_v16, %v16485_v13  ;;  %v16483_v7 = vand.u32 4294901760, %v13929_v56 }
 0x461   :  { %11219 = vmatpush3.bf16.msra.mxu1 %v13782_v26  ;;  %v2488_v27 = vand.u32 4294901760, %v2487_v54  ;;  %v2495_v48 = vand.u32 4294901760, %v2494_v20  ;;  %v13941_v63 = vsub.f32 %v13818_v9, %v2362_v38  ;;  %v13946_v50 = vsub.f32 %v13820_v3, %v2365_v24 }
 0x462   :  { %11221 = vmatprep.subr.bf16.mxu1 %v13792_v49  ;;  %v13881_v43 = vpack.c.bf16 %v2460_v2, %v2453_v25  ;;  %v2502_v46 = vand.u32 4294901760, %v2501_v6  ;;  %v2508_v2 = vsub.f32 %v13924_v62, %v16484_v17  ;;  %v2515_v39 = vsub.f32 %v13929_v56, %v16483_v7 }
 0x463   :  { %v13913_v59 = vpack.c.bf16 %v2488_v27, %v2481_v1  ;;  %16716 = vst [vmem:[#allocation12_spill] sm:$0xff] %v13941_v63  ;;  %16717 = vst [vmem:[#allocation14_spill] sm:$0xff] %v13946_v50  ;;  %v16482_v18 = vand.u32 4294901760, %v13941_v63  ;;  %v16481_v52 = vand.u32 4294901760, %v13946_v50  ;;  %v13965_v54 = vpack.c.bf16 %v13824_v44, %v13822_v0 }
 0x464   :  { %v13933_v25 = vpack.c.bf16 %v2502_v46, %v2495_v48  ;;  %v2509_v61 = vand.u32 4294901760, %v2508_v2  ;;  %v2516_v35 = vand.u32 4294901760, %v2515_v39  ;;  %v13969_v1 = vpack.c.bf16 %v13847_v28, %v13845_v36  ;;  %v7759_v39 = vld [vmem:[#allocation7 + $0x8] ss:$0 sm:$0xff] }
 0x465   :  { %11223 = vmatpush3.bf16.msra.mxu1 %v13792_v49  ;;  %v2522_v9 = vsub.f32 %v13941_v63, %v16482_v18  ;;  %v2529_v38 = vsub.f32 %v13946_v50, %v16481_v52  ;;  %v13973_v27 = vpack.c.bf16 %v13862_v5, %v13860_v58  ;;  %v13977_v20 = vpack.c.bf16 %v13877_v30, %v13875_v19 }
 0x466   :  { %11225 = vmatprep.subr.bf16.mxu1 %v13802_v37  ;;  %v13959_v3 = vpack.c.bf16 %v2516_v35, %v2509_v61  ;;  %v13981_v6 = vpack.c.bf16 %v13890_v22, %v13887_v12  ;;  %v13985_v48 = vpack.c.bf16 %v13907_v16, %v13904_v53  ;;  %v13989_v46 = vpack.c.bf16 %v13929_v56, %v13924_v62 }
 0x467   :  { %v2523_v24 = vand.u32 4294901760, %v2522_v9  ;;  %v2530_v33 = vand.u32 4294901760, %v2529_v38  ;;  %v13993_v2 = vpack.c.bf16 %v13946_v50, %v13941_v63  ;;  %v2279_v50 = vld [vmem:[#allocation7 + $0x9] sm:$0x1] }
 0x469   :  { %11227 = vmatpush3.bf16.msra.mxu1 %v13802_v37  ;;  %v13961_v31 = vpack.c.bf16 %v2530_v33, %v2523_v24 }
 0x46a   :  { %11229 = vmatprep.subr.bf16.mxu1 %v13816_v40 }
 0x46d   :  { %11231 = vmatpush3.bf16.msra.mxu1 %v13816_v40 }
 0x46e   :  { %11233 = vmatprep.subr.bf16.mxu1 %v13836_v51 }
 0x471   :  { %11235 = vmatpush3.bf16.msra.mxu1 %v13836_v51 }
 0x472   :  { %11237 = vmatprep.subr.bf16.mxu1 %v13852_v10 }
 0x52d   :  { %v9367_v61 = vpop.f32.mrb[2].mxu0 }
 0x52e   :  { %v12552_v35 = vadd.f32 %v9367_v61, %v7759_v39  ;;  %v2247_v9 = vpop.f32.mrb[3].mxu0 }
 0x52f   :  { %v12553_v38 = vadd.f32 %v7759_v39, %v2247_v9 }
 0x530   :  { %v2266_v24 = vmul.f32 %v12552_v35, %v12552_v35 }
 0x531   :  { %v2257_v33 = vadd.f32 %v12553_v38, %v12552_v35  ;;  %v2265_v52 = vmul.f32 %v12553_v38, %v12553_v38 }
 0x533   :  { %v2258_v18 = vrot.slane %v2257_v33, 4  ;;  %v2267_v7 = vadd.f32 %v2266_v24, %v2265_v52 }
 0x535   :  { %v2259_v17 = vadd.f32 %v2258_v18, %v2257_v33  ;;  %v2268_v13 = vrot.slane %v2267_v7, 4  ;;  %v2281_v18 = vld [vmem:[#allocation7 + $0xa] sm:$0x1] }
 0x537   :  { %v2260_v4 = vrot.slane %v2259_v17, 2  ;;  %v2269_v41 = vadd.f32 %v2268_v13, %v2267_v7 }
 0x539   :  { %v2261_v14 = vadd.f32 %v2260_v4, %v2259_v17  ;;  %v2270_v57 = vrot.slane %v2269_v41, 2 }
 0x53b   :  { %v2262_v47 = vrot.slane %v2261_v14, 1  ;;  %v2271_v34 = vadd.f32 %v2270_v57, %v2269_v41 }
 0x53d   :  { %v2263_v23 = vadd.f32 %v2262_v47, %v2261_v14  ;;  %v2272_v55 = vrot.slane %v2271_v34, 1 }
 0x53f   :  { %v2264_v29 = vmul.f32 0.0625, %v2263_v23  ;;  %v2273_v8 = vadd.f32 %v2272_v55, %v2271_v34 }
 0x541   :  { %v2274_v61 = vmul.f32 0.0625, %v2273_v8  ;;  %v2275_v32 = vmul.f32 %v2264_v29, %v2264_v29 }
 0x543   :  { %v2276_v39 = vsub.f32 %v2274_v61, %v2275_v32 }
 0x545   :  { %v2277_v9 = vadd.f32 1e-05, %v2276_v39 }
 0x547   :  { %12693 = vrsqrt.f32 %v2277_v9  ;;  %v14140_v9 = vld [vmem:[#allocation5 + $0xd0] sm:$0xff] }
 0x551   :  { %v12694_v63 = vpop.eup %12693 }
 0x552   :  { %v2280_v52 = vmul.f32 %v12694_v63, %v2279_v50 }
 0x554   :  { %v2282_v24 = vmul.f32 %v2280_v52, %v2264_v29  ;;  %v2287_v13 = vrot.slane %v2280_v52, %v13315_v15  ;;  %v14142_v52 = vld [vmem:[#allocation5 + $0x128] sm:$0xff] }
 0x556   :  { %v2283_v4 = vsub.f32 %v2281_v18, %v2282_v24  ;;  %v2288_v17 = vmul.f32 %v12553_v38, %v2287_v13  ;;  %v2289_v7 = vmul.f32 %v12552_v35, %v2287_v13  ;;  %v16506_v18 = vand.u32 4294901760, %v14140_v9 }
 0x557   :  { %v16505_v24 = vand.u32 4294901760, %v14142_v52 }
 0x558   :  { %v2293_v47 = vrot.slane %v2283_v4, %v13315_v15 }
 0x559   :  { %v14157_v4 = vpack.c.bf16 %v16505_v24, %v16506_v18 }
 0x55a   :  { %v2294_v57 = vadd.f32 %v2293_v47, %v2288_v17  ;;  %v2295_v23 = vadd.f32 %v2293_v47, %v2289_v7  ;;  %v14159_v17 = vld [vmem:[#allocation5 + $0x188] sm:$0xff]  ;;  %v14161_v7 = vld [vmem:[#allocation5 + $0x1e0] sm:$0xff] }
 0x55b   :  { %16739 = vst [vmem:[#allocation16_spill] sm:$0xff] %v14157_v4  ;;  %v16504_v47 = vand.u32 4294901760, %v14159_v17 }
 0x55c   :  { %v2296_v55 = vmax.f32 %v2294_v57, 0.0  ;;  %v2297_v8 = vmax.f32 %v2295_v23, 0.0  ;;  %v16503_v57 = vand.u32 4294901760, %v14161_v7  ;;  %v14166_v23 = vld [vmem:[#allocation5 + $0x180] sm:$0xff] }
 0x55e   :  { %v13997_v34 = vand.u32 4294901760, %v2296_v55  ;;  %v13999_v32 = vand.u32 4294901760, %v2297_v8 }
 0x560   :  { %v2401_v14 = vsub.f32 %v2296_v55, %v13997_v34  ;;  %v14003_v41 = vsub.f32 %v2297_v8, %v13999_v32  ;;  %v14168_v55 = vld [vmem:[#allocation5 + $0x1d8] sm:$0xff]  ;;  %v16502_v8 = vand.u32 4294901760, %v14166_v23 }
 0x562   :  { %v2402_v29 = vand.u32 4294901760, %v2401_v14  ;;  %v2412_v63 = vand.u32 4294901760, %v14003_v41 }
 0x564   :  { %v2403_v50 = vsub.f32 %v2401_v14, %v2402_v29  ;;  %v2413_v35 = vsub.f32 %v14003_v41, %v2412_v63 }
 0x566   :  { %v2404_v38 = vand.u32 4294901760, %v2403_v50  ;;  %v2414_v33 = vand.u32 4294901760, %v2413_v35  ;;  %v14192_v35 = vld [vmem:[#allocation5 + $0x230] sm:$0xff] }
 0x568   :  { %9400 = vmatprep.mubr.f32.mxu1 %v2404_v38  ;;  %v14194_v38 = vld [vmem:[#allocation5 + $0x288] sm:$0xff] }
 0x569   :  { %9401 = vmatmul.mubr.f32.vlgmr.msra.gmra.mrb[2].mxu1 %v2414_v33  ;;  %v3115_v33 = vand.u32 4294901760, %v14192_v35 }
 0x56a   :  { %11239 = vmatpush3.bf16.msra.mxu1 %v13852_v10  ;;  %9435 = vmatprep.mubr.f32.mxu1 %v13997_v34  ;;  %v16718_v10 = vand.u32 4294901760, %v13822_v0  ;;  %v16723_v0 = vand.u32 4294901760, %v13862_v5  ;;  %v16729_v5 = vand.u32 4294901760, %v13907_v16 }
 0x56b   :  { %11241 = vmatprep.subr.bf16.mxu1 %v13867_v21 }
 0x56e   :  { %11243 = vmatpush3.bf16.msra.mxu1 %v13867_v21  ;;  %v16719_v21 = vand.u32 4294901760, %v13824_v44  ;;  %v16724_v44 = vand.u32 4294901760, %v13875_v19  ;;  %v16730_v19 = vand.u32 4294901760, %v13924_v62  ;;  %v14133_v62 = vld [vmem:[#allocation5 + $0xd8] sm:$0xff] }
 0x56f   :  { %11245 = vmatprep.subr.bf16.mxu1 %v13881_v43  ;;  %v16508_v61 = vand.u32 4294901760, %v14133_v62 }
 0x572   :  { %11247 = vmatpush3.bf16.msra.mxu1 %v13881_v43  ;;  %v11332_v43 = vpack.c.bf16 %v16719_v21, %v16718_v10  ;;  %v3119_v10 = vand.u32 4294901760, %v14194_v38 }
 0x573   :  { %11249 = vmatprep.subr.bf16.mxu1 %v13909_v45 }
 0x576   :  { %11251 = vmatpush3.bf16.msra.mxu1 %v13909_v45  ;;  %v16720_v45 = vand.u32 4294901760, %v13845_v36 }
 0x577   :  { %11253 = vmatprep.subr.bf16.mxu1 %v13913_v59 }
 0x57a   :  { %11255 = vmatpush3.bf16.msra.mxu1 %v13913_v59  ;;  %v16721_v59 = vand.u32 4294901760, %v13847_v28  ;;  %v16726_v28 = vand.u32 4294901760, %v13887_v12  ;;  %v16732_v12 = vld [vmem:[#allocation12_spill] sm:$0xff] }
 0x57b   :  { %11257 = vmatprep.subr.bf16.mxu1 %v13933_v25 }
 0x57e   :  { %11259 = vmatpush3.bf16.msra.mxu1 %v13933_v25  ;;  %v11336_v25 = vpack.c.bf16 %v16721_v59, %v16720_v45  ;;  %v3061_v45 = vld [vmem:[#allocation5 + $0x2e8] sm:$0xff]  ;;  %v3063_v59 = vld [vmem:[#allocation5 + $0x340] sm:$0xff] }
 0x57f   :  { %11261 = vmatprep.subr.bf16.mxu1 %v13959_v3 }
 0x582   :  { %11263 = vmatpush3.bf16.msra.mxu1 %v13959_v3  ;;  %v16722_v3 = vand.u32 4294901760, %v13860_v58  ;;  %v16728_v58 = vand.u32 4294901760, %v13904_v53 }
 0x583   :  { %11265 = vmatprep.subr.bf16.mxu1 %v13961_v31 }
 0x586   :  { %11267 = vmatpush3.bf16.msra.mxu1 %v13961_v31  ;;  %v11340_v31 = vpack.c.bf16 %v16723_v0, %v16722_v3  ;;  %v3125_v3 = vand.u32 4294901760, %v3063_v59  ;;  %v3060_v0 = vld [vmem:[#allocation5 + $0x2e0] sm:$0xff] }
 0x587   :  { %11269 = vmatprep.subr.bf16.mxu1 %v13965_v54 }
 0x589   :  { %9436 = vmatmul.mubr.f32.vlgmr.msra.gmra.mrb[2].mxu1 %v13999_v32 }
 0x58a   :  { %11271 = vmatpush3.bf16.msra.mxu1 %v13965_v54  ;;  %9470 = vmatprep.mubr.f32.mxu1 %v2401_v14  ;;  %v16725_v54 = vand.u32 4294901760, %v13877_v30  ;;  %v16731_v30 = vand.u32 4294901760, %v13929_v56  ;;  %v14135_v56 = vld [vmem:[#allocation5 + $0x130] sm:$0xff] }
 0x58b   :  { %11273 = vmatprep.subr.bf16.mxu1 %v13969_v1  ;;  %v16507_v39 = vand.u32 4294901760, %v14135_v56 }
 0x58c   :  { %v11344_v36 = vpack.c.bf16 %v16725_v54, %v16724_v44  ;;  %v3123_v44 = vand.u32 4294901760, %v3060_v0 }
 0x58d   :  { %v14151_v13 = vpack.c.bf16 %v16507_v39, %v16508_v61 }
 0x58e   :  { %11275 = vmatpush3.bf16.msra.mxu1 %v13969_v1  ;;  %v16727_v1 = vand.u32 4294901760, %v13890_v22  ;;  %v16734_v22 = vld [vmem:[#allocation14_spill] sm:$0xff] }
 0x58f   :  { %11277 = vmatprep.subr.bf16.mxu1 %v13973_v27  ;;  %16738 = vst [vmem:[#allocation15_spill] sm:$0xff] %v14151_v13 }
 0x592   :  { %11279 = vmatpush3.bf16.msra.mxu1 %v13973_v27  ;;  %v11348_v27 = vpack.c.bf16 %v16727_v1, %v16726_v28  ;;  %v3065_v1 = vld [vmem:[#allocation5 + $0x398] sm:$0xff] }
 0x593   :  { %11281 = vmatprep.subr.bf16.mxu1 %v13977_v20 }
 0x596   :  { %11283 = vmatpush3.bf16.msra.mxu1 %v13977_v20  ;;  %v11352_v20 = vpack.c.bf16 %v16729_v5, %v16728_v58  ;;  %v3129_v58 = vand.u32 4294901760, %v3065_v1 }
 0x597   :  { %11285 = vmatprep.subr.bf16.mxu1 %v13981_v6 }
 0x59a   :  { %11287 = vmatpush3.bf16.msra.mxu1 %v13981_v6  ;;  %v11356_v6 = vpack.c.bf16 %v16731_v30, %v16730_v19  ;;  %v3066_v19 = vld [vmem:[#allocation5 + $0x3e8] sm:$0xff] }
 0x59b   :  { %11289 = vmatprep.subr.bf16.mxu1 %v13985_v48 }
 0x59e   :  { %11291 = vmatpush3.bf16.msra.mxu1 %v13985_v48  ;;  %v16733_v48 = vand.u32 4294901760, %v16732_v12 }
 0x59f   :  { %11293 = vmatprep.subr.bf16.mxu1 %v13989_v46 }
 0x5a2   :  { %11295 = vmatpush3.bf16.msra.mxu1 %v13989_v46  ;;  %v16735_v46 = vand.u32 4294901760, %v16734_v22  ;;  %v3069_v22 = vld [vmem:[#allocation5 + $0x448] sm:$0xff] }
 0x5a3   :  { %11297 = vmatprep.subr.bf16.mxu1 %v13993_v2 }
 0x5a6   :  { %11299 = vmatpush3.bf16.msra.mxu1 %v13993_v2  ;;  %v11360_v2 = vpack.c.bf16 %v16735_v46, %v16733_v48  ;;  %v3071_v46 = vld [vmem:[#allocation5 + $0x4a0] sm:$0xff] }
 0x5a7   :  { %11301 = vmatprep.subr.bf16.mxu1 %v13770_v60 }
 0x5a9   :  { %9471 = vmatmul.mubr.f32.vlgmr.msra.gmra.mrb[2].mxu1 %v14003_v41  ;;  %v14185_v41 = vld [vmem:[#allocation5 + $0x238] sm:$0xff] }
 0x5aa   :  { %11303 = vmatpush3.bf16.msra.mxu1 %v13770_v60  ;;  %9505 = vmatprep.mubr.f32.mxu1 %v2402_v29  ;;  %v14187_v29 = vld [vmem:[#allocation5 + $0x290] sm:$0xff] }
 0x5ab   :  { %11305 = vmatprep.subr.bf16.mxu1 %v13774_v11  ;;  %v16499_v50 = vand.u32 4294901760, %v14187_v29 }
 0x5ae   :  { %11307 = vmatpush3.bf16.msra.mxu1 %v13774_v11 }
 0x5af   :  { %11309 = vmatprep.subr.bf16.mxu1 %v13778_v42 }
 0x5b2   :  { %11311 = vmatpush3.bf16.msra.mxu1 %v13778_v42 }
 0x5b3   :  { %11313 = vmatprep.subr.bf16.mxu1 %v13782_v26 }
 0x5b6   :  { %11315 = vmatpush3.bf16.msra.mxu1 %v13782_v26 }
 0x5b7   :  { %11317 = vmatprep.subr.bf16.mxu1 %v13792_v49 }
 0x5ba   :  { %11319 = vmatpush3.bf16.msra.mxu1 %v13792_v49 }
 0x5bb   :  { %11321 = vmatprep.subr.bf16.mxu1 %v13802_v37 }
 0x5be   :  { %11323 = vmatpush3.bf16.msra.mxu1 %v13802_v37 }
 0x5bf   :  { %11325 = vmatprep.subr.bf16.mxu1 %v13816_v40 }
 0x5c2   :  { %11327 = vmatpush3.bf16.msra.mxu1 %v13816_v40 }
 0x5c3   :  { %11329 = vmatprep.subr.bf16.mxu1 %v13836_v51 }
 0x5c6   :  { %11331 = vmatpush3.bf16.msra.mxu1 %v13836_v51 }
 0x5c7   :  { %11333 = vmatprep.subr.bf16.mxu1 %v11332_v43 }
 0x5c9   :  { %9506 = vmatmul.mubr.f32.vlgmr.msra.gmra.mrb[2].mxu1 %v2412_v63  ;;  %v16500_v63 = vand.u32 4294901760, %v14185_v41 }
 0x5ca   :  { %11335 = vmatpush3.bf16.msra.mxu1 %v11332_v43  ;;  %9540 = vmatprep.mubr.f32.mxu1 %v13997_v34  ;;  %v14205_v43 = vpack.c.bf16 %v3119_v10, %v3115_v33 }
 0x5cb   :  { %11337 = vmatprep.subr.bf16.mxu1 %v11336_v25  ;;  %v14203_v21 = vpack.c.bf16 %v16499_v50, %v16500_v63  ;;  %v3141_v50 = vand.u32 4294901760, %v3071_v46  ;;  %v3068_v63 = vld [vmem:[#allocation5 + $0x440] sm:$0xff] }
 0x5cc   :  { %16743 = vst [vmem:[#allocation20_spill] sm:$0xff] %v14205_v43 }
 0x5cd   :  { %16742 = vst [vmem:[#allocation19_spill] sm:$0xff] %v14203_v21 }
 0x5ce   :  { %11339 = vmatpush3.bf16.msra.mxu1 %v11336_v25  ;;  %v3121_v25 = vand.u32 4294901760, %v3061_v45 }
 0x5cf   :  { %11341 = vmatprep.subr.bf16.mxu1 %v11340_v31 }
 0x5d2   :  { %11343 = vmatpush3.bf16.msra.mxu1 %v11340_v31  ;;  %v3062_v31 = vld [vmem:[#allocation5 + $0x338] sm:$0xff] }
 0x5d3   :  { %11345 = vmatprep.subr.bf16.mxu1 %v11344_v36  ;;  %v3127_v54 = vand.u32 4294901760, %v3062_v31 }
 0x5d5   :  { %v14211_v28 = vpack.c.bf16 %v3127_v54, %v3123_v44 }
 0x5d6   :  { %11347 = vmatpush3.bf16.msra.mxu1 %v11344_v36  ;;  %v14209_v36 = vpack.c.bf16 %v3125_v3, %v3121_v25 }
 0x5d7   :  { %11349 = vmatprep.subr.bf16.mxu1 %v11348_v27  ;;  %16745 = vst [vmem:[#allocation22_spill] sm:$0xff] %v14211_v28 }
 0x5d8   :  { %16744 = vst [vmem:[#allocation21_spill] sm:$0xff] %v14209_v36 }
 0x5da   :  { %11351 = vmatpush3.bf16.msra.mxu1 %v11348_v27  ;;  %v3067_v27 = vld [vmem:[#allocation5 + $0x3f0] sm:$0xff] }
 0x5db   :  { %11353 = vmatprep.subr.bf16.mxu1 %v11352_v20  ;;  %v3133_v5 = vand.u32 4294901760, %v3067_v27 }
 0x5dd   :  { %v14215_v12 = vpack.c.bf16 %v3133_v5, %v3129_v58 }
 0x5de   :  { %11355 = vmatpush3.bf16.msra.mxu1 %v11352_v20  ;;  %v3064_v20 = vld [vmem:[#allocation5 + $0x390] sm:$0xff] }
 0x5df   :  { %11357 = vmatprep.subr.bf16.mxu1 %v11356_v6  ;;  %v3131_v30 = vand.u32 4294901760, %v3064_v20  ;;  %16746 = vst [vmem:[#allocation23_spill] sm:$0xff] %v14215_v12 }
 0x5e2   :  { %11359 = vmatpush3.bf16.msra.mxu1 %v11356_v6  ;;  %v3135_v6 = vand.u32 4294901760, %v3066_v19 }
 0x5e3   :  { %11361 = vmatprep.subr.bf16.mxu1 %v11360_v2 }
 0x5e4   :  { %v14217_v48 = vpack.c.bf16 %v3135_v6, %v3131_v30 }
 0x5e6   :  { %11363 = vmatpush3.bf16.msra.mxu1 %v11360_v2  ;;  %16747 = vst [vmem:[#allocation24_spill] sm:$0xff] %v14217_v48  ;;  %v3137_v2 = vand.u32 4294901760, %v3069_v22 }
 0x5e7   :  { %11365 = vmatprep.subr.bf16.mxu1 %v13770_v60 }
 0x5e8   :  { %v14231_v18 = vpack.c.bf16 %v3141_v50, %v3137_v2 }
 0x5e9   :  { %9541 = vmatmul.mubr.f32.vlgmr.msra.gmra.mrb[2].mxu1 %v13999_v32 }
 0x5ea   :  { %11367 = vmatpush3.bf16.msra.mxu1 %v13770_v60  ;;  %9575 = vmatprep.mubr.f32.mxu1 %v13997_v34  ;;  %v14109_v60 = vld [vmem:[#allocation5 + $0x28] sm:$0xff]  ;;  %v16501_v34 = vand.u32 4294901760, %v14168_v55  ;;  %16748 = vst [vmem:[#allocation25_spill] sm:$0xff] %v14231_v18 }
 0x5eb   :  { %11369 = vmatprep.subr.bf16.mxu1 %v13774_v11 }
 0x5ec   :  { %v14183_v14 = vpack.c.bf16 %v16501_v34, %v16502_v8  ;;  %v3070_v34 = vld [vmem:[#allocation5 + $0x498] sm:$0xff]  ;;  %v3139_v8 = vand.u32 4294901760, %v3068_v63 }
 0x5ee   :  { %11371 = vmatpush3.bf16.msra.mxu1 %v13774_v11  ;;  %v14111_v11 = vld [vmem:[#allocation5 + $0x80] sm:$0xff]  ;;  %16741 = vst [vmem:[#allocation18_spill] sm:$0xff] %v14183_v14 }
 0x5ef   :  { %11373 = vmatprep.subr.bf16.mxu1 %v13778_v42 }
 0x5f2   :  { %11375 = vmatpush3.bf16.msra.mxu1 %v13778_v42  ;;  %v3089_v42 = vand.u32 4294901760, %v14109_v60 }
 0x5f3   :  { %11377 = vmatprep.subr.bf16.mxu1 %v13782_v26 }
 0x5f6   :  { %11379 = vmatpush3.bf16.msra.mxu1 %v13782_v26  ;;  %v3093_v26 = vand.u32 4294901760, %v14111_v11 }
 0x5f7   :  { %11381 = vmatprep.subr.bf16.mxu1 %v13792_v49 }
 0x5f8   :  { %v14229_v24 = vsub.f32 %v14111_v11, %v3093_v26 }
 0x5fa   :  { %11383 = vmatpush3.bf16.msra.mxu1 %v13792_v49  ;;  %v14115_v49 = vld [vmem:[#allocation5 + $0x20] sm:$0xff] }
 0x5fb   :  { %11385 = vmatprep.subr.bf16.mxu1 %v13802_v37 }
 0x5fe   :  { %11387 = vmatpush3.bf16.msra.mxu1 %v13802_v37  ;;  %v14117_v37 = vld [vmem:[#allocation5 + $0x78] sm:$0xff] }
 0x5ff   :  { %11389 = vmatprep.subr.bf16.mxu1 %v13816_v40  ;;  %v3095_v53 = vand.u32 4294901760, %v14117_v37 }
 0x601   :  { %v14241_v61 = vsub.f32 %v14117_v37, %v3095_v53  ;;  %v16751_v37 = vand.u32 4294901760, %v14135_v56 }
 0x602   :  { %11391 = vmatpush3.bf16.msra.mxu1 %v13816_v40  ;;  %v3091_v40 = vand.u32 4294901760, %v14115_v49 }
 0x603   :  { %11393 = vmatprep.subr.bf16.mxu1 %v13836_v51 }
 0x604   :  { %v14131_v16 = vpack.c.bf16 %v3095_v53, %v3091_v40  ;;  %v14236_v39 = vsub.f32 %v14115_v49, %v3091_v40  ;;  %v16750_v49 = vand.u32 4294901760, %v14133_v62  ;;  %v14256_v53 = vsub.f32 %v14135_v56, %v16751_v37 }
 0x605   :  { %v16755_v56 = vand.u32 4294901760, %v14161_v7 }
 0x606   :  { %11395 = vmatpush3.bf16.msra.mxu1 %v13836_v51  ;;  %v14125_v51 = vpack.c.bf16 %v3093_v26, %v3089_v42  ;;  %16737 = vst [vmem:[#allocation14_spill] sm:$0xff] %v14131_v16  ;;  %v14251_v40 = vsub.f32 %v14133_v62, %v16750_v49  ;;  %v16754_v62 = vand.u32 4294901760, %v14159_v17 }
 0x607   :  { %v14277_v37 = vsub.f32 %v14161_v7, %v16755_v56  ;;  %v14300_v56 = vsub.f32 %v14192_v35, %v3115_v33  ;;  %v14319_v35 = vsub.f32 %v3066_v19, %v3135_v6  ;;  %v3074_v33 = vld [vmem:[#allocation5 + $0x548] sm:$0xff] }
 0x608   :  { %16736 = vst [vmem:[#allocation12_spill] sm:$0xff] %v14125_v51  ;;  %11397 = vmatprep.subr.bf16.mxu0 %v14125_v51  ;;  %v14272_v49 = vsub.f32 %v14159_v17, %v16754_v62  ;;  %v16759_v62 = vand.u32 4294901760, %v14187_v29 }
 0x609   :  { %9576 = vmatmul.mubr.f32.vlgmr.msra.gmra.mrb[2].mxu1 %v13999_v32  ;;  %11399 = vmatpush1.bf16.msra.mxu0 %v14131_v16  ;;  %v14177_v32 = vpack.c.bf16 %v16503_v57, %v16504_v47  ;;  %v3143_v57 = vand.u32 4294901760, %v3070_v34  ;;  %v14224_v47 = vsub.f32 %v14109_v60, %v3089_v42  ;;  %v3073_v60 = vld [vmem:[#allocation5 + $0x4f8] sm:$0xff]  ;;  %v3075_v42 = vld [vmem:[#allocation5 + $0x550] sm:$0xff] }
 0x60a   :  { %11401 = vmatprep.subr.bf16.mxu0 %v14151_v13  ;;  %v3145_v11 = vand.u32 4294901760, %v3073_v60  ;;  %v3149_v26 = vand.u32 4294901760, %v3075_v42  ;;  %v14297_v7 = vsub.f32 %v14187_v29, %v16759_v62  ;;  %v14317_v29 = vsub.f32 %v3064_v20, %v3131_v30 }
 0x60b   :  { %16740 = vst [vmem:[#allocation17_spill] sm:$0xff] %v14177_v32 }
 0x60c   :  { %16760 = vst [vmem:[#allocation27_spill] sm:$0xff] %v14317_v29 }
 0x60d   :  { %11403 = vmatpush1.bf16.msra.mxu0 %v14157_v4 }
 0x60e   :  { %11405 = vmatprep.subr.bf16.mxu0 %v14177_v32 }
 0x611   :  { %11407 = vmatpush1.bf16.msra.mxu0 %v14183_v14 }
 0x612   :  { %11409 = vmatprep.subr.bf16.mxu0 %v14203_v21  ;;  %v14315_v21 = vsub.f32 %v3067_v27, %v3133_v5  ;;  %v16769_v27 = vand.u32 4294901760, %v14229_v24 }
 0x615   :  { %11411 = vmatpush1.bf16.msra.mxu0 %v14205_v43  ;;  %v16753_v43 = vand.u32 4294901760, %v14142_v52 }
 0x616   :  { %11413 = vmatprep.subr.bf16.mxu0 %v14209_v36  ;;  %v16752_v36 = vand.u32 4294901760, %v14140_v9 }
 0x619   :  { %11415 = vmatpush1.bf16.msra.mxu0 %v14211_v28  ;;  %v16758_v28 = vand.u32 4294901760, %v14185_v41 }
 0x61a   :  { %11417 = vmatprep.subr.bf16.mxu0 %v14215_v12  ;;  %v14266_v12 = vsub.f32 %v14142_v52, %v16753_v43  ;;  %v16757_v52 = vand.u32 4294901760, %v14168_v55 }
 0x61b   :  { %v14292_v17 = vsub.f32 %v14185_v41, %v16758_v28  ;;  %v3072_v41 = vld [vmem:[#allocation5 + $0x4f0] sm:$0xff]  ;;  %v14313_v28 = vsub.f32 %v3065_v1, %v3129_v58  ;;  %v16534_v58 = vand.u32 4294901760, %v14251_v40 }
 0x61c   :  { %v14287_v43 = vsub.f32 %v14168_v55, %v16757_v52  ;;  %v14307_v55 = vsub.f32 %v3063_v59, %v3125_v3  ;;  %v14309_v52 = vsub.f32 %v3060_v0, %v3123_v44  ;;  %v14327_v59 = vsub.f32 %v3070_v34, %v3143_v57 }
 0x61d   :  { %11419 = vmatpush1.bf16.msra.mxu0 %v14217_v48  ;;  %v14243_v48 = vpack.c.bf16 %v3143_v57, %v3139_v8  ;;  %v14331_v3 = vsub.f32 %v3073_v60, %v3145_v11  ;;  %v14333_v0 = vsub.f32 %v3075_v42, %v3149_v26  ;;  %v3151_v44 = vand.u32 4294901760, %v3074_v33 }
 0x61e   :  { %11421 = vmatprep.subr.bf16.mxu0 %v14231_v18  ;;  %v14261_v18 = vsub.f32 %v14140_v9, %v16752_v36  ;;  %v16756_v9 = vand.u32 4294901760, %v14166_v23  ;;  %16764 = vst [vmem:[#allocation31_spill] sm:$0xff] %v14327_v59  ;;  %v16540_v34 = vand.u32 4294901760, %v14236_v39 }
 0x61f   :  { %16749 = vst [vmem:[#allocation26_spill] sm:$0xff] %v14243_v48  ;;  %16766 = vst [vmem:[#allocation33_spill] sm:$0xff] %v14331_v3  ;;  %v14350_v20 = vsub.f32 %v3074_v33, %v3151_v44 }
 0x620   :  { %v14282_v36 = vsub.f32 %v14166_v23, %v16756_v9  ;;  %v14303_v23 = vsub.f32 %v14194_v38, %v3119_v10  ;;  %v14305_v9 = vsub.f32 %v3061_v45, %v3121_v25  ;;  %v14321_v38 = vsub.f32 %v3069_v22, %v3137_v2  ;;  %16767 = vst [vmem:[#allocation34_spill] sm:$0xff] %v14333_v0 }
 0x621   :  { %11423 = vmatpush1.bf16.msra.mxu0 %v14243_v48  ;;  %v14311_v48 = vsub.f32 %v3062_v31, %v3127_v54  ;;  %v14323_v10 = vsub.f32 %v3071_v46, %v3141_v50  ;;  %v14325_v45 = vsub.f32 %v3068_v63, %v3139_v8  ;;  %v14329_v25 = vpack.c.bf16 %v3149_v26, %v3145_v11 }
 0x622   :  { %16761 = vst [vmem:[#allocation28_spill] sm:$0xff] %v14321_v38  ;;  %v3147_v31 = vand.u32 4294901760, %v3072_v41  ;;  %v16768_v54 = vand.u32 4294901760, %v14224_v47  ;;  %v3223_v50 = vsub.f32 %v14229_v24, %v16769_v27  ;;  %v16542_v8 = vmov 0.0   ;;  %16772 = vst [vmem:[#allocation37_spill] sm:$0xff] %v14350_v20 }
 0x623   :  { %16762 = vst [vmem:[#allocation29_spill] sm:$0xff] %v14323_v10  ;;  %16763 = vst [vmem:[#allocation30_spill] sm:$0xff] %v14325_v45  ;;  %11425 = vmatprep.subr.bf16.mxu0 %v14329_v25  ;;  %3185 = vmatprep.mubr.f32.mxu0 %v16542_v8  ;;  %v16537_v63 = vand.u32 4294901760, %v14241_v61  ;;  %v3217_v6 = vsub.f32 %v14236_v39, %v16540_v34  ;;  %v3235_v46 = vsub.f32 %v14251_v40, %v16534_v58 }
 0x624   :  { %16765 = vst [vmem:[#allocation32_spill] sm:$0xff] %v14329_v25  ;;  %v3211_v1 = vsub.f32 %v14224_v47, %v16768_v54  ;;  %v14342_v57 = vsub.f32 %v3072_v41, %v3147_v31  ;;  %v14348_v5 = vpack.c.bf16 %v3151_v44, %v3147_v31  ;;  %v3224_v30 = vand.u32 4294901760, %v3223_v50 }
 0x625   :  { %v3229_v22 = vsub.f32 %v14241_v61, %v16537_v63  ;;  %v16530_v2 = vand.u32 4294901760, %v14256_v53  ;;  %v16526_v42 = vand.u32 4294901760, %v14261_v18  ;;  %v16525_v11 = vand.u32 4294901760, %v14266_v12 }
 0x626   :  { %16770 = vst [vmem:[#allocation35_spill] sm:$0xff] %v14342_v57  ;;  %16771 = vst [vmem:[#allocation36_spill] sm:$0xff] %v14348_v5  ;;  %v3212_v19 = vand.u32 4294901760, %v3211_v1  ;;  %11427 = vmatpush1.bf16.msra.mxu0 %v14348_v5  ;;  %v16527_v26 = vand.u32 4294901760, %v14272_v49  ;;  %v3218_v62 = vand.u32 4294901760, %v3217_v6  ;;  %v3236_v33 = vand.u32 4294901760, %v3235_v46 }
 0x627   :  { %v3230_v41 = vand.u32 4294901760, %v3229_v22  ;;  %v3247_v31 = vsub.f32 %v14256_v53, %v16530_v2  ;;  %v3241_v44 = vsub.f32 %v14261_v18, %v16526_v42  ;;  %v3253_v54 = vsub.f32 %v14266_v12, %v16525_v11 }
 0x628   :  { %v11428_v60 = vpack.c.bf16 %v3224_v30, %v3212_v19  ;;  %v3259_v1 = vsub.f32 %v14272_v49, %v16527_v26  ;;  %v16528_v27 = vand.u32 4294901760, %v14277_v37  ;;  %v16529_v30 = vand.u32 4294901760, %v14282_v36 }
 0x629   :  { %v14379_v50 = vpack.c.bf16 %v3230_v41, %v3218_v62  ;;  %v3248_v19 = vand.u32 4294901760, %v3247_v31  ;;  %v16532_v6 = vand.u32 4294901760, %v14287_v43  ;;  %v3242_v22 = vand.u32 4294901760, %v3241_v44 }
 0x62a   :  { %11429 = vmatprep.subr.bf16.mxu0 %v11428_v60  ;;  %v3254_v46 = vand.u32 4294901760, %v3253_v54  ;;  %v3260_v60 = vand.u32 4294901760, %v3259_v1  ;;  %v3271_v11 = vsub.f32 %v14277_v37, %v16528_v27  ;;  %v3265_v26 = vsub.f32 %v14282_v36, %v16529_v30 }
 0x62b   :  { %v14386_v42 = vpack.c.bf16 %v3248_v19, %v3236_v33  ;;  %v3277_v62 = vsub.f32 %v14287_v43, %v16532_v6  ;;  %v16531_v41 = vand.u32 4294901760, %v14292_v17  ;;  %v16533_v54 = vand.u32 4294901760, %v14297_v7 }
 0x62c   :  { %v14395_v31 = vpack.c.bf16 %v3254_v46, %v3242_v22  ;;  %v3272_v44 = vand.u32 4294901760, %v3271_v11  ;;  %v16535_v1 = vand.u32 4294901760, %v14300_v56  ;;  %v3266_v27 = vand.u32 4294901760, %v3265_v26 }
 0x62d   :  { %v3278_v33 = vand.u32 4294901760, %v3277_v62  ;;  %v3283_v19 = vsub.f32 %v14292_v17, %v16531_v41  ;;  %v16536_v30 = vand.u32 4294901760, %v14303_v23  ;;  %v3295_v22 = vsub.f32 %v14297_v7, %v16533_v54 }
 0x62e   :  { %v14403_v2 = vpack.c.bf16 %v3272_v44, %v3260_v60  ;;  %v3289_v11 = vsub.f32 %v14300_v56, %v16535_v1  ;;  %v16538_v46 = vand.u32 4294901760, %v14305_v9  ;;  %v16539_v60 = vand.u32 4294901760, %v14307_v55 }
 0x62f   :  { %v14412_v26 = vpack.c.bf16 %v3278_v33, %v3266_v27  ;;  %v3284_v62 = vand.u32 4294901760, %v3283_v19  ;;  %v3301_v41 = vsub.f32 %v14303_v23, %v16536_v30  ;;  %v3296_v44 = vand.u32 4294901760, %v3295_v22 }
 0x630   :  { %v3290_v6 = vand.u32 4294901760, %v3289_v11  ;;  %v3307_v54 = vsub.f32 %v14305_v9, %v16538_v46  ;;  %v16541_v58 = vand.u32 4294901760, %v14309_v52  ;;  %v3319_v27 = vsub.f32 %v14307_v55, %v16539_v60 }
 0x631   :  { %v3302_v1 = vand.u32 4294901760, %v3301_v41  ;;  %v16544_v33 = vand.u32 4294901760, %v14311_v48  ;;  %v16545_v19 = vand.u32 4294901760, %v14313_v28  ;;  %v14427_v30 = vpack.c.bf16 %v3296_v44, %v3284_v62 }
 0x632   :  { %v3308_v63 = vand.u32 4294901760, %v3307_v54  ;;  %v3313_v22 = vsub.f32 %v14309_v52, %v16541_v58  ;;  %v16546_v11 = vand.u32 4294901760, %v14315_v21  ;;  %v3320_v41 = vand.u32 4294901760, %v3319_v27 }
 0x633   :  { %v14433_v46 = vpack.c.bf16 %v3302_v1, %v3290_v6  ;;  %v3325_v60 = vsub.f32 %v14311_v48, %v16544_v33  ;;  %v3331_v34 = vsub.f32 %v14313_v28, %v16545_v19  ;;  %v16549_v44 = vand.u32 4294901760, %v14317_v29 }
 0x634   :  { %v3314_v62 = vand.u32 4294901760, %v3313_v22  ;;  %v3343_v54 = vsub.f32 %v14315_v21, %v16546_v11  ;;  %v16550_v58 = vand.u32 4294901760, %v14319_v35  ;;  %v14446_v6 = vpack.c.bf16 %v3320_v41, %v3308_v63 }
 0x635   :  { %v3326_v1 = vand.u32 4294901760, %v3325_v60  ;;  %v3332_v27 = vand.u32 4294901760, %v3331_v34  ;;  %v16553_v8 = vand.u32 4294901760, %v14321_v38  ;;  %v3337_v19 = vsub.f32 %v14317_v29, %v16549_v44 }
 0x636   :  { %v3344_v33 = vand.u32 4294901760, %v3343_v54  ;;  %v3349_v22 = vsub.f32 %v14319_v35, %v16550_v58  ;;  %v16556_v11 = vand.u32 4294901760, %v14323_v10  ;;  %v16557_v34 = vand.u32 4294901760, %v14325_v45 }
 0x637   :  { %v14456_v5 = vpack.c.bf16 %v3326_v1, %v3314_v62  ;;  %v3355_v63 = vsub.f32 %v14321_v38, %v16553_v8  ;;  %v16561_v60 = vand.u32 4294901760, %v14327_v59  ;;  %v3338_v54 = vand.u32 4294901760, %v3337_v19 }
 0x638   :  { %v14463_v41 = vpack.c.bf16 %v3344_v33, %v3332_v27  ;;  %v3350_v44 = vand.u32 4294901760, %v3349_v22  ;;  %v3367_v58 = vsub.f32 %v14323_v10, %v16556_v11  ;;  %v3361_v62 = vsub.f32 %v14325_v45, %v16557_v34  ;;  %v3025_v10 = vld [vmem:[#allocation7 + $0xd] sm:$0x1] }
 0x639   :  { %v3356_v25 = vand.u32 4294901760, %v3355_v63  ;;  %v3373_v1 = vsub.f32 %v14327_v59, %v16561_v60  ;;  %v16560_v8 = vand.u32 4294901760, %v14331_v3  ;;  %v16564_v19 = vand.u32 4294901760, %v14333_v0 }
 0x63a   :  { %v14475_v14 = vpack.c.bf16 %v3350_v44, %v3338_v54  ;;  %v3368_v33 = vand.u32 4294901760, %v3367_v58  ;;  %v16565_v27 = vand.u32 4294901760, %v14342_v57  ;;  %v3362_v22 = vand.u32 4294901760, %v3361_v62 }
 0x63b   :  { %v3374_v11 = vand.u32 4294901760, %v3373_v1  ;;  %v3379_v63 = vsub.f32 %v14331_v3, %v16560_v8  ;;  %v16566_v34 = vand.u32 4294901760, %v14350_v20  ;;  %v3391_v44 = vsub.f32 %v14333_v0, %v16564_v19 }
 0x63c   :  { %v14483_v32 = vpack.c.bf16 %v3368_v33, %v3356_v25  ;;  %v3385_v58 = vsub.f32 %v14342_v57, %v16565_v27 }
 0x63d   :  { %v14491_v54 = vpack.c.bf16 %v3374_v11, %v3362_v22  ;;  %v3380_v62 = vand.u32 4294901760, %v3379_v63  ;;  %v3397_v1 = vsub.f32 %v14350_v20, %v16566_v34  ;;  %v3392_v8 = vand.u32 4294901760, %v3391_v44 }
 0x63e   :  { %v3386_v60 = vand.u32 4294901760, %v3385_v58 }
 0x63f   :  { %v3398_v4 = vand.u32 4294901760, %v3397_v1  ;;  %v14496_v25 = vpack.c.bf16 %v3392_v8, %v3380_v62  ;;  %v7760_v8 = vld [vmem:[#allocation7 + $0xc] ss:$0 sm:$0xff] }
 0x641   :  { %v14498_v33 = vpack.c.bf16 %v3398_v4, %v3386_v60 }
 0x6dc   :  { %v9577_v58 = vpop.f32.mrb[2].mxu1 }
 0x6dd   :  { %v12554_v63 = vadd.f32 %v9577_v58, %v7760_v8  ;;  %v2993_v22 = vpop.f32.mrb[3].mxu1 }
 0x6de   :  { %v12555_v62 = vadd.f32 %v7760_v8, %v2993_v22 }
 0x6df   :  { %v3012_v11 = vmul.f32 %v12554_v63, %v12554_v63 }
 0x6e0   :  { %v3003_v27 = vadd.f32 %v12555_v62, %v12554_v63  ;;  %v3011_v1 = vmul.f32 %v12555_v62, %v12555_v62 }
 0x6e2   :  { %v3004_v19 = vrot.slane %v3003_v27, 4  ;;  %v3013_v13 = vadd.f32 %v3012_v11, %v3011_v1  ;;  %v16773_v1 = vmov 0.0  }
 0x6e4   :  { %v3005_v34 = vadd.f32 %v3004_v19, %v3003_v27  ;;  %v3014_v16 = vrot.slane %v3013_v13, 4  ;;  %v3027_v19 = vld [vmem:[#allocation7 + $0xe] sm:$0x1] }
 0x6e6   :  { %v3006_v51 = vrot.slane %v3005_v34, 2  ;;  %v3015_v4 = vadd.f32 %v3014_v16, %v3013_v13 }
 0x6e8   :  { %v3007_v45 = vadd.f32 %v3006_v51, %v3005_v34  ;;  %v3016_v59 = vrot.slane %v3015_v4, 2 }
 0x6ea   :  { %v3008_v60 = vrot.slane %v3007_v45, 1  ;;  %v3017_v3 = vadd.f32 %v3016_v59, %v3015_v4 }
 0x6ec   :  { %v3009_v0 = vadd.f32 %v3008_v60, %v3007_v45  ;;  %v3018_v44 = vrot.slane %v3017_v3, 1 }
 0x6ee   :  { %v3010_v57 = vmul.f32 0.0625, %v3009_v0  ;;  %v3019_v20 = vadd.f32 %v3018_v44, %v3017_v3 }
 0x6f0   :  { %v3020_v58 = vmul.f32 0.0625, %v3019_v20  ;;  %v3021_v38 = vmul.f32 %v3010_v57, %v3010_v57 }
 0x6f2   :  { %v3022_v22 = vsub.f32 %v3020_v58, %v3021_v38 }
 0x6f4   :  { %v3023_v8 = vadd.f32 1e-05, %v3022_v22 }
 0x6f6   :  { %12695 = vrsqrt.f32 %v3023_v8  ;;  %v16790_v8 = vld [vmem:[#allocation31_spill] sm:$0xff] }
 0x700   :  { %v12696_v29 = vpop.eup %12695 }
 0x701   :  { %v3026_v11 = vmul.f32 %v12696_v29, %v3025_v10 }
 0x703   :  { %v3028_v27 = vmul.f32 %v3026_v11, %v3010_v57  ;;  %v3033_v16 = vrot.slane %v3026_v11, %v13315_v15  ;;  %v16791_v11 = vld [vmem:[#allocation30_spill] sm:$0xff] }
 0x705   :  { %v3029_v51 = vsub.f32 %v3027_v19, %v3028_v27  ;;  %v3034_v13 = vmul.f32 %v12555_v62, %v3033_v16  ;;  %v3035_v34 = vmul.f32 %v12554_v63, %v3033_v16  ;;  %v16792_v19 = vpack.c.bf16 %v16790_v8, %v16791_v11  ;;  %v16793_v27 = vld [vmem:[#allocation34_spill] sm:$0xff]  ;;  %v16794_v16 = vld [vmem:[#allocation33_spill] sm:$0xff] }
 0x707   :  { %v3039_v45 = vrot.slane %v3029_v51, %v13315_v15  ;;  %v16795_v51 = vpack.c.bf16 %v16793_v27, %v16794_v16 }
 0x709   :  { %v3040_v59 = vadd.f32 %v3039_v45, %v3034_v13  ;;  %v3041_v0 = vadd.f32 %v3039_v45, %v3035_v34  ;;  %v16796_v13 = vld [vmem:[#allocation37_spill] sm:$0xff]  ;;  %v16797_v34 = vld [vmem:[#allocation35_spill] sm:$0xff] }
 0x70a   :  { %v16798_v45 = vpack.c.bf16 %v16796_v13, %v16797_v34 }
 0x70b   :  { %v3042_v3 = vmax.f32 %v3040_v59, 0.0  ;;  %v3043_v20 = vmax.f32 %v3041_v0, 0.0  ;;  %v16799_v59 = vld [vmem:[#allocation12_spill] sm:$0xff]  ;;  %v16800_v0 = vld [vmem:[#allocation14_spill] sm:$0xff] }
 0x70d   :  { %v14534_v4 = vand.u32 4294901760, %v3042_v3  ;;  %v14536_v38 = vand.u32 4294901760, %v3043_v20 }
 0x70f   :  { %v14539_v60 = vsub.f32 %v3042_v3, %v14534_v4  ;;  %v14542_v29 = vsub.f32 %v3043_v20, %v14536_v38  ;;  %v16801_v3 = vld [vmem:[#allocation15_spill] sm:$0xff]  ;;  %v16802_v20 = vld [vmem:[#allocation16_spill] sm:$0xff] }
 0x711   :  { %v3188_v10 = vand.u32 4294901760, %v14539_v60  ;;  %v16591_v57 = vand.u32 4294901760, %v14542_v29 }
 0x713   :  { %v3189_v63 = vsub.f32 %v14539_v60, %v3188_v10  ;;  %v3200_v62 = vsub.f32 %v14542_v29, %v16591_v57 }
 0x715   :  { %v3190_v44 = vand.u32 4294901760, %v3189_v63  ;;  %v3201_v58 = vand.u32 4294901760, %v3200_v62  ;;  %v16803_v63 = vld [vmem:[#allocation17_spill] sm:$0xff]  ;;  %v16805_v62 = vld [vmem:[#allocation19_spill] sm:$0xff] }
 0x717   :  { %3191 = vmatmul.mubr.f32.vlgmr.msra.gmra.mrb[4].mxu0 %v3190_v44  ;;  %v16804_v44 = vld [vmem:[#allocation18_spill] sm:$0xff] }
 0x718   :  { %11431 = vmatpush1.bf16.msra.mxu0 %v14379_v50  ;;  %3196 = vmatprep.mubr.f32.mxu0 %v16773_v1  ;;  %v16779_v50 = vpack.c.bf16 %v14287_v43, %v14282_v36 }
 0x719   :  { %11433 = vmatprep.subr.bf16.mxu0 %v14386_v42  ;;  %v16778_v42 = vpack.c.bf16 %v14277_v37, %v14272_v49 }
 0x71b   :  { %3202 = vmatmul.mubr.f32.gmra.mrb[6].mxu0 %v3201_v58  ;;  %v16806_v58 = vld [vmem:[#allocation20_spill] sm:$0xff] }
 0x71c   :  { %11435 = vmatpush1.bf16.msra.mxu0 %v14395_v31  ;;  %3432 = vmatprep.mubr.f32.mxu0 %v16773_v1  ;;  %v16781_v31 = vpack.c.bf16 %v14303_v23, %v14300_v56 }
 0x71d   :  { %11437 = vmatprep.subr.bf16.mxu0 %v14403_v2  ;;  %v16774_v2 = vpack.c.bf16 %v14229_v24, %v14224_v47 }
 0x720   :  { %11439 = vmatpush1.bf16.msra.mxu0 %v14412_v26  ;;  %v16783_v26 = vpack.c.bf16 %v14311_v48, %v14309_v52 }
 0x721   :  { %11441 = vmatprep.subr.bf16.mxu0 %v14427_v30  ;;  %v16780_v30 = vpack.c.bf16 %v14297_v7, %v14292_v17 }
 0x724   :  { %11443 = vmatpush1.bf16.msra.mxu0 %v14433_v46  ;;  %v16782_v46 = vpack.c.bf16 %v14307_v55, %v14305_v9 }
 0x725   :  { %11445 = vmatprep.subr.bf16.mxu0 %v14446_v6  ;;  %v16784_v6 = vpack.c.bf16 %v14315_v21, %v14313_v28 }
 0x728   :  { %11447 = vmatpush1.bf16.msra.mxu0 %v14456_v5  ;;  %v16775_v5 = vpack.c.bf16 %v14241_v61, %v14236_v39 }
 0x729   :  { %11449 = vmatprep.subr.bf16.mxu0 %v14463_v41  ;;  %v16785_v41 = vld [vmem:[#allocation27_spill] sm:$0xff] }
 0x72c   :  { %11451 = vmatpush1.bf16.msra.mxu0 %v14475_v14  ;;  %v16777_v14 = vpack.c.bf16 %v14266_v12, %v14261_v18 }
 0x72d   :  { %11453 = vmatprep.subr.bf16.mxu0 %v14483_v32  ;;  %v16776_v32 = vpack.c.bf16 %v14256_v53, %v14251_v40 }
 0x730   :  { %11455 = vmatpush1.bf16.msra.mxu0 %v14491_v54  ;;  %v16786_v54 = vpack.c.bf16 %v14319_v35, %v16785_v41 }
 0x731   :  { %11457 = vmatprep.subr.bf16.mxu0 %v14496_v25  ;;  %v16787_v25 = vld [vmem:[#allocation29_spill] sm:$0xff] }
 0x734   :  { %11459 = vmatpush1.bf16.msra.mxu0 %v14498_v33  ;;  %v16788_v33 = vld [vmem:[#allocation28_spill] sm:$0xff] }
 0x735   :  { %11461 = vmatprep.subr.bf16.mxu0 %v16774_v2  ;;  %v16789_v22 = vpack.c.bf16 %v16787_v25, %v16788_v33  ;;  %v16807_v2 = vld [vmem:[#allocation21_spill] sm:$0xff] }
 0x737   :  { %3434 = vmatmul.mubr.f32.vlgmr.msra.gmra.mrb[4].mxu0 %v14534_v4 }
 0x738   :  { %11463 = vmatpush1.bf16.msra.mxu0 %v16775_v5  ;;  %3439 = vmatprep.mubr.f32.mxu0 %v16773_v1  ;;  %v16808_v5 = vld [vmem:[#allocation22_spill] sm:$0xff] }
 0x739   :  { %11465 = vmatprep.subr.bf16.mxu0 %v16776_v32  ;;  %v16809_v32 = vld [vmem:[#allocation23_spill] sm:$0xff] }
 0x73b   :  { %3441 = vmatmul.mubr.f32.gmra.mrb[6].mxu0 %v14536_v38 }
 0x73c   :  { %11467 = vmatpush1.bf16.msra.mxu0 %v16777_v14  ;;  %3575 = vmatprep.mubr.f32.mxu0 %v16773_v1  ;;  %v16810_v14 = vld [vmem:[#allocation24_spill] sm:$0xff] }
 0x73d   :  { %11469 = vmatprep.subr.bf16.mxu0 %v16778_v42  ;;  %v16811_v42 = vld [vmem:[#allocation25_spill] sm:$0xff] }
 0x740   :  { %11471 = vmatpush1.bf16.msra.mxu0 %v16779_v50  ;;  %v16812_v50 = vld [vmem:[#allocation26_spill] sm:$0xff] }
 0x741   :  { %11473 = vmatprep.subr.bf16.mxu0 %v16780_v30  ;;  %v16813_v30 = vld [vmem:[#allocation32_spill] sm:$0xff] }
 0x744   :  { %11475 = vmatpush1.bf16.msra.mxu0 %v16781_v31  ;;  %v16814_v31 = vand.u32 4294901760, %v14224_v47  ;;  %v16822_v47 = vand.u32 4294901760, %v14266_v12  ;;  %v16829_v12 = vand.u32 4294901760, %v14297_v7  ;;  %v16836_v7 = vand.u32 4294901760, %v14313_v28 }
 0x745   :  { %11477 = vmatprep.subr.bf16.mxu0 %v16782_v46  ;;  %v16815_v46 = vand.u32 4294901760, %v14229_v24  ;;  %v16821_v24 = vand.u32 4294901760, %v14261_v18  ;;  %v16828_v18 = vand.u32 4294901760, %v14292_v17  ;;  %v16835_v17 = vand.u32 4294901760, %v14311_v48 }
 0x746   :  { %v16842_v48 = vand.u32 4294901760, %v16791_v11  ;;  %v16843_v28 = vand.u32 4294901760, %v16790_v8  ;;  %v4004_v8 = vld [vmem:[#allocation5 + $0x88] sm:$0xff] }
 0x748   :  { %11479 = vmatpush1.bf16.msra.mxu0 %v16783_v26  ;;  %v11524_v26 = vpack.c.bf16 %v16815_v46, %v16814_v31  ;;  %v16824_v31 = vand.u32 4294901760, %v14277_v37  ;;  %v16830_v37 = vand.u32 4294901760, %v14300_v56  ;;  %v16837_v56 = vand.u32 4294901760, %v14315_v21 }
 0x749   :  { %11481 = vmatprep.subr.bf16.mxu0 %v16784_v6  ;;  %v16816_v6 = vld [vmem:[#allocation36_spill] sm:$0xff]  ;;  %v16844_v21 = vand.u32 4294901760, %v16794_v16 }
 0x74c   :  { %11483 = vmatpush1.bf16.msra.mxu0 %v16786_v54  ;;  %v16817_v54 = vand.u32 4294901760, %v14236_v39  ;;  %v11530_v39 = vpack.c.bf16 %v16822_v47, %v16821_v24  ;;  %v11550_v24 = vpack.c.bf16 %v16843_v28, %v16842_v48 }
 0x74d   :  { %11485 = vmatprep.subr.bf16.mxu0 %v16789_v22  ;;  %v16818_v22 = vand.u32 4294901760, %v14241_v61  ;;  %v16823_v61 = vand.u32 4294901760, %v14272_v49  ;;  %v11536_v49 = vpack.c.bf16 %v16829_v12, %v16828_v18 }
 0x750   :  { %11487 = vmatpush1.bf16.msra.mxu0 %v16792_v19  ;;  %v11526_v19 = vpack.c.bf16 %v16818_v22, %v16817_v54  ;;  %v16834_v54 = vand.u32 4294901760, %v14309_v52  ;;  %v16841_v52 = vand.u32 4294901760, %v16787_v25  ;;  %v4003_v25 = vld [vmem:[#allocation5 + $0x30] sm:$0xff] }
 0x751   :  { %11489 = vmatprep.subr.bf16.mxu0 %v16795_v51  ;;  %v16819_v51 = vand.u32 4294901760, %v14251_v40  ;;  %v11532_v40 = vpack.c.bf16 %v16824_v31, %v16823_v61  ;;  %v4025_v11 = vand.u32 4294901760, %v4003_v25  ;;  %v14760_v61 = vld [vmem:[#allocation5 + $0x3f8] sm:$0xff] }
 0x752   :  { %v11542_v22 = vpack.c.bf16 %v16835_v17, %v16834_v54 }
 0x754   :  { %11491 = vmatpush1.bf16.msra.mxu0 %v16798_v45  ;;  %v16820_v45 = vand.u32 4294901760, %v14256_v53  ;;  %v16825_v53 = vand.u32 4294901760, %v14542_v29 }
 0x755   :  { %11493 = vmatprep.subr.bf16.mxu0 %v16799_v59 }
 0x756   :  { %v11528_v57 = vpack.c.bf16 %v16820_v45, %v16819_v51 }
 0x757   :  { %3578 = vmatmul.mubr.f32.vlgmr.msra.gmra.mrb[4].mxu0 %v14539_v60  ;;  %v16826_v60 = vand.u32 4294901760, %v14282_v36  ;;  %v16832_v36 = vand.u32 4294901760, %v14305_v9  ;;  %v16839_v9 = vand.u32 4294901760, %v14319_v35  ;;  %v16846_v35 = vand.u32 4294901760, %v16797_v34  ;;  %v4006_v34 = vld [vmem:[#allocation5 + $0x138] sm:$0xff] }
 0x758   :  { %11495 = vmatpush1.bf16.msra.mxu0 %v16800_v0  ;;  %3583 = vmatprep.mubr.f32.mxu0 %v16773_v1 }
 0x759   :  { %11497 = vmatprep.subr.bf16.mxu0 %v16801_v3 }
 0x75b   :  { %3586 = vmatmul.mubr.f32.gmra.mrb[6].mxu0 %v14542_v29  ;;  %v16831_v29 = vand.u32 4294901760, %v14303_v23  ;;  %v16838_v23 = vand.u32 4294901760, %v16785_v41  ;;  %v16845_v41 = vand.u32 4294901760, %v16793_v27  ;;  %v4028_v27 = vand.u32 4294901760, %v4004_v8 }
 0x75c   :  { %11499 = vmatpush1.bf16.msra.mxu0 %v16802_v20  ;;  %3688 = vmatprep.mubr.f32.mxu0 %v16773_v1 }
 0x75d   :  { %11501 = vmatprep.subr.bf16.mxu0 %v16803_v63  ;;  %v11546_v51 = vpack.c.bf16 %v16839_v9, %v16838_v23  ;;  %v11552_v47 = vpack.c.bf16 %v16845_v41, %v16844_v21  ;;  %v14734_v16 = vpack.c.bf16 %v4028_v27, %v4025_v11 }
 0x75f   :  { %11589 = vmatprep.subr.bf16.mxu1 %v14734_v16 }
 0x760   :  { %11503 = vmatpush1.bf16.msra.mxu0 %v16804_v44  ;;  %11591 = vmatpush3.bf16.msra.mxu1 %v14734_v16 }
 0x761   :  { %11505 = vmatprep.subr.bf16.mxu0 %v16805_v62 }
 0x764   :  { %11507 = vmatpush1.bf16.msra.mxu0 %v16806_v58 }
 0x765   :  { %11509 = vmatprep.subr.bf16.mxu0 %v16807_v2 }
 0x768   :  { %11511 = vmatpush1.bf16.msra.mxu0 %v16808_v5 }
 0x769   :  { %11513 = vmatprep.subr.bf16.mxu0 %v16809_v32 }
 0x76c   :  { %11515 = vmatpush1.bf16.msra.mxu0 %v16810_v14 }
 0x76d   :  { %11517 = vmatprep.subr.bf16.mxu0 %v16811_v42 }
 0x770   :  { %11519 = vmatpush1.bf16.msra.mxu0 %v16812_v50 }
 0x771   :  { %11521 = vmatprep.subr.bf16.mxu0 %v16813_v30 }
 0x774   :  { %11523 = vmatpush1.bf16.msra.mxu0 %v16816_v6 }
 0x775   :  { %11525 = vmatprep.subr.bf16.mxu0 %v11524_v26 }
 0x777   :  { %3692 = vmatmul.mubr.f32.vlgmr.msra.gmra.mrb[4].mxu0 %v3188_v10  ;;  %v16827_v10 = vand.u32 4294901760, %v14287_v43  ;;  %v16833_v43 = vand.u32 4294901760, %v14307_v55  ;;  %v16840_v55 = vand.u32 4294901760, %v16788_v33  ;;  %v16847_v33 = vand.u32 4294901760, %v16796_v13  ;;  %v4005_v13 = vld [vmem:[#allocation5 + $0xe0] sm:$0xff] }
 0x778   :  { %11527 = vmatpush1.bf16.msra.mxu0 %v11526_v19  ;;  %3697 = vmatprep.mubr.f32.mxu0 %v16773_v1  ;;  %v11544_v19 = vpack.c.bf16 %v16837_v56, %v16836_v7 }
 0x779   :  { %11529 = vmatprep.subr.bf16.mxu0 %v11528_v57  ;;  %v11534_v46 = vpack.c.bf16 %v16827_v10, %v16826_v60  ;;  %v11538_v57 = vpack.c.bf16 %v16831_v29, %v16830_v37  ;;  %v11540_v26 = vpack.c.bf16 %v16833_v43, %v16832_v36  ;;  %v11548_v45 = vpack.c.bf16 %v16841_v52, %v16840_v55  ;;  %v14768_v60 = vld [vmem:[#allocation5 + $0x450] sm:$0xff]  ;;  %v14770_v10 = vld [vmem:[#allocation5 + $0x4a8] sm:$0xff] }
 0x77a   :  { %v4061_v18 = vand.u32 4294901760, %v14768_v60  ;;  %v4064_v12 = vand.u32 4294901760, %v14770_v10  ;;  %v14788_v36 = vsub.f32 %v4003_v25, %v4025_v11  ;;  %v14790_v43 = vsub.f32 %v4004_v8, %v4028_v27 }
 0x77b   :  { %3701 = vmatmul.mubr.f32.gmra.mrb[6].mxu0 %v16825_v53 }
 0x77c   :  { %11531 = vmatpush1.bf16.msra.mxu0 %v11530_v39  ;;  %3867 = vmatprep.mubr.f32.mxu0 %v16773_v1  ;;  %v11554_v39 = vpack.c.bf16 %v16847_v33, %v16846_v35  ;;  %v4128_v54 = vand.u32 4294901760, %v14788_v36  ;;  %v4135_v17 = vand.u32 4294901760, %v14790_v43 }
 0x77d   :  { %11533 = vmatprep.subr.bf16.mxu0 %v11532_v40  ;;  %v4058_v40 = vand.u32 4294901760, %v14760_v61 }
 0x77e   :  { %v4136_v7 = vsub.f32 %v14790_v43, %v4135_v17 }
 0x780   :  { %11535 = vmatpush1.bf16.msra.mxu0 %v11534_v46  ;;  %v14772_v46 = vld [vmem:[#allocation5 + $0x500] sm:$0xff]  ;;  %v4137_v9 = vand.u32 4294901760, %v4136_v7 }
 0x781   :  { %11537 = vmatprep.subr.bf16.mxu0 %v11536_v49  ;;  %v14777_v49 = vld [vmem:[#allocation5 + $0x558] sm:$0xff]  ;;  %v4067_v37 = vand.u32 4294901760, %v14772_v46 }
 0x782   :  { %v4070_v29 = vand.u32 4294901760, %v14777_v49 }
 0x784   :  { %11539 = vmatpush1.bf16.msra.mxu0 %v11538_v57  ;;  %v14786_v57 = vpack.c.bf16 %v4064_v12, %v4061_v18 }
 0x785   :  { %11541 = vmatprep.subr.bf16.mxu0 %v11540_v26  ;;  %v14796_v26 = vpack.c.bf16 %v4070_v29, %v4067_v37 }
 0x788   :  { %11543 = vmatpush1.bf16.msra.mxu0 %v11542_v22  ;;  %v4129_v22 = vsub.f32 %v14788_v36, %v4128_v54 }
 0x789   :  { %11545 = vmatprep.subr.bf16.mxu0 %v11544_v19 }
 0x78a   :  { %v4130_v23 = vand.u32 4294901760, %v4129_v22 }
 0x78c   :  { %11547 = vmatpush1.bf16.msra.mxu0 %v11546_v51  ;;  %v14816_v52 = vpack.c.bf16 %v4137_v9, %v4130_v23 }
 0x78d   :  { %11549 = vmatprep.subr.bf16.mxu0 %v11548_v45 }
 0x790   :  { %11551 = vmatpush1.bf16.msra.mxu0 %v11550_v24 }
 0x791   :  { %11553 = vmatprep.subr.bf16.mxu0 %v11552_v47 }
 0x794   :  { %11555 = vmatpush1.bf16.msra.mxu0 %v11554_v39 }
 0x795   :  { %11557 = vmatprep.subr.bf16.mxu0 %v16799_v59  ;;  %v4031_v59 = vand.u32 4294901760, %v4005_v13 }
 0x797   :  { %3869 = vmatmul.mubr.f32.vlgmr.msra.gmra.mrb[4].mxu0 %v14534_v4  ;;  %v14809_v56 = vsub.f32 %v4005_v13, %v4031_v59 }
 0x798   :  { %11559 = vmatpush1.bf16.msra.mxu0 %v16800_v0  ;;  %3874 = vmatprep.mubr.f32.mxu0 %v16773_v1  ;;  %v4034_v0 = vand.u32 4294901760, %v4006_v34 }
 0x799   :  { %11561 = vmatprep.subr.bf16.mxu0 %v16801_v3  ;;  %v4142_v51 = vand.u32 4294901760, %v14809_v56 }
 0x79a   :  { %v14738_v3 = vpack.c.bf16 %v4034_v0, %v4031_v59  ;;  %v14811_v19 = vsub.f32 %v4006_v34, %v4034_v0 }
 0x79b   :  { %3876 = vmatmul.mubr.f32.gmra.mrb[6].mxu0 %v14536_v38  ;;  %v4143_v45 = vsub.f32 %v14809_v56, %v4142_v51 }
 0x79c   :  { %11563 = vmatpush1.bf16.msra.mxu0 %v16802_v20  ;;  %3978 = vmatprep.mubr.f32.mxu0 %v16773_v1  ;;  %v16604_v55 = vand.u32 4294901760, %v14811_v19 }
 0x79d   :  { %11565 = vmatprep.subr.bf16.mxu0 %v16803_v63  ;;  %11593 = vmatprep.subr.bf16.mxu1 %v14738_v3  ;;  %v4144_v21 = vand.u32 4294901760, %v4143_v45 }
 0x79e   :  { %11595 = vmatpush3.bf16.msra.mxu1 %v14738_v3  ;;  %v4150_v48 = vsub.f32 %v14811_v19, %v16604_v55 }
 0x7a0   :  { %11567 = vmatpush1.bf16.msra.mxu0 %v16804_v44  ;;  %v4009_v44 = vld [vmem:[#allocation5 + $0x240] sm:$0xff]  ;;  %v4151_v41 = vand.u32 4294901760, %v4150_v48 }
 0x7a1   :  { %11569 = vmatprep.subr.bf16.mxu0 %v16805_v62  ;;  %v4010_v62 = vld [vmem:[#allocation5 + $0x298] sm:$0xff] }
 0x7a2   :  { %v14831_v33 = vpack.c.bf16 %v4151_v41, %v4144_v21 }
 0x7a4   :  { %11571 = vmatpush1.bf16.msra.mxu0 %v16806_v58  ;;  %v4043_v58 = vand.u32 4294901760, %v4009_v44 }
 0x7a5   :  { %11573 = vmatprep.subr.bf16.mxu0 %v16807_v2  ;;  %v4046_v2 = vand.u32 4294901760, %v4010_v62 }
 0x7a6   :  { %v14839_v8 = vsub.f32 %v4009_v44, %v4043_v58 }
 0x7a7   :  { %v14841_v11 = vsub.f32 %v4010_v62, %v4046_v2 }
 0x7a8   :  { %11575 = vmatpush1.bf16.msra.mxu0 %v16808_v5  ;;  %v14746_v5 = vpack.c.bf16 %v4046_v2, %v4043_v58  ;;  %v16601_v34 = vand.u32 4294901760, %v14839_v8 }
 0x7a9   :  { %11577 = vmatprep.subr.bf16.mxu0 %v16809_v32  ;;  %v14748_v32 = vld [vmem:[#allocation5 + $0x2f0] sm:$0xff]  ;;  %v16600_v59 = vand.u32 4294901760, %v14841_v11 }
 0x7ac   :  { %11579 = vmatpush1.bf16.msra.mxu0 %v16810_v14  ;;  %v14750_v14 = vld [vmem:[#allocation5 + $0x348] sm:$0xff] }
 0x7ad   :  { %11581 = vmatprep.subr.bf16.mxu0 %v16811_v42  ;;  %v4049_v42 = vand.u32 4294901760, %v14748_v32 }
 0x7b0   :  { %11583 = vmatpush1.bf16.msra.mxu0 %v16812_v50  ;;  %v4052_v50 = vand.u32 4294901760, %v14750_v14 }
 0x7b1   :  { %11585 = vmatprep.subr.bf16.mxu0 %v16813_v30 }
 0x7b2   :  { %v14756_v30 = vpack.c.bf16 %v4052_v50, %v4049_v42 }
 0x7b4   :  { %11587 = vmatpush1.bf16.msra.mxu0 %v16816_v6  ;;  %v14758_v6 = vld [vmem:[#allocation5 + $0x3a0] sm:$0xff] }
 0x7b5   :  { %v4055_v31 = vand.u32 4294901760, %v14758_v6 }
 0x7b7   :  { %3980 = vmatmul.mubr.f32.vlgmr.msra.gmra.mrb[4].mxu0 %v14534_v4  ;;  %v4007_v4 = vld [vmem:[#allocation5 + $0x190] sm:$0xff]  ;;  %v14766_v53 = vpack.c.bf16 %v4058_v40, %v4055_v31 }
 0x7b8   :  { %3985 = vmatprep.mubr.f32.mxu0 %v16773_v1  ;;  %v4008_v1 = vld [vmem:[#allocation5 + $0x1e8] sm:$0xff] }
 0x7b9   :  { %v4040_v20 = vand.u32 4294901760, %v4008_v1 }
 0x7bb   :  { %3987 = vmatmul.mubr.f32.gmra.mrb[6].mxu0 %v14536_v38  ;;  %v4037_v38 = vand.u32 4294901760, %v4007_v4  ;;  %v14826_v24 = vsub.f32 %v4008_v1, %v4040_v20  ;;  %v14851_v1 = vsub.f32 %v14748_v32, %v4049_v42  ;;  %v14871_v42 = vsub.f32 %v14760_v61, %v4058_v40 }
 0x7bc   :  { %v14888_v61 = vsub.f32 %v14768_v60, %v4061_v18  ;;  %v14905_v60 = vsub.f32 %v14772_v46, %v4067_v37 }
 0x7bd   :  { %v14742_v63 = vpack.c.bf16 %v4040_v20, %v4037_v38  ;;  %v14824_v28 = vsub.f32 %v4007_v4, %v4037_v38  ;;  %v16602_v35 = vand.u32 4294901760, %v14826_v24  ;;  %v4171_v4 = vsub.f32 %v14839_v8, %v16601_v34  ;;  %v57_v34 = vld [vmem:[#allocation2 + $0x10] sm:$0xff] }
 0x7be   :  { %v14854_v38 = vsub.f32 %v14750_v14, %v4052_v50  ;;  %v4178_v20 = vsub.f32 %v14841_v11, %v16600_v59  ;;  %v16599_v62 = vand.u32 4294901760, %v14851_v1  ;;  %v14868_v14 = vsub.f32 %v14758_v6, %v4055_v31 }
 0x7bf   :  { %11597 = vmatprep.subr.bf16.mxu1 %v14742_v63  ;;  %v16603_v47 = vand.u32 4294901760, %v14824_v28  ;;  %v4164_v25 = vsub.f32 %v14826_v24, %v16602_v35  ;;  %v4172_v44 = vand.u32 4294901760, %v4171_v4  ;;  %v16596_v45 = vand.u32 4294901760, %v14871_v42 }
 0x7c0   :  { %11599 = vmatpush3.bf16.msra.mxu1 %v14742_v63  ;;  %v16598_v58 = vand.u32 4294901760, %v14854_v38  ;;  %v4179_v2 = vand.u32 4294901760, %v4178_v20  ;;  %v4185_v22 = vsub.f32 %v14851_v1, %v16599_v62  ;;  %v16597_v9 = vand.u32 4294901760, %v14868_v14 }
 0x7c1   :  { %11601 = vmatprep.subr.bf16.mxu1 %v14746_v5  ;;  %v4157_v39 = vsub.f32 %v14824_v28, %v16603_v47  ;;  %v4165_v13 = vand.u32 4294901760, %v4164_v25  ;;  %v4206_v6 = vsub.f32 %v14871_v42, %v16596_v45  ;;  %v14893_v31 = vsub.f32 %v14770_v10, %v4064_v12 }
 0x7c2   :  { %v4192_v32 = vsub.f32 %v14854_v38, %v16598_v58  ;;  %v14873_v50 = vpack.c.bf16 %v4179_v2, %v4172_v44  ;;  %v4186_v7 = vand.u32 4294901760, %v4185_v22  ;;  %v4199_v21 = vsub.f32 %v14868_v14, %v16597_v9 }
 0x7c3   :  { %v4158_v27 = vand.u32 4294901760, %v4157_v39  ;;  %v4207_v41 = vand.u32 4294901760, %v4206_v6  ;;  %v16595_v39 = vand.u32 4294901760, %v14888_v61  ;;  %v16594_v25 = vand.u32 4294901760, %v14893_v31 }
 0x7c4   :  { %11603 = vmatpush3.bf16.msra.mxu1 %v14746_v5  ;;  %v4193_v23 = vand.u32 4294901760, %v4192_v32  ;;  %v4200_v40 = vand.u32 4294901760, %v4199_v21  ;;  %v14910_v10 = vsub.f32 %v14777_v49, %v4070_v29  ;;  %v16593_v4 = vand.u32 4294901760, %v14905_v60 }
 0x7c5   :  { %11605 = vmatprep.subr.bf16.mxu1 %v14756_v30  ;;  %v14845_v0 = vpack.c.bf16 %v4165_v13, %v4158_v27  ;;  %v4213_v13 = vsub.f32 %v14888_v61, %v16595_v39  ;;  %v4220_v18 = vsub.f32 %v14893_v31, %v16594_v25  ;;  %v14929_v32 = vpack.c.bf16 %v14790_v43, %v14788_v36 }
 0x7c6   :  { %v14877_v48 = vpack.c.bf16 %v4193_v23, %v4186_v7  ;;  %v14897_v27 = vpack.c.bf16 %v4207_v41, %v4200_v40  ;;  %v16592_v20 = vand.u32 4294901760, %v14910_v10  ;;  %v4227_v46 = vsub.f32 %v14905_v60, %v16593_v4 }
 0x7c7   :  { %v4214_v12 = vand.u32 4294901760, %v4213_v13  ;;  %v4221_v44 = vand.u32 4294901760, %v4220_v18  ;;  %v14933_v7 = vpack.c.bf16 %v14811_v19, %v14809_v56  ;;  %v14937_v23 = vpack.c.bf16 %v14826_v24, %v14824_v28  ;;  %v3077_v18 = vld [vmem:[#allocation7 + $0x10] ss:$4 sm:$0x3] }
 0x7c8   :  { %11607 = vmatpush3.bf16.msra.mxu1 %v14756_v30  ;;  %v4234_v37 = vsub.f32 %v14910_v10, %v16592_v20  ;;  %v4228_v29 = vand.u32 4294901760, %v4227_v46  ;;  %v14941_v21 = vpack.c.bf16 %v14841_v11, %v14839_v8  ;;  %v14945_v6 = vpack.c.bf16 %v14854_v38, %v14851_v1 }
 0x7c9   :  { %11609 = vmatprep.subr.bf16.mxu1 %v14766_v53  ;;  %v14923_v49 = vpack.c.bf16 %v4221_v44, %v4214_v12  ;;  %v14949_v40 = vpack.c.bf16 %v14871_v42, %v14868_v14  ;;  %v14953_v41 = vpack.c.bf16 %v14893_v31, %v14888_v61  ;;  %v14957_v13 = vpack.c.bf16 %v14910_v10, %v14905_v60  ;;  %v16848_v12 = vld [vmem:[#allocation13_spill] sm:$0xff] }
 0x7ca   :  { %v4235_v2 = vand.u32 4294901760, %v4234_v37  ;;  %v3085_v44 = vsub.s32 1, %v16848_v12  ;;  %v3082_v46 = vrot.slane %v3077_v18, %v13315_v15  ;;  %v16851_v36 = vand.u32 4294901760, %v14826_v24 }
 0x7cb   :  { %v16852_v43 = vand.u32 4294901760, %v14839_v8  ;;  %v16854_v56 = vand.u32 4294901760, %v14851_v1  ;;  %v16857_v24 = vand.u32 4294901760, %v14871_v42  ;;  %v16858_v8 = vand.u32 4294901760, %v14888_v61  ;;  %v4753_v61 = vld [vmem:[#allocation5 + $0x198] sm:$0xff] }
 0x7cc   :  { %11611 = vmatpush3.bf16.msra.mxu1 %v14766_v53  ;;  %v14925_v22 = vpack.c.bf16 %v4235_v2, %v4228_v29  ;;  %v3086_v37 = vrot.slane %v3077_v18, %v3085_v44  ;;  %v16860_v1 = vand.u32 4294901760, %v14905_v60 }
 0x7cd   :  { %11613 = vmatprep.subr.bf16.mxu1 %v14786_v57 }
 0x7d0   :  { %11615 = vmatpush3.bf16.msra.mxu1 %v14786_v57 }
 0x7d1   :  { %11617 = vmatprep.subr.bf16.mxu1 %v14796_v26 }
 0x7d4   :  { %11619 = vmatpush3.bf16.msra.mxu1 %v14796_v26 }
 0x7d5   :  { %11621 = vmatprep.subr.bf16.mxu1 %v14816_v52 }
 0x88a   :  { %v3981_v29 = vpop.f32.mrb[4].mxu0 }
 0x88b   :  { %v12556_v2 = vadd.f32 %v3981_v29, %v3082_v46  ;;  %v3983_v20 = vpop.f32.mrb[5].mxu0  ;;  %v58_v29 = vld [vmem:[#allocation2 + $0x18] sm:$0xff] }
 0x88c   :  { %v12557_v4 = vadd.f32 %v3983_v20, %v3086_v37 }
 0x88d   :  { %7734 = vst [vmem:[#allocation8 + $0x10] sm:$0xff] %v12556_v2 }
 0x88e   :  { %v3993_v25 = vmul.f32 0.5, %v12557_v4  ;;  %7737 = vst [vmem:[#allocation8 + $0x20] sm:$0xff] %v12557_v4  ;;  %v3988_v39 = vpop.f32.mrb[6].mxu0 }
 0x88f   :  { %v12558_v45 = vadd.f32 %v3988_v39, %v3082_v46  ;;  %v3990_v9 = vpop.f32.mrb[7].mxu0 }
 0x890   :  { %v3995_v58 = vmul.f32 1.442695, %v3993_v25  ;;  %v12559_v62 = vadd.f32 %v3990_v9, %v3086_v37 }
 0x891   :  { %7735 = vst [vmem:[#allocation8 + $0x18] sm:$0xff] %v12558_v45 }
 0x892   :  { %12697 = vpow2.f32 %v3995_v58  ;;  %v3994_v59 = vmul.f32 0.5, %v12559_v62  ;;  %7738 = vst [vmem:[#allocation8 + $0x28] sm:$0xff] %v12559_v62 }
 0x894   :  { %v3997_v12 = vmul.f32 1.442695, %v3994_v59 }
 0x896   :  { %12699 = vpow2.f32 %v3997_v12 }
 0x89c   :  { %v12698_v18 = vpop.eup %12697 }
 0x89d   :  { %v3999_v44 = vmul.f32 %v12698_v18, %v57_v34 }
 0x89f   :  { %v4001_v35 = vadd.f32 %v12556_v2, %v3999_v44  ;;  %v15094_v2 = vld [vmem:[#allocation5 + $0x400] sm:$0xff] }
 0x8a0   :  { %v12700_v20 = vpop.eup %12699  ;;  %v4804_v18 = vand.u32 4294901760, %v15094_v2 }
 0x8a1   :  { %v4000_v47 = vmul.f32 %v12700_v20, %v58_v29  ;;  %v14961_v55 = vand.u32 4294901760, %v4001_v35  ;;  %v15102_v29 = vld [vmem:[#allocation5 + $0x458] sm:$0xff]  ;;  %v15104_v20 = vld [vmem:[#allocation5 + $0x4b0] sm:$0xff] }
 0x8a3   :  { %v4106_v39 = vsub.f32 %v4001_v35, %v14961_v55  ;;  %v4002_v4 = vadd.f32 %v12558_v45, %v4000_v47  ;;  %v16849_v47 = vand.u32 4294901760, %v14811_v19  ;;  %v16855_v19 = vand.u32 4294901760, %v14854_v38 }
 0x8a4   :  { %v16861_v38 = vand.u32 4294901760, %v14910_v10  ;;  %v4755_v10 = vld [vmem:[#allocation5 + $0x248] sm:$0xff] }
 0x8a5   :  { %v4107_v25 = vand.u32 4294901760, %v4106_v39  ;;  %v14964_v9 = vand.u32 4294901760, %v4002_v4  ;;  %v11720_v35 = vpack.c.bf16 %v16849_v47, %v4142_v51  ;;  %v11732_v51 = vpack.c.bf16 %v16855_v19, %v16854_v56 }
 0x8a7   :  { %v4108_v58 = vsub.f32 %v4106_v39, %v4107_v25  ;;  %v4116_v62 = vsub.f32 %v4002_v4, %v14964_v9  ;;  %v4810_v4 = vand.u32 4294901760, %v15104_v20 }
 0x8a9   :  { %v4109_v59 = vand.u32 4294901760, %v4108_v58  ;;  %v4117_v46 = vand.u32 4294901760, %v4116_v62 }
 0x8ab   :  { %9610 = vmatprep.mubr.f32.mxu1 %v4109_v59  ;;  %v4118_v37 = vsub.f32 %v4116_v62, %v4117_v46  ;;  %v15122_v59 = vld [vmem:[#allocation5 + $0x560] sm:$0xff] }
 0x8ad   :  { %v4119_v34 = vand.u32 4294901760, %v4118_v37  ;;  %v4816_v37 = vand.u32 4294901760, %v15122_v59 }
 0x8af   :  { %9611 = vmatmul.mubr.f32.vlgmr.msra.gmra.mrb[4].mxu1 %v4119_v34 }
 0x8b0   :  { %11623 = vmatpush3.bf16.msra.mxu1 %v14816_v52  ;;  %9645 = vmatprep.mubr.f32.mxu1 %v14961_v55  ;;  %v11716_v52 = vpack.c.bf16 %v4135_v17, %v4128_v54  ;;  %v16853_v54 = vand.u32 4294901760, %v14841_v11  ;;  %v16859_v11 = vand.u32 4294901760, %v14893_v31  ;;  %v4783_v31 = vand.u32 4294901760, %v4753_v61 }
 0x8b1   :  { %11625 = vmatprep.subr.bf16.mxu1 %v14831_v33 }
 0x8b2   :  { %v11728_v17 = vpack.c.bf16 %v16853_v54, %v16852_v43  ;;  %v11740_v45 = vpack.c.bf16 %v16859_v11, %v16858_v8 }
 0x8b4   :  { %11627 = vmatpush3.bf16.msra.mxu1 %v14831_v33  ;;  %v16850_v33 = vand.u32 4294901760, %v14824_v28  ;;  %v16856_v28 = vand.u32 4294901760, %v14868_v14  ;;  %v4752_v14 = vld [vmem:[#allocation5 + $0x140] sm:$0xff] }
 0x8b5   :  { %11629 = vmatprep.subr.bf16.mxu1 %v14845_v0  ;;  %v4780_v42 = vand.u32 4294901760, %v4752_v14 }
 0x8b8   :  { %11631 = vmatpush3.bf16.msra.mxu1 %v14845_v0  ;;  %v11724_v0 = vpack.c.bf16 %v16851_v36, %v16850_v33 }
 0x8b9   :  { %11633 = vmatprep.subr.bf16.mxu1 %v14873_v50 }
 0x8bc   :  { %11635 = vmatpush3.bf16.msra.mxu1 %v14873_v50  ;;  %v11736_v50 = vpack.c.bf16 %v16857_v24, %v16856_v28  ;;  %v15158_v24 = vsub.f32 %v4753_v61, %v4783_v31 }
 0x8bd   :  { %11637 = vmatprep.subr.bf16.mxu1 %v14877_v48 }
 0x8c0   :  { %11639 = vmatpush3.bf16.msra.mxu1 %v14877_v48  ;;  %v11744_v48 = vpack.c.bf16 %v16861_v38, %v16860_v1 }
 0x8c1   :  { %11641 = vmatprep.subr.bf16.mxu1 %v14897_v27 }
 0x8c4   :  { %11643 = vmatpush3.bf16.msra.mxu1 %v14897_v27 }
 0x8c5   :  { %11645 = vmatprep.subr.bf16.mxu1 %v14923_v49 }
 0x8c8   :  { %11647 = vmatpush3.bf16.msra.mxu1 %v14923_v49  ;;  %v4756_v49 = vld [vmem:[#allocation5 + $0x2a0] sm:$0xff] }
 0x8c9   :  { %11649 = vmatprep.subr.bf16.mxu1 %v14925_v22 }
 0x8cc   :  { %11651 = vmatpush3.bf16.msra.mxu1 %v14925_v22  ;;  %v4789_v22 = vand.u32 4294901760, %v4755_v10 }
 0x8cd   :  { %11653 = vmatprep.subr.bf16.mxu1 %v14929_v32 }
 0x8cf   :  { %9646 = vmatmul.mubr.f32.vlgmr.msra.gmra.mrb[4].mxu1 %v14964_v9 }
 0x8d0   :  { %11655 = vmatpush3.bf16.msra.mxu1 %v14929_v32  ;;  %9680 = vmatprep.mubr.f32.mxu1 %v4106_v39  ;;  %v4792_v32 = vand.u32 4294901760, %v4756_v49  ;;  %v4807_v39 = vand.u32 4294901760, %v15102_v29 }
 0x8d1   :  { %11657 = vmatprep.subr.bf16.mxu1 %v14933_v7 }
 0x8d4   :  { %11659 = vmatpush3.bf16.msra.mxu1 %v14933_v7  ;;  %v15080_v7 = vpack.c.bf16 %v4792_v32, %v4789_v22 }
 0x8d5   :  { %11661 = vmatprep.subr.bf16.mxu1 %v14937_v23 }
 0x8d8   :  { %11663 = vmatpush3.bf16.msra.mxu1 %v14937_v23  ;;  %v15082_v23 = vld [vmem:[#allocation5 + $0x2f8] sm:$0xff] }
 0x8d9   :  { %11665 = vmatprep.subr.bf16.mxu1 %v14941_v21 }
 0x8dc   :  { %11667 = vmatpush3.bf16.msra.mxu1 %v14941_v21  ;;  %v15084_v21 = vld [vmem:[#allocation5 + $0x350] sm:$0xff] }
 0x8dd   :  { %11669 = vmatprep.subr.bf16.mxu1 %v14945_v6 }
 0x8e0   :  { %11671 = vmatpush3.bf16.msra.mxu1 %v14945_v6  ;;  %v4795_v6 = vand.u32 4294901760, %v15082_v23 }
 0x8e1   :  { %11673 = vmatprep.subr.bf16.mxu1 %v14949_v40 }
 0x8e4   :  { %11675 = vmatpush3.bf16.msra.mxu1 %v14949_v40  ;;  %v4798_v40 = vand.u32 4294901760, %v15084_v21 }
 0x8e5   :  { %11677 = vmatprep.subr.bf16.mxu1 %v14953_v41 }
 0x8e8   :  { %11679 = vmatpush3.bf16.msra.mxu1 %v14953_v41  ;;  %v15090_v41 = vpack.c.bf16 %v4798_v40, %v4795_v6 }
 0x8e9   :  { %11681 = vmatprep.subr.bf16.mxu1 %v14957_v13 }
 0x8ec   :  { %11683 = vmatpush3.bf16.msra.mxu1 %v14957_v13  ;;  %v15092_v13 = vld [vmem:[#allocation5 + $0x3a8] sm:$0xff] }
 0x8ed   :  { %11685 = vmatprep.subr.bf16.mxu1 %v14734_v16  ;;  %v4801_v12 = vand.u32 4294901760, %v15092_v13 }
 0x8ef   :  { %9681 = vmatmul.mubr.f32.vlgmr.msra.gmra.mrb[4].mxu1 %v4116_v62  ;;  %v15100_v44 = vpack.c.bf16 %v4804_v18, %v4801_v12  ;;  %v15120_v62 = vld [vmem:[#allocation5 + $0x508] sm:$0xff] }
 0x8f0   :  { %11687 = vmatpush3.bf16.msra.mxu1 %v14734_v16  ;;  %9715 = vmatprep.mubr.f32.mxu1 %v4107_v25  ;;  %v15114_v25 = vpack.c.bf16 %v4810_v4, %v4807_v39 }
 0x8f1   :  { %11689 = vmatprep.subr.bf16.mxu1 %v14738_v3 }
 0x8f4   :  { %11691 = vmatpush3.bf16.msra.mxu1 %v14738_v3 }
 0x8f5   :  { %11693 = vmatprep.subr.bf16.mxu1 %v14742_v63 }
 0x8f8   :  { %11695 = vmatpush3.bf16.msra.mxu1 %v14742_v63 }
 0x8f9   :  { %11697 = vmatprep.subr.bf16.mxu1 %v14746_v5 }
 0x8fc   :  { %11699 = vmatpush3.bf16.msra.mxu1 %v14746_v5 }
 0x8fd   :  { %11701 = vmatprep.subr.bf16.mxu1 %v14756_v30 }
 0x900   :  { %11703 = vmatpush3.bf16.msra.mxu1 %v14756_v30 }
 0x901   :  { %11705 = vmatprep.subr.bf16.mxu1 %v14766_v53 }
 0x904   :  { %11707 = vmatpush3.bf16.msra.mxu1 %v14766_v53 }
 0x905   :  { %11709 = vmatprep.subr.bf16.mxu1 %v14786_v57 }
 0x908   :  { %11711 = vmatpush3.bf16.msra.mxu1 %v14786_v57 }
 0x909   :  { %11713 = vmatprep.subr.bf16.mxu1 %v14796_v26 }
 0x90c   :  { %11715 = vmatpush3.bf16.msra.mxu1 %v14796_v26 }
 0x90d   :  { %11717 = vmatprep.subr.bf16.mxu1 %v11716_v52 }
 0x90f   :  { %9716 = vmatmul.mubr.f32.vlgmr.msra.gmra.mrb[4].mxu1 %v4117_v46  ;;  %v4813_v46 = vand.u32 4294901760, %v15120_v62 }
 0x910   :  { %11719 = vmatpush3.bf16.msra.mxu1 %v11716_v52  ;;  %9750 = vmatprep.mubr.f32.mxu1 %v14961_v55 }
 0x911   :  { %11721 = vmatprep.subr.bf16.mxu1 %v11720_v35  ;;  %v15134_v47 = vpack.c.bf16 %v4816_v37, %v4813_v46 }
 0x914   :  { %11723 = vmatpush3.bf16.msra.mxu1 %v11720_v35 }
 0x915   :  { %11725 = vmatprep.subr.bf16.mxu1 %v11724_v0 }
 0x918   :  { %11727 = vmatpush3.bf16.msra.mxu1 %v11724_v0  ;;  %v15144_v0 = vsub.f32 %v4752_v14, %v4780_v42 }
 0x919   :  { %11729 = vmatprep.subr.bf16.mxu1 %v11728_v17 }
 0x91a   :  { %v16617_v56 = vand.u32 4294901760, %v15144_v0 }
 0x91c   :  { %11731 = vmatpush3.bf16.msra.mxu1 %v11728_v17  ;;  %v4896_v28 = vsub.f32 %v15144_v0, %v16617_v56 }
 0x91d   :  { %11733 = vmatprep.subr.bf16.mxu1 %v11732_v51 }
 0x91e   :  { %v4897_v11 = vand.u32 4294901760, %v4896_v28 }
 0x920   :  { %11735 = vmatpush3.bf16.msra.mxu1 %v11732_v51 }
 0x921   :  { %11737 = vmatprep.subr.bf16.mxu1 %v11736_v50 }
 0x924   :  { %11739 = vmatpush3.bf16.msra.mxu1 %v11736_v50 }
 0x925   :  { %11741 = vmatprep.subr.bf16.mxu1 %v11740_v45 }
 0x928   :  { %11743 = vmatpush3.bf16.msra.mxu1 %v11740_v45  ;;  %v16616_v45 = vand.u32 4294901760, %v15158_v24 }
 0x929   :  { %11745 = vmatprep.subr.bf16.mxu1 %v11744_v48 }
 0x92c   :  { %11747 = vmatpush3.bf16.msra.mxu1 %v11744_v48  ;;  %v4903_v48 = vsub.f32 %v15158_v24, %v16616_v45 }
 0x92d   :  { %11749 = vmatprep.subr.bf16.mxu1 %v14734_v16 }
 0x92f   :  { %9751 = vmatmul.mubr.f32.vlgmr.msra.gmra.mrb[4].mxu1 %v14964_v9 }
 0x930   :  { %11751 = vmatpush3.bf16.msra.mxu1 %v14734_v16  ;;  %9785 = vmatprep.mubr.f32.mxu1 %v14961_v55  ;;  %v4749_v16 = vld [vmem:[#allocation5 + $0x38] sm:$0xff] }
 0x931   :  { %11753 = vmatprep.subr.bf16.mxu1 %v14738_v3 }
 0x934   :  { %11755 = vmatpush3.bf16.msra.mxu1 %v14738_v3  ;;  %v4750_v3 = vld [vmem:[#allocation5 + $0x90] sm:$0xff] }
 0x935   :  { %11757 = vmatprep.subr.bf16.mxu1 %v14742_v63 }
 0x938   :  { %11759 = vmatpush3.bf16.msra.mxu1 %v14742_v63  ;;  %v4771_v63 = vand.u32 4294901760, %v4749_v16 }
 0x939   :  { %11761 = vmatprep.subr.bf16.mxu1 %v14746_v5 }
 0x93c   :  { %11763 = vmatpush3.bf16.msra.mxu1 %v14746_v5  ;;  %v4774_v5 = vand.u32 4294901760, %v4750_v3 }
 0x93d   :  { %11765 = vmatprep.subr.bf16.mxu1 %v14756_v30 }
 0x93e   :  { %v15068_v55 = vpack.c.bf16 %v4774_v5, %v4771_v63  ;;  %v15118_v58 = vsub.f32 %v4750_v3, %v4774_v5  ;;  %v15173_v3 = vsub.f32 %v4755_v10, %v4789_v22  ;;  %v4904_v5 = vand.u32 4294901760, %v4903_v48 }
 0x940   :  { %11767 = vmatpush3.bf16.msra.mxu1 %v14756_v30  ;;  %v4751_v30 = vld [vmem:[#allocation5 + $0xe8] sm:$0xff]  ;;  %11781 = vmatprep.subr.bf16.mxu0 %v15068_v55  ;;  %v16619_v52 = vand.u32 4294901760, %v15118_v58  ;;  %v16614_v14 = vand.u32 4294901760, %v15173_v3 }
 0x941   :  { %11769 = vmatprep.subr.bf16.mxu1 %v14766_v53  ;;  %11783 = vmatpush3.bf16.msra.mxu0 %v15068_v55 }
 0x942   :  { %v4882_v33 = vsub.f32 %v15118_v58, %v16619_v52  ;;  %v4917_v61 = vsub.f32 %v15173_v3, %v16614_v14 }
 0x944   :  { %11771 = vmatpush3.bf16.msra.mxu1 %v14766_v53  ;;  %v4777_v53 = vand.u32 4294901760, %v4751_v30  ;;  %v4883_v54 = vand.u32 4294901760, %v4882_v33  ;;  %v4918_v10 = vand.u32 4294901760, %v4917_v61 }
 0x945   :  { %11773 = vmatprep.subr.bf16.mxu1 %v14786_v57 }
 0x946   :  { %v15142_v36 = vsub.f32 %v4751_v30, %v4777_v53 }
 0x948   :  { %11775 = vmatpush3.bf16.msra.mxu1 %v14786_v57  ;;  %v15072_v57 = vpack.c.bf16 %v4780_v42, %v4777_v53  ;;  %v16618_v17 = vand.u32 4294901760, %v15142_v36 }
 0x949   :  { %11777 = vmatprep.subr.bf16.mxu1 %v14796_v26 }
 0x94a   :  { %11785 = vmatprep.subr.bf16.mxu0 %v15072_v57  ;;  %v4889_v51 = vsub.f32 %v15142_v36, %v16618_v17 }
 0x94b   :  { %11787 = vmatpush3.bf16.msra.mxu0 %v15072_v57 }
 0x94c   :  { %11779 = vmatpush3.bf16.msra.mxu1 %v14796_v26  ;;  %v4754_v26 = vld [vmem:[#allocation5 + $0x1f0] sm:$0xff]  ;;  %v4890_v8 = vand.u32 4294901760, %v4889_v51 }
 0x94d   :  { %v4786_v27 = vand.u32 4294901760, %v4754_v26 }
 0x94e   :  { %v15165_v38 = vpack.c.bf16 %v4897_v11, %v4890_v8 }
 0x94f   :  { %9786 = vmatmul.mubr.f32.vlgmr.msra.gmra.mrb[4].mxu1 %v14964_v9  ;;  %v15076_v60 = vpack.c.bf16 %v4786_v27, %v4783_v31  ;;  %v15116_v9 = vsub.f32 %v4749_v16, %v4771_v63  ;;  %v15160_v50 = vsub.f32 %v4754_v26, %v4786_v27  ;;  %v15175_v63 = vsub.f32 %v4756_v49, %v4792_v32 }
 0x950   :  { %v15185_v26 = vsub.f32 %v15082_v23, %v4795_v6  ;;  %v15188_v31 = vsub.f32 %v15084_v21, %v4798_v40  ;;  %v15202_v21 = vsub.f32 %v15092_v13, %v4801_v12  ;;  %v15205_v6 = vsub.f32 %v15094_v2, %v4804_v18 }
 0x951   :  { %11789 = vmatprep.subr.bf16.mxu0 %v15076_v60  ;;  %v16620_v34 = vand.u32 4294901760, %v15116_v9  ;;  %v16615_v1 = vand.u32 4294901760, %v15160_v50  ;;  %v16613_v53 = vand.u32 4294901760, %v15175_v63  ;;  %v15222_v2 = vsub.f32 %v15102_v29, %v4807_v39 }
 0x952   :  { %11791 = vmatpush3.bf16.msra.mxu0 %v15076_v60  ;;  %v16612_v49 = vand.u32 4294901760, %v15185_v26  ;;  %v16611_v22 = vand.u32 4294901760, %v15188_v31  ;;  %v16609_v51 = vand.u32 4294901760, %v15205_v6  ;;  %v15227_v12 = vsub.f32 %v15104_v20, %v4810_v4 }
 0x953   :  { %11793 = vmatprep.subr.bf16.mxu0 %v15080_v7  ;;  %v4875_v35 = vsub.f32 %v15116_v9, %v16620_v34  ;;  %v4910_v16 = vsub.f32 %v15160_v50, %v16615_v1  ;;  %v4924_v27 = vsub.f32 %v15175_v63, %v16613_v53  ;;  %v16608_v48 = vand.u32 4294901760, %v15222_v2 }
 0x954   :  { %v4938_v23 = vsub.f32 %v15188_v31, %v16611_v22  ;;  %v4952_v13 = vsub.f32 %v15205_v6, %v16609_v51  ;;  %v15239_v29 = vsub.f32 %v15120_v62, %v4813_v46  ;;  %v15244_v20 = vsub.f32 %v15122_v59, %v4816_v37 }
 0x955   :  { %v4876_v43 = vand.u32 4294901760, %v4875_v35  ;;  %v4911_v30 = vand.u32 4294901760, %v4910_v16  ;;  %v4925_v32 = vand.u32 4294901760, %v4924_v27  ;;  %v4931_v35 = vsub.f32 %v15185_v26, %v16612_v49 }
 0x956   :  { %11795 = vmatpush3.bf16.msra.mxu0 %v15080_v7  ;;  %v4953_v11 = vand.u32 4294901760, %v4952_v13  ;;  %v16607_v16 = vand.u32 4294901760, %v15227_v12  ;;  %16862 = vst [vmem:[#allocation27_spill] sm:$0xff] %v15239_v29  ;;  %16863 = vst [vmem:[#allocation29_spill] sm:$0xff] %v15244_v20  ;;  %v16606_v61 = vand.u32 4294901760, %v15239_v29  ;;  %v16605_v27 = vand.u32 4294901760, %v15244_v20 }
 0x957   :  { %11797 = vmatprep.subr.bf16.mxu0 %v15090_v41  ;;  %v15150_v19 = vpack.c.bf16 %v4883_v54, %v4876_v43  ;;  %v15179_v42 = vpack.c.bf16 %v4911_v30, %v4904_v5  ;;  %v15207_v40 = vpack.c.bf16 %v4925_v32, %v4918_v10  ;;  %v4932_v33 = vand.u32 4294901760, %v4931_v35 }
 0x958   :  { %v4939_v43 = vand.u32 4294901760, %v4938_v23  ;;  %v16610_v54 = vand.u32 4294901760, %v15202_v21  ;;  %v4959_v30 = vsub.f32 %v15222_v2, %v16608_v48  ;;  %v4966_v39 = vsub.f32 %v15227_v12, %v16607_v16 }
 0x959   :  { %v4973_v62 = vsub.f32 %v15239_v29, %v16606_v61  ;;  %v4980_v46 = vsub.f32 %v15244_v20, %v16605_v27  ;;  %v15263_v23 = vpack.c.bf16 %v15118_v58, %v15116_v9  ;;  %v15279_v13 = vpack.c.bf16 %v15188_v31, %v15185_v26 }
 0x95a   :  { %11799 = vmatpush3.bf16.msra.mxu0 %v15090_v41  ;;  %v15211_v28 = vpack.c.bf16 %v4939_v43, %v4932_v33  ;;  %v4945_v8 = vsub.f32 %v15202_v21, %v16610_v54  ;;  %v4960_v4 = vand.u32 4294901760, %v4959_v30  ;;  %v4967_v10 = vand.u32 4294901760, %v4966_v39  ;;  %v7761_v39 = vld [vmem:[#allocation7 + $0x18] ss:$0 sm:$0xff] }
 0x95b   :  { %11801 = vmatprep.subr.bf16.mxu0 %v15100_v44  ;;  %v4974_v37 = vand.u32 4294901760, %v4973_v62  ;;  %v4981_v32 = vand.u32 4294901760, %v4980_v46  ;;  %v15267_v33 = vpack.c.bf16 %v15144_v0, %v15142_v36  ;;  %v15271_v43 = vpack.c.bf16 %v15160_v50, %v15158_v24 }
 0x95c   :  { %v4946_v18 = vand.u32 4294901760, %v4945_v8  ;;  %v15257_v59 = vpack.c.bf16 %v4967_v10, %v4960_v4  ;;  %v15275_v8 = vpack.c.bf16 %v15175_v63, %v15173_v3  ;;  %v15291_v30 = vpack.c.bf16 %v15244_v20, %v15239_v29  ;;  %v4730_v20 = vld [vmem:[#allocation7 + $0x19] sm:$0x1] }
 0x95d   :  { %v15259_v35 = vpack.c.bf16 %v4981_v32, %v4974_v37 }
 0x95e   :  { %11803 = vmatpush3.bf16.msra.mxu0 %v15100_v44  ;;  %v15231_v5 = vpack.c.bf16 %v4953_v11, %v4946_v18  ;;  %v15283_v18 = vpack.c.bf16 %v15205_v6, %v15202_v21  ;;  %v15287_v11 = vpack.c.bf16 %v15227_v12, %v15222_v2 }
 0x95f   :  { %11805 = vmatprep.subr.bf16.mxu0 %v15114_v25 }
 0x962   :  { %11807 = vmatpush3.bf16.msra.mxu0 %v15114_v25 }
 0x963   :  { %11809 = vmatprep.subr.bf16.mxu0 %v15134_v47 }
 0x966   :  { %11811 = vmatpush3.bf16.msra.mxu0 %v15134_v47 }
 0x967   :  { %11813 = vmatprep.subr.bf16.mxu0 %v15150_v19 }
 0xa22   :  { %v9787_v4 = vpop.f32.mrb[4].mxu1 }
 0xa23   :  { %v12560_v10 = vadd.f32 %v9787_v4, %v7761_v39  ;;  %v4698_v62 = vpop.f32.mrb[5].mxu1 }
 0xa24   :  { %v12561_v46 = vadd.f32 %v7761_v39, %v4698_v62 }
 0xa25   :  { %v4717_v37 = vmul.f32 %v12560_v10, %v12560_v10 }
 0xa26   :  { %v4708_v32 = vadd.f32 %v12561_v46, %v12560_v10  ;;  %v4716_v27 = vmul.f32 %v12561_v46, %v12561_v46 }
 0xa28   :  { %v4709_v61 = vrot.slane %v4708_v32, 4  ;;  %v4718_v16 = vadd.f32 %v4717_v37, %v4716_v27 }
 0xa2a   :  { %v4710_v48 = vadd.f32 %v4709_v61, %v4708_v32  ;;  %v4719_v51 = vrot.slane %v4718_v16, 4  ;;  %v4732_v61 = vld [vmem:[#allocation7 + $0x1a] sm:$0x1] }
 0xa2c   :  { %v4711_v54 = vrot.slane %v4710_v48, 2  ;;  %v4720_v22 = vadd.f32 %v4719_v51, %v4718_v16 }
 0xa2e   :  { %v4712_v49 = vadd.f32 %v4711_v54, %v4710_v48  ;;  %v4721_v53 = vrot.slane %v4720_v22, 2 }
 0xa30   :  { %v4713_v14 = vrot.slane %v4712_v49, 1  ;;  %v4722_v1 = vadd.f32 %v4721_v53, %v4720_v22 }
 0xa32   :  { %v4714_v45 = vadd.f32 %v4713_v14, %v4712_v49  ;;  %v4723_v56 = vrot.slane %v4722_v1, 1 }
 0xa34   :  { %v4715_v17 = vmul.f32 0.0625, %v4714_v45  ;;  %v4724_v52 = vadd.f32 %v4723_v56, %v4722_v1 }
 0xa36   :  { %v4725_v4 = vmul.f32 0.0625, %v4724_v52  ;;  %v4726_v34 = vmul.f32 %v4715_v17, %v4715_v17 }
 0xa38   :  { %v4727_v39 = vsub.f32 %v4725_v4, %v4726_v34 }
 0xa3a   :  { %v4728_v62 = vadd.f32 1e-05, %v4727_v39 }
 0xa3c   :  { %12701 = vrsqrt.f32 %v4728_v62 }
 0xa46   :  { %v12702_v29 = vpop.eup %12701 }
 0xa47   :  { %v4731_v27 = vmul.f32 %v12702_v29, %v4730_v20 }
 0xa49   :  { %v4733_v37 = vmul.f32 %v4731_v27, %v4715_v17  ;;  %v4738_v51 = vrot.slane %v4731_v27, %v13315_v15  ;;  %v5501_v27 = vld [vmem:[#allocation5 + $0x250] sm:$0xff] }
 0xa4b   :  { %v4734_v54 = vsub.f32 %v4732_v61, %v4733_v37  ;;  %v4739_v48 = vmul.f32 %v12561_v46, %v4738_v51  ;;  %v4740_v16 = vmul.f32 %v12560_v10, %v4738_v51  ;;  %v5502_v61 = vld [vmem:[#allocation5 + $0x2a8] sm:$0xff]  ;;  %v5535_v37 = vand.u32 4294901760, %v5501_v27 }
 0xa4c   :  { %v5538_v51 = vand.u32 4294901760, %v5502_v61 }
 0xa4d   :  { %v4744_v14 = vrot.slane %v4734_v54, %v13315_v15 }
 0xa4e   :  { %v15419_v54 = vpack.c.bf16 %v5538_v51, %v5535_v37 }
 0xa4f   :  { %v4745_v53 = vadd.f32 %v4744_v14, %v4739_v48  ;;  %v4746_v45 = vadd.f32 %v4744_v14, %v4740_v16  ;;  %v15421_v48 = vld [vmem:[#allocation5 + $0x300] sm:$0xff]  ;;  %v15423_v16 = vld [vmem:[#allocation5 + $0x358] sm:$0xff] }
 0xa50   :  { %v5541_v14 = vand.u32 4294901760, %v15421_v48 }
 0xa51   :  { %v4747_v56 = vmax.f32 %v4745_v53, 0.0  ;;  %v4748_v52 = vmax.f32 %v4746_v45, 0.0  ;;  %v5544_v53 = vand.u32 4294901760, %v15423_v16 }
 0xa53   :  { %v15295_v1 = vand.u32 4294901760, %v4747_v56  ;;  %v15297_v34 = vand.u32 4294901760, %v4748_v52  ;;  %v15429_v45 = vpack.c.bf16 %v5544_v53, %v5541_v14 }
 0xa55   :  { %v15300_v49 = vsub.f32 %v4748_v52, %v15297_v34  ;;  %v4852_v17 = vsub.f32 %v4747_v56, %v15295_v1  ;;  %v15431_v56 = vld [vmem:[#allocation5 + $0x3b0] sm:$0xff]  ;;  %v15433_v52 = vld [vmem:[#allocation5 + $0x408] sm:$0xff] }
 0xa57   :  { %v4853_v22 = vand.u32 4294901760, %v4852_v17  ;;  %v4863_v29 = vand.u32 4294901760, %v15300_v49 }
 0xa59   :  { %v4854_v20 = vsub.f32 %v4852_v17, %v4853_v22  ;;  %v4864_v10 = vsub.f32 %v15300_v49, %v4863_v29 }
 0xa5b   :  { %v4855_v46 = vand.u32 4294901760, %v4854_v20  ;;  %v4865_v32 = vand.u32 4294901760, %v4864_v10 }
 0xa5d   :  { %9820 = vmatprep.mubr.f32.mxu0 %v4855_v46  ;;  %v15455_v46 = vld [vmem:[#allocation5 + $0x510] sm:$0xff] }
 0xa5e   :  { %9821 = vmatmul.mubr.f32.vlgmr.msra.gmra.mrb[8].mxu0 %v4865_v32  ;;  %v15457_v32 = vld [vmem:[#allocation5 + $0x568] sm:$0xff] }
 0xa5f   :  { %11815 = vmatpush3.bf16.msra.mxu0 %v15150_v19  ;;  %9855 = vmatprep.mubr.f32.mxu0 %v15295_v1  ;;  %v16864_v19 = vand.u32 4294901760, %v15116_v9  ;;  %v16869_v9 = vand.u32 4294901760, %v15160_v50  ;;  %v16875_v50 = vand.u32 4294901760, %v15205_v6  ;;  %v5498_v6 = vld [vmem:[#allocation5 + $0x148] sm:$0xff] }
 0xa60   :  { %11817 = vmatprep.subr.bf16.mxu0 %v15165_v38 }
 0xa63   :  { %11819 = vmatpush3.bf16.msra.mxu0 %v15165_v38  ;;  %v16865_v38 = vand.u32 4294901760, %v15118_v58  ;;  %v16870_v58 = vand.u32 4294901760, %v15173_v3  ;;  %v16876_v3 = vand.u32 4294901760, %v15222_v2  ;;  %v5526_v2 = vand.u32 4294901760, %v5498_v6 }
 0xa64   :  { %11821 = vmatprep.subr.bf16.mxu0 %v15179_v42 }
 0xa67   :  { %11823 = vmatpush3.bf16.msra.mxu0 %v15179_v42  ;;  %v11908_v42 = vpack.c.bf16 %v16865_v38, %v16864_v19 }
 0xa68   :  { %11825 = vmatprep.subr.bf16.mxu0 %v15207_v40 }
 0xa6b   :  { %11827 = vmatpush3.bf16.msra.mxu0 %v15207_v40  ;;  %v16866_v40 = vand.u32 4294901760, %v15142_v36 }
 0xa6c   :  { %11829 = vmatprep.subr.bf16.mxu0 %v15211_v28 }
 0xa6f   :  { %11831 = vmatpush3.bf16.msra.mxu0 %v15211_v28  ;;  %v16867_v28 = vand.u32 4294901760, %v15144_v0  ;;  %v16872_v0 = vand.u32 4294901760, %v15185_v26  ;;  %v16878_v26 = vld [vmem:[#allocation27_spill] sm:$0xff] }
 0xa70   :  { %11833 = vmatprep.subr.bf16.mxu0 %v15231_v5 }
 0xa73   :  { %11835 = vmatpush3.bf16.msra.mxu0 %v15231_v5  ;;  %v11912_v5 = vpack.c.bf16 %v16867_v28, %v16866_v40  ;;  %v5562_v40 = vand.u32 4294901760, %v15457_v32 }
 0xa74   :  { %11837 = vmatprep.subr.bf16.mxu0 %v15257_v59 }
 0xa77   :  { %11839 = vmatpush3.bf16.msra.mxu0 %v15257_v59  ;;  %v16868_v59 = vand.u32 4294901760, %v15158_v24  ;;  %v16874_v24 = vand.u32 4294901760, %v15202_v21 }
 0xa78   :  { %11841 = vmatprep.subr.bf16.mxu0 %v15259_v35 }
 0xa7b   :  { %11843 = vmatpush3.bf16.msra.mxu0 %v15259_v35  ;;  %v11916_v35 = vpack.c.bf16 %v16869_v9, %v16868_v59 }
 0xa7c   :  { %11845 = vmatprep.subr.bf16.mxu0 %v15263_v23 }
 0xa7e   :  { %9856 = vmatmul.mubr.f32.vlgmr.msra.gmra.mrb[8].mxu0 %v15297_v34 }
 0xa7f   :  { %11847 = vmatpush3.bf16.msra.mxu0 %v15263_v23  ;;  %9890 = vmatprep.mubr.f32.mxu0 %v4852_v17  ;;  %v16871_v23 = vand.u32 4294901760, %v15175_v63  ;;  %v16877_v63 = vand.u32 4294901760, %v15227_v12  ;;  %v5499_v12 = vld [vmem:[#allocation5 + $0x1a0] sm:$0xff] }
 0xa80   :  { %11849 = vmatprep.subr.bf16.mxu0 %v15267_v33  ;;  %v5529_v4 = vand.u32 4294901760, %v5499_v12  ;;  %v15441_v17 = vld [vmem:[#allocation5 + $0x460] sm:$0xff] }
 0xa81   :  { %v11920_v36 = vpack.c.bf16 %v16871_v23, %v16870_v58  ;;  %v15484_v23 = vsub.f32 %v5498_v6, %v5526_v2 }
 0xa83   :  { %11851 = vmatpush3.bf16.msra.mxu0 %v15267_v33  ;;  %v16873_v33 = vand.u32 4294901760, %v15188_v31  ;;  %v16880_v31 = vld [vmem:[#allocation29_spill] sm:$0xff] }
 0xa84   :  { %11853 = vmatprep.subr.bf16.mxu0 %v15271_v43 }
 0xa87   :  { %11855 = vmatpush3.bf16.msra.mxu0 %v15271_v43  ;;  %v11924_v43 = vpack.c.bf16 %v16873_v33, %v16872_v0 }
 0xa88   :  { %11857 = vmatprep.subr.bf16.mxu0 %v15275_v8 }
 0xa8b   :  { %11859 = vmatpush3.bf16.msra.mxu0 %v15275_v8  ;;  %v11928_v8 = vpack.c.bf16 %v16875_v50, %v16874_v24 }
 0xa8c   :  { %11861 = vmatprep.subr.bf16.mxu0 %v15279_v13 }
 0xa8f   :  { %11863 = vmatpush3.bf16.msra.mxu0 %v15279_v13  ;;  %v11932_v13 = vpack.c.bf16 %v16877_v63, %v16876_v3  ;;  %v15497_v3 = vsub.f32 %v5499_v12, %v5529_v4 }
 0xa90   :  { %11865 = vmatprep.subr.bf16.mxu0 %v15283_v18 }
 0xa93   :  { %11867 = vmatpush3.bf16.msra.mxu0 %v15283_v18  ;;  %v16879_v18 = vand.u32 4294901760, %v16878_v26 }
 0xa94   :  { %11869 = vmatprep.subr.bf16.mxu0 %v15287_v11 }
 0xa97   :  { %11871 = vmatpush3.bf16.msra.mxu0 %v15287_v11  ;;  %v16881_v11 = vand.u32 4294901760, %v16880_v31 }
 0xa98   :  { %11873 = vmatprep.subr.bf16.mxu0 %v15291_v30 }
 0xa9b   :  { %11875 = vmatpush3.bf16.msra.mxu0 %v15291_v30  ;;  %v11936_v30 = vpack.c.bf16 %v16881_v11, %v16879_v18  ;;  %v16634_v18 = vand.u32 4294901760, %v15497_v3 }
 0xa9c   :  { %11877 = vmatprep.subr.bf16.mxu0 %v15068_v55 }
 0xa9e   :  { %9891 = vmatmul.mubr.f32.vlgmr.msra.gmra.mrb[8].mxu0 %v15300_v49 }
 0xa9f   :  { %11879 = vmatpush3.bf16.msra.mxu0 %v15068_v55  ;;  %9925 = vmatprep.mubr.f32.mxu0 %v4853_v22  ;;  %v15443_v22 = vld [vmem:[#allocation5 + $0x4b8] sm:$0xff] }
 0xaa0   :  { %11881 = vmatprep.subr.bf16.mxu0 %v15072_v57  ;;  %v5556_v20 = vand.u32 4294901760, %v15443_v22 }
 0xaa3   :  { %11883 = vmatpush3.bf16.msra.mxu0 %v15072_v57 }
 0xaa4   :  { %11885 = vmatprep.subr.bf16.mxu0 %v15076_v60 }
 0xaa7   :  { %11887 = vmatpush3.bf16.msra.mxu0 %v15076_v60 }
 0xaa8   :  { %11889 = vmatprep.subr.bf16.mxu0 %v15080_v7 }
 0xaab   :  { %11891 = vmatpush3.bf16.msra.mxu0 %v15080_v7 }
 0xaac   :  { %11893 = vmatprep.subr.bf16.mxu0 %v15090_v41 }
 0xaaf   :  { %11895 = vmatpush3.bf16.msra.mxu0 %v15090_v41 }
 0xab0   :  { %11897 = vmatprep.subr.bf16.mxu0 %v15100_v44 }
 0xab3   :  { %11899 = vmatpush3.bf16.msra.mxu0 %v15100_v44 }
 0xab4   :  { %11901 = vmatprep.subr.bf16.mxu0 %v15114_v25 }
 0xab7   :  { %11903 = vmatpush3.bf16.msra.mxu0 %v15114_v25 }
 0xab8   :  { %11905 = vmatprep.subr.bf16.mxu0 %v15134_v47 }
 0xabb   :  { %11907 = vmatpush3.bf16.msra.mxu0 %v15134_v47 }
 0xabc   :  { %11909 = vmatprep.subr.bf16.mxu0 %v11908_v42 }
 0xabe   :  { %9926 = vmatmul.mubr.f32.vlgmr.msra.gmra.mrb[8].mxu0 %v4863_v29  ;;  %v5553_v29 = vand.u32 4294901760, %v15441_v17 }
 0xabf   :  { %11911 = vmatpush3.bf16.msra.mxu0 %v11908_v42  ;;  %9960 = vmatprep.mubr.f32.mxu0 %v15295_v1  ;;  %v5559_v42 = vand.u32 4294901760, %v15455_v46 }
 0xac0   :  { %11913 = vmatprep.subr.bf16.mxu0 %v11912_v5  ;;  %v15453_v10 = vpack.c.bf16 %v5556_v20, %v5553_v29 }
 0xac1   :  { %v15473_v59 = vpack.c.bf16 %v5562_v40, %v5559_v42 }
 0xac3   :  { %11915 = vmatpush3.bf16.msra.mxu0 %v11912_v5 }
 0xac4   :  { %11917 = vmatprep.subr.bf16.mxu0 %v11916_v35 }
 0xac7   :  { %11919 = vmatpush3.bf16.msra.mxu0 %v11916_v35 }
 0xac8   :  { %11921 = vmatprep.subr.bf16.mxu0 %v11920_v36 }
 0xacb   :  { %11923 = vmatpush3.bf16.msra.mxu0 %v11920_v36 }
 0xacc   :  { %11925 = vmatprep.subr.bf16.mxu0 %v11924_v43 }
 0xacf   :  { %11927 = vmatpush3.bf16.msra.mxu0 %v11924_v43  ;;  %v16635_v43 = vand.u32 4294901760, %v15484_v23 }
 0xad0   :  { %11929 = vmatprep.subr.bf16.mxu0 %v11928_v8 }
 0xad3   :  { %11931 = vmatpush3.bf16.msra.mxu0 %v11928_v8  ;;  %v5642_v8 = vsub.f32 %v15484_v23, %v16635_v43 }
 0xad4   :  { %11933 = vmatprep.subr.bf16.mxu0 %v11932_v13 }
 0xad5   :  { %v5643_v26 = vand.u32 4294901760, %v5642_v8 }
 0xad7   :  { %11935 = vmatpush3.bf16.msra.mxu0 %v11932_v13 }
 0xad8   :  { %11937 = vmatprep.subr.bf16.mxu0 %v11936_v30 }
 0xadb   :  { %11939 = vmatpush3.bf16.msra.mxu0 %v11936_v30  ;;  %v5649_v30 = vsub.f32 %v15497_v3, %v16634_v18 }
 0xadc   :  { %11941 = vmatprep.subr.bf16.mxu0 %v15068_v55 }
 0xade   :  { %9961 = vmatmul.mubr.f32.vlgmr.msra.gmra.mrb[8].mxu0 %v15297_v34 }
 0xadf   :  { %11943 = vmatpush3.bf16.msra.mxu0 %v15068_v55  ;;  %9995 = vmatprep.mubr.f32.mxu0 %v15295_v1  ;;  %v5495_v55 = vld [vmem:[#allocation5 + $0x40] sm:$0xff]  ;;  %v5547_v1 = vand.u32 4294901760, %v15431_v56 }
 0xae0   :  { %11945 = vmatprep.subr.bf16.mxu0 %v15072_v57 }
 0xae3   :  { %11947 = vmatpush3.bf16.msra.mxu0 %v15072_v57  ;;  %v5496_v57 = vld [vmem:[#allocation5 + $0x98] sm:$0xff] }
 0xae4   :  { %11949 = vmatprep.subr.bf16.mxu0 %v15076_v60 }
 0xae7   :  { %11951 = vmatpush3.bf16.msra.mxu0 %v15076_v60  ;;  %v5517_v60 = vand.u32 4294901760, %v5495_v55 }
 0xae8   :  { %11953 = vmatprep.subr.bf16.mxu0 %v15080_v7 }
 0xae9   :  { %v15459_v19 = vsub.f32 %v5495_v55, %v5517_v60 }
 0xaeb   :  { %11955 = vmatpush3.bf16.msra.mxu0 %v15080_v7  ;;  %v5520_v7 = vand.u32 4294901760, %v5496_v57  ;;  %v16638_v28 = vand.u32 4294901760, %v15459_v19 }
 0xaec   :  { %11957 = vmatprep.subr.bf16.mxu0 %v15090_v41 }
 0xaed   :  { %v15407_v21 = vpack.c.bf16 %v5520_v7, %v5517_v60  ;;  %v15461_v38 = vsub.f32 %v5496_v57, %v5520_v7  ;;  %v5621_v9 = vsub.f32 %v15459_v19, %v16638_v28  ;;  %v15512_v57 = vsub.f32 %v5501_v27, %v5535_v37 }
 0xaee   :  { %v15514_v60 = vsub.f32 %v5502_v61, %v5538_v51  ;;  %v5650_v7 = vand.u32 4294901760, %v5649_v30 }
 0xaef   :  { %11959 = vmatpush3.bf16.msra.mxu0 %v15090_v41  ;;  %v5497_v41 = vld [vmem:[#allocation5 + $0xf0] sm:$0xff]  ;;  %11973 = vmatprep.subr.bf16.mxu1 %v15407_v21  ;;  %v16637_v5 = vand.u32 4294901760, %v15461_v38  ;;  %v5622_v36 = vand.u32 4294901760, %v5621_v9  ;;  %v16632_v6 = vand.u32 4294901760, %v15512_v57 }
 0xaf0   :  { %11961 = vmatprep.subr.bf16.mxu0 %v15100_v44  ;;  %11975 = vmatpush3.bf16.msra.mxu1 %v15407_v21 }
 0xaf1   :  { %v5628_v35 = vsub.f32 %v15461_v38, %v16637_v5  ;;  %v5663_v12 = vsub.f32 %v15512_v57, %v16632_v6 }
 0xaf3   :  { %11963 = vmatpush3.bf16.msra.mxu0 %v15100_v44  ;;  %v5523_v44 = vand.u32 4294901760, %v5497_v41  ;;  %v5629_v0 = vand.u32 4294901760, %v5628_v35  ;;  %v5664_v27 = vand.u32 4294901760, %v5663_v12 }
 0xaf4   :  { %11965 = vmatprep.subr.bf16.mxu0 %v15114_v25 }
 0xaf5   :  { %v15482_v58 = vsub.f32 %v5497_v41, %v5523_v44  ;;  %v15489_v24 = vpack.c.bf16 %v5629_v0, %v5622_v36 }
 0xaf7   :  { %11967 = vmatpush3.bf16.msra.mxu0 %v15114_v25  ;;  %v15411_v25 = vpack.c.bf16 %v5526_v2, %v5523_v44  ;;  %v16636_v33 = vand.u32 4294901760, %v15482_v58  ;;  %v16631_v44 = vand.u32 4294901760, %v15514_v60 }
 0xaf8   :  { %11969 = vmatprep.subr.bf16.mxu0 %v15134_v47 }
 0xaf9   :  { %11977 = vmatprep.subr.bf16.mxu1 %v15411_v25  ;;  %v5635_v50 = vsub.f32 %v15482_v58, %v16636_v33 }
 0xafa   :  { %11979 = vmatpush3.bf16.msra.mxu1 %v15411_v25 }
 0xafb   :  { %11971 = vmatpush3.bf16.msra.mxu0 %v15134_v47  ;;  %v5500_v47 = vld [vmem:[#allocation5 + $0x1f8] sm:$0xff]  ;;  %v5636_v13 = vand.u32 4294901760, %v5635_v50 }
 0xafc   :  { %v5532_v39 = vand.u32 4294901760, %v5500_v47 }
 0xafd   :  { %v15504_v11 = vpack.c.bf16 %v5643_v26, %v5636_v13 }
 0xafe   :  { %9996 = vmatmul.mubr.f32.vlgmr.msra.gmra.mrb[8].mxu0 %v15297_v34  ;;  %v15415_v62 = vpack.c.bf16 %v5532_v39, %v5529_v4  ;;  %v5550_v34 = vand.u32 4294901760, %v15433_v52  ;;  %v15499_v63 = vsub.f32 %v5500_v47, %v5532_v39  ;;  %v15524_v47 = vsub.f32 %v15421_v48, %v5541_v14 }
 0xaff   :  { %v15527_v4 = vsub.f32 %v15423_v16, %v5544_v53  ;;  %v5670_v39 = vsub.f32 %v15514_v60, %v16631_v44  ;;  %v15541_v16 = vsub.f32 %v15431_v56, %v5547_v1 }
 0xb00   :  { %11981 = vmatprep.subr.bf16.mxu1 %v15415_v62  ;;  %v15439_v49 = vpack.c.bf16 %v5550_v34, %v5547_v1  ;;  %v16633_v31 = vand.u32 4294901760, %v15499_v63  ;;  %v16630_v61 = vand.u32 4294901760, %v15524_v47  ;;  %v15544_v14 = vsub.f32 %v15433_v52, %v5550_v34 }
 0xb01   :  { %11983 = vmatpush3.bf16.msra.mxu1 %v15415_v62  ;;  %v16629_v37 = vand.u32 4294901760, %v15527_v4  ;;  %v5671_v51 = vand.u32 4294901760, %v5670_v39  ;;  %v16628_v0 = vand.u32 4294901760, %v15541_v16  ;;  %v15561_v52 = vsub.f32 %v15441_v17, %v5553_v29 }
 0xb02   :  { %11985 = vmatprep.subr.bf16.mxu1 %v15419_v54  ;;  %v5656_v55 = vsub.f32 %v15499_v63, %v16633_v31  ;;  %v5677_v9 = vsub.f32 %v15524_v47, %v16630_v61  ;;  %v16627_v50 = vand.u32 4294901760, %v15544_v14  ;;  %v15566_v1 = vsub.f32 %v15443_v22, %v5556_v20 }
 0xb03   :  { %v5684_v48 = vsub.f32 %v15527_v4, %v16629_v37  ;;  %v15546_v53 = vpack.c.bf16 %v5671_v51, %v5664_v27  ;;  %v5691_v13 = vsub.f32 %v15541_v16, %v16628_v0  ;;  %v16626_v30 = vand.u32 4294901760, %v15561_v52 }
 0xb04   :  { %v5657_v41 = vand.u32 4294901760, %v5656_v55  ;;  %v5678_v35 = vand.u32 4294901760, %v5677_v9  ;;  %v5698_v56 = vsub.f32 %v15544_v14, %v16627_v50  ;;  %v16625_v55 = vand.u32 4294901760, %v15566_v1 }
 0xb05   :  { %11987 = vmatpush3.bf16.msra.mxu1 %v15419_v54  ;;  %v5685_v36 = vand.u32 4294901760, %v5684_v48  ;;  %v5692_v34 = vand.u32 4294901760, %v5691_v13  ;;  %v15578_v17 = vsub.f32 %v15455_v46, %v5559_v42  ;;  %v15583_v22 = vsub.f32 %v15457_v32, %v5562_v40 }
 0xb06   :  { %11989 = vmatprep.subr.bf16.mxu1 %v15429_v45  ;;  %v15518_v2 = vpack.c.bf16 %v5657_v41, %v5650_v7  ;;  %v5699_v26 = vand.u32 4294901760, %v5698_v56  ;;  %v5705_v41 = vsub.f32 %v15561_v52, %v16626_v30  ;;  %v5712_v29 = vsub.f32 %v15566_v1, %v16625_v55 }
 0xb07   :  { %v15550_v8 = vpack.c.bf16 %v5685_v36, %v5678_v35  ;;  %16882 = vst [vmem:[#allocation28_spill] sm:$0xff] %v15578_v17  ;;  %16883 = vst [vmem:[#allocation31_spill] sm:$0xff] %v15583_v22  ;;  %v16624_v12 = vand.u32 4294901760, %v15578_v17  ;;  %v16623_v39 = vand.u32 4294901760, %v15583_v22  ;;  %v15602_v48 = vpack.c.bf16 %v15461_v38, %v15459_v19 }
 0xb08   :  { %v15570_v7 = vpack.c.bf16 %v5699_v26, %v5692_v34  ;;  %v5706_v20 = vand.u32 4294901760, %v5705_v41  ;;  %v5713_v27 = vand.u32 4294901760, %v5712_v29  ;;  %v15606_v35 = vpack.c.bf16 %v15484_v23, %v15482_v58  ;;  %v7762_v29 = vld [vmem:[#allocation7 + $0x1c] ss:$0 sm:$0xff] }
 0xb09   :  { %11991 = vmatpush3.bf16.msra.mxu1 %v15429_v45  ;;  %v5719_v46 = vsub.f32 %v15578_v17, %v16624_v12  ;;  %v5726_v42 = vsub.f32 %v15583_v22, %v16623_v39  ;;  %v15610_v36 = vpack.c.bf16 %v15499_v63, %v15497_v3  ;;  %v15614_v13 = vpack.c.bf16 %v15514_v60, %v15512_v57 }
 0xb0a   :  { %11993 = vmatprep.subr.bf16.mxu1 %v15439_v49  ;;  %v15596_v32 = vpack.c.bf16 %v5713_v27, %v5706_v20  ;;  %v15618_v56 = vpack.c.bf16 %v15527_v4, %v15524_v47  ;;  %v15622_v34 = vpack.c.bf16 %v15544_v14, %v15541_v16  ;;  %v15626_v26 = vpack.c.bf16 %v15566_v1, %v15561_v52 }
 0xb0b   :  { %v5720_v40 = vand.u32 4294901760, %v5719_v46  ;;  %v5727_v51 = vand.u32 4294901760, %v5726_v42  ;;  %v15630_v41 = vpack.c.bf16 %v15583_v22, %v15578_v17  ;;  %v5476_v22 = vld [vmem:[#allocation7 + $0x1d] sm:$0x1] }
 0xb0d   :  { %11995 = vmatpush3.bf16.msra.mxu1 %v15439_v49  ;;  %v15598_v9 = vpack.c.bf16 %v5727_v51, %v5720_v40 }
 0xb0e   :  { %11997 = vmatprep.subr.bf16.mxu1 %v15453_v10 }
 0xb11   :  { %11999 = vmatpush3.bf16.msra.mxu1 %v15453_v10 }
 0xb12   :  { %12001 = vmatprep.subr.bf16.mxu1 %v15473_v59 }
 0xb15   :  { %12003 = vmatpush3.bf16.msra.mxu1 %v15473_v59 }
 0xb16   :  { %12005 = vmatprep.subr.bf16.mxu1 %v15489_v24 }
 0xbd1   :  { %v9997_v20 = vpop.f32.mrb[8].mxu0 }
 0xbd2   :  { %v12562_v27 = vadd.f32 %v9997_v20, %v7762_v29  ;;  %v5444_v46 = vpop.f32.mrb[9].mxu0 }
 0xbd3   :  { %v12563_v42 = vadd.f32 %v7762_v29, %v5444_v46 }
 0xbd4   :  { %v5463_v40 = vmul.f32 %v12562_v27, %v12562_v27 }
 0xbd5   :  { %v5454_v51 = vadd.f32 %v12563_v42, %v12562_v27  ;;  %v5462_v39 = vmul.f32 %v12563_v42, %v12563_v42 }
 0xbd7   :  { %v5455_v12 = vrot.slane %v5454_v51, 4  ;;  %v5464_v55 = vadd.f32 %v5463_v40, %v5462_v39 }
 0xbd9   :  { %v5456_v30 = vadd.f32 %v5455_v12, %v5454_v51  ;;  %v5465_v50 = vrot.slane %v5464_v55, 4  ;;  %v5478_v12 = vld [vmem:[#allocation7 + $0x1e] sm:$0x1] }
 0xbdb   :  { %v5457_v0 = vrot.slane %v5456_v30, 2  ;;  %v5466_v37 = vadd.f32 %v5465_v50, %v5464_v55 }
 0xbdd   :  { %v5458_v61 = vadd.f32 %v5457_v0, %v5456_v30  ;;  %v5467_v44 = vrot.slane %v5466_v37, 2 }
 0xbdf   :  { %v5459_v6 = vrot.slane %v5458_v61, 1  ;;  %v5468_v31 = vadd.f32 %v5467_v44, %v5466_v37 }
 0xbe1   :  { %v5460_v18 = vadd.f32 %v5459_v6, %v5458_v61  ;;  %v5469_v43 = vrot.slane %v5468_v31, 1 }
 0xbe3   :  { %v5461_v33 = vmul.f32 0.0625, %v5460_v18  ;;  %v5470_v5 = vadd.f32 %v5469_v43, %v5468_v31 }
 0xbe5   :  { %v5471_v20 = vmul.f32 0.0625, %v5470_v5  ;;  %v5472_v28 = vmul.f32 %v5461_v33, %v5461_v33 }
 0xbe7   :  { %v5473_v29 = vsub.f32 %v5471_v20, %v5472_v28 }
 0xbe9   :  { %v5474_v46 = vadd.f32 1e-05, %v5473_v29 }
 0xbeb   :  { %12703 = vrsqrt.f32 %v5474_v46 }
 0xbf5   :  { %v12704_v17 = vpop.eup %12703 }
 0xbf6   :  { %v5477_v39 = vmul.f32 %v12704_v17, %v5476_v22 }
 0xbf8   :  { %v5479_v40 = vmul.f32 %v5477_v39, %v5461_v33  ;;  %v5484_v50 = vrot.slane %v5477_v39, %v13315_v15  ;;  %v6247_v39 = vld [vmem:[#allocation5 + $0x258] sm:$0xff] }
 0xbfa   :  { %v5480_v0 = vsub.f32 %v5478_v12, %v5479_v40  ;;  %v5485_v30 = vmul.f32 %v12563_v42, %v5484_v50  ;;  %v5486_v55 = vmul.f32 %v12562_v27, %v5484_v50  ;;  %v6248_v12 = vld [vmem:[#allocation5 + $0x2b0] sm:$0xff]  ;;  %v6281_v40 = vand.u32 4294901760, %v6247_v39 }
 0xbfb   :  { %v6284_v50 = vand.u32 4294901760, %v6248_v12 }
 0xbfc   :  { %v5490_v6 = vrot.slane %v5480_v0, %v13315_v15 }
 0xbfd   :  { %v15758_v0 = vpack.c.bf16 %v6284_v50, %v6281_v40 }
 0xbfe   :  { %v5491_v44 = vadd.f32 %v5490_v6, %v5485_v30  ;;  %v5492_v18 = vadd.f32 %v5490_v6, %v5486_v55  ;;  %v15760_v30 = vld [vmem:[#allocation5 + $0x308] sm:$0xff]  ;;  %v15762_v55 = vld [vmem:[#allocation5 + $0x360] sm:$0xff] }
 0xbff   :  { %v6287_v6 = vand.u32 4294901760, %v15760_v30 }
 0xc00   :  { %v5493_v43 = vmax.f32 %v5491_v44, 0.0  ;;  %v5494_v5 = vmax.f32 %v5492_v18, 0.0  ;;  %v6290_v44 = vand.u32 4294901760, %v15762_v55 }
 0xc02   :  { %v15634_v31 = vand.u32 4294901760, %v5493_v43  ;;  %v15636_v28 = vand.u32 4294901760, %v5494_v5  ;;  %v15768_v18 = vpack.c.bf16 %v6290_v44, %v6287_v6 }
 0xc04   :  { %v5598_v61 = vsub.f32 %v5493_v43, %v15634_v31  ;;  %v15640_v37 = vsub.f32 %v5494_v5, %v15636_v28  ;;  %v15770_v43 = vld [vmem:[#allocation5 + $0x3b8] sm:$0xff]  ;;  %v15772_v5 = vld [vmem:[#allocation5 + $0x410] sm:$0xff] }
 0xc06   :  { %v5599_v33 = vand.u32 4294901760, %v5598_v61  ;;  %v5609_v17 = vand.u32 4294901760, %v15640_v37 }
 0xc08   :  { %v5600_v22 = vsub.f32 %v5598_v61, %v5599_v33  ;;  %v5610_v27 = vsub.f32 %v15640_v37, %v5609_v17 }
 0xc0a   :  { %v5601_v42 = vand.u32 4294901760, %v5600_v22  ;;  %v5611_v51 = vand.u32 4294901760, %v5610_v27 }
 0xc0c   :  { %10030 = vmatprep.mubr.f32.mxu1 %v5601_v42  ;;  %v15794_v42 = vld [vmem:[#allocation5 + $0x518] sm:$0xff] }
 0xc0d   :  { %10031 = vmatmul.mubr.f32.vlgmr.msra.gmra.mrb[6].mxu1 %v5611_v51  ;;  %v15796_v51 = vld [vmem:[#allocation5 + $0x570] sm:$0xff] }
 0xc0e   :  { %12007 = vmatpush3.bf16.msra.mxu1 %v15489_v24  ;;  %10065 = vmatprep.mubr.f32.mxu1 %v15634_v31  ;;  %v16884_v24 = vand.u32 4294901760, %v15459_v19  ;;  %v16889_v19 = vand.u32 4294901760, %v15499_v63  ;;  %v16895_v63 = vand.u32 4294901760, %v15544_v14  ;;  %v6244_v14 = vld [vmem:[#allocation5 + $0x150] sm:$0xff] }
 0xc0f   :  { %12009 = vmatprep.subr.bf16.mxu1 %v15504_v11 }
 0xc12   :  { %12011 = vmatpush3.bf16.msra.mxu1 %v15504_v11  ;;  %v16885_v11 = vand.u32 4294901760, %v15461_v38  ;;  %v16890_v38 = vand.u32 4294901760, %v15512_v57  ;;  %v16896_v57 = vand.u32 4294901760, %v15561_v52  ;;  %v6272_v52 = vand.u32 4294901760, %v6244_v14 }
 0xc13   :  { %12013 = vmatprep.subr.bf16.mxu1 %v15518_v2 }
 0xc16   :  { %12015 = vmatpush3.bf16.msra.mxu1 %v15518_v2  ;;  %v12100_v2 = vpack.c.bf16 %v16885_v11, %v16884_v24 }
 0xc17   :  { %12017 = vmatprep.subr.bf16.mxu1 %v15546_v53 }
 0xc1a   :  { %12019 = vmatpush3.bf16.msra.mxu1 %v15546_v53  ;;  %v16886_v53 = vand.u32 4294901760, %v15482_v58 }
 0xc1b   :  { %12021 = vmatprep.subr.bf16.mxu1 %v15550_v8 }
 0xc1e   :  { %12023 = vmatpush3.bf16.msra.mxu1 %v15550_v8  ;;  %v16887_v8 = vand.u32 4294901760, %v15484_v23  ;;  %v16892_v23 = vand.u32 4294901760, %v15524_v47  ;;  %v16898_v47 = vld [vmem:[#allocation28_spill] sm:$0xff] }
 0xc1f   :  { %12025 = vmatprep.subr.bf16.mxu1 %v15570_v7 }
 0xc22   :  { %12027 = vmatpush3.bf16.msra.mxu1 %v15570_v7  ;;  %v12104_v7 = vpack.c.bf16 %v16887_v8, %v16886_v53  ;;  %v6308_v53 = vand.u32 4294901760, %v15796_v51 }
 0xc23   :  { %12029 = vmatprep.subr.bf16.mxu1 %v15596_v32 }
 0xc26   :  { %12031 = vmatpush3.bf16.msra.mxu1 %v15596_v32  ;;  %v16888_v32 = vand.u32 4294901760, %v15497_v3  ;;  %v16894_v3 = vand.u32 4294901760, %v15541_v16 }
 0xc27   :  { %12033 = vmatprep.subr.bf16.mxu1 %v15598_v9 }
 0xc2a   :  { %12035 = vmatpush3.bf16.msra.mxu1 %v15598_v9  ;;  %v12108_v9 = vpack.c.bf16 %v16889_v19, %v16888_v32 }
 0xc2b   :  { %12037 = vmatprep.subr.bf16.mxu1 %v15602_v48 }
 0xc2d   :  { %10066 = vmatmul.mubr.f32.vlgmr.msra.gmra.mrb[6].mxu1 %v15636_v28 }
 0xc2e   :  { %12039 = vmatpush3.bf16.msra.mxu1 %v15602_v48  ;;  %10100 = vmatprep.mubr.f32.mxu1 %v5598_v61  ;;  %v16891_v48 = vand.u32 4294901760, %v15514_v60  ;;  %v16897_v60 = vand.u32 4294901760, %v15566_v1  ;;  %v6245_v1 = vld [vmem:[#allocation5 + $0x1a8] sm:$0xff] }
 0xc2f   :  { %12041 = vmatprep.subr.bf16.mxu1 %v15606_v35  ;;  %v6275_v20 = vand.u32 4294901760, %v6245_v1 }
 0xc30   :  { %v12112_v58 = vpack.c.bf16 %v16891_v48, %v16890_v38  ;;  %v15823_v48 = vsub.f32 %v6244_v14, %v6272_v52 }
 0xc32   :  { %12043 = vmatpush3.bf16.msra.mxu1 %v15606_v35  ;;  %v16893_v35 = vand.u32 4294901760, %v15527_v4  ;;  %v16900_v4 = vld [vmem:[#allocation31_spill] sm:$0xff] }
 0xc33   :  { %12045 = vmatprep.subr.bf16.mxu1 %v15610_v36 }
 0xc36   :  { %12047 = vmatpush3.bf16.msra.mxu1 %v15610_v36  ;;  %v12116_v36 = vpack.c.bf16 %v16893_v35, %v16892_v23 }
 0xc37   :  { %12049 = vmatprep.subr.bf16.mxu1 %v15614_v13 }
 0xc3a   :  { %12051 = vmatpush3.bf16.msra.mxu1 %v15614_v13  ;;  %v12120_v13 = vpack.c.bf16 %v16895_v63, %v16894_v3 }
 0xc3b   :  { %12053 = vmatprep.subr.bf16.mxu1 %v15618_v56 }
 0xc3e   :  { %12055 = vmatpush3.bf16.msra.mxu1 %v15618_v56  ;;  %v12124_v56 = vpack.c.bf16 %v16897_v60, %v16896_v57  ;;  %v15836_v57 = vsub.f32 %v6245_v1, %v6275_v20 }
 0xc3f   :  { %12057 = vmatprep.subr.bf16.mxu1 %v15622_v34 }
 0xc42   :  { %12059 = vmatpush3.bf16.msra.mxu1 %v15622_v34  ;;  %v16899_v34 = vand.u32 4294901760, %v16898_v47 }
 0xc43   :  { %12061 = vmatprep.subr.bf16.mxu1 %v15626_v26 }
 0xc46   :  { %12063 = vmatpush3.bf16.msra.mxu1 %v15626_v26  ;;  %v16901_v26 = vand.u32 4294901760, %v16900_v4 }
 0xc47   :  { %12065 = vmatprep.subr.bf16.mxu1 %v15630_v41 }
 0xc4a   :  { %12067 = vmatpush3.bf16.msra.mxu1 %v15630_v41  ;;  %v12128_v41 = vpack.c.bf16 %v16901_v26, %v16899_v34  ;;  %v16652_v34 = vand.u32 4294901760, %v15836_v57 }
 0xc4b   :  { %12069 = vmatprep.subr.bf16.mxu1 %v15407_v21 }
 0xc4d   :  { %10101 = vmatmul.mubr.f32.vlgmr.msra.gmra.mrb[6].mxu1 %v15640_v37  ;;  %v15780_v37 = vld [vmem:[#allocation5 + $0x468] sm:$0xff] }
 0xc4e   :  { %12071 = vmatpush3.bf16.msra.mxu1 %v15407_v21  ;;  %10135 = vmatprep.mubr.f32.mxu1 %v5599_v33  ;;  %v15782_v33 = vld [vmem:[#allocation5 + $0x4c0] sm:$0xff] }
 0xc4f   :  { %12073 = vmatprep.subr.bf16.mxu1 %v15411_v25  ;;  %v6302_v22 = vand.u32 4294901760, %v15782_v33 }
 0xc52   :  { %12075 = vmatpush3.bf16.msra.mxu1 %v15411_v25 }
 0xc53   :  { %12077 = vmatprep.subr.bf16.mxu1 %v15415_v62 }
 0xc56   :  { %12079 = vmatpush3.bf16.msra.mxu1 %v15415_v62 }
 0xc57   :  { %12081 = vmatprep.subr.bf16.mxu1 %v15419_v54 }
 0xc5a   :  { %12083 = vmatpush3.bf16.msra.mxu1 %v15419_v54 }
 0xc5b   :  { %12085 = vmatprep.subr.bf16.mxu1 %v15429_v45 }
 0xc5e   :  { %12087 = vmatpush3.bf16.msra.mxu1 %v15429_v45 }
 0xc5f   :  { %12089 = vmatprep.subr.bf16.mxu1 %v15439_v49 }
 0xc62   :  { %12091 = vmatpush3.bf16.msra.mxu1 %v15439_v49 }
 0xc63   :  { %12093 = vmatprep.subr.bf16.mxu1 %v15453_v10 }
 0xc66   :  { %12095 = vmatpush3.bf16.msra.mxu1 %v15453_v10 }
 0xc67   :  { %12097 = vmatprep.subr.bf16.mxu1 %v15473_v59 }
 0xc6a   :  { %12099 = vmatpush3.bf16.msra.mxu1 %v15473_v59 }
 0xc6b   :  { %12101 = vmatprep.subr.bf16.mxu1 %v12100_v2 }
 0xc6d   :  { %10136 = vmatmul.mubr.f32.vlgmr.msra.gmra.mrb[6].mxu1 %v5609_v17  ;;  %v6299_v17 = vand.u32 4294901760, %v15780_v37 }
 0xc6e   :  { %12103 = vmatpush3.bf16.msra.mxu1 %v12100_v2  ;;  %10170 = vmatprep.mubr.f32.mxu1 %v15634_v31  ;;  %v6305_v2 = vand.u32 4294901760, %v15794_v42 }
 0xc6f   :  { %12105 = vmatprep.subr.bf16.mxu1 %v12104_v7  ;;  %v15792_v27 = vpack.c.bf16 %v6302_v22, %v6299_v17 }
 0xc70   :  { %v15812_v32 = vpack.c.bf16 %v6308_v53, %v6305_v2 }
 0xc72   :  { %12107 = vmatpush3.bf16.msra.mxu1 %v12104_v7 }
 0xc73   :  { %12109 = vmatprep.subr.bf16.mxu1 %v12108_v9 }
 0xc76   :  { %12111 = vmatpush3.bf16.msra.mxu1 %v12108_v9 }
 0xc77   :  { %12113 = vmatprep.subr.bf16.mxu1 %v12112_v58 }
 0xc7a   :  { %12115 = vmatpush3.bf16.msra.mxu1 %v12112_v58 }
 0xc7b   :  { %12117 = vmatprep.subr.bf16.mxu1 %v12116_v36 }
 0xc7e   :  { %12119 = vmatpush3.bf16.msra.mxu1 %v12116_v36  ;;  %v16653_v36 = vand.u32 4294901760, %v15823_v48 }
 0xc7f   :  { %12121 = vmatprep.subr.bf16.mxu1 %v12120_v13 }
 0xc82   :  { %12123 = vmatpush3.bf16.msra.mxu1 %v12120_v13  ;;  %v6388_v13 = vsub.f32 %v15823_v48, %v16653_v36 }
 0xc83   :  { %12125 = vmatprep.subr.bf16.mxu1 %v12124_v56 }
 0xc84   :  { %v6389_v47 = vand.u32 4294901760, %v6388_v13 }
 0xc86   :  { %12127 = vmatpush3.bf16.msra.mxu1 %v12124_v56 }
 0xc87   :  { %12129 = vmatprep.subr.bf16.mxu1 %v12128_v41 }
 0xc8a   :  { %12131 = vmatpush3.bf16.msra.mxu1 %v12128_v41  ;;  %v6395_v41 = vsub.f32 %v15836_v57, %v16652_v34 }
 0xc8b   :  { %12133 = vmatprep.subr.bf16.mxu1 %v15407_v21 }
 0xc8d   :  { %10171 = vmatmul.mubr.f32.vlgmr.msra.gmra.mrb[6].mxu1 %v15636_v28 }
 0xc8e   :  { %12135 = vmatpush3.bf16.msra.mxu1 %v15407_v21  ;;  %10205 = vmatprep.mubr.f32.mxu1 %v15634_v31  ;;  %v6241_v21 = vld [vmem:[#allocation5 + $0x48] sm:$0xff]  ;;  %v6293_v31 = vand.u32 4294901760, %v15770_v43 }
 0xc8f   :  { %12137 = vmatprep.subr.bf16.mxu1 %v15411_v25 }
 0xc92   :  { %12139 = vmatpush3.bf16.msra.mxu1 %v15411_v25  ;;  %v6242_v25 = vld [vmem:[#allocation5 + $0xa0] sm:$0xff] }
 0xc93   :  { %12141 = vmatprep.subr.bf16.mxu1 %v15415_v62 }
 0xc96   :  { %12143 = vmatpush3.bf16.msra.mxu1 %v15415_v62  ;;  %v6263_v62 = vand.u32 4294901760, %v6241_v21 }
 0xc97   :  { %12145 = vmatprep.subr.bf16.mxu1 %v15419_v54 }
 0xc98   :  { %v15798_v24 = vsub.f32 %v6241_v21, %v6263_v62 }
 0xc9a   :  { %12147 = vmatpush3.bf16.msra.mxu1 %v15419_v54  ;;  %v6266_v54 = vand.u32 4294901760, %v6242_v25  ;;  %v16656_v8 = vand.u32 4294901760, %v15798_v24 }
 0xc9b   :  { %12149 = vmatprep.subr.bf16.mxu1 %v15429_v45 }
 0xc9c   :  { %v15746_v16 = vpack.c.bf16 %v6266_v54, %v6263_v62  ;;  %v15800_v11 = vsub.f32 %v6242_v25, %v6266_v54  ;;  %v6367_v19 = vsub.f32 %v15798_v24, %v16656_v8  ;;  %v15851_v25 = vsub.f32 %v6247_v39, %v6281_v40 }
 0xc9d   :  { %v15853_v62 = vsub.f32 %v6248_v12, %v6284_v50  ;;  %v6396_v54 = vand.u32 4294901760, %v6395_v41 }
 0xc9e   :  { %12151 = vmatpush3.bf16.msra.mxu1 %v15429_v45  ;;  %v6243_v45 = vld [vmem:[#allocation5 + $0xf8] sm:$0xff]  ;;  %12165 = vmatprep.subr.bf16.mxu0 %v15746_v16  ;;  %v16655_v7 = vand.u32 4294901760, %v15800_v11  ;;  %v6368_v58 = vand.u32 4294901760, %v6367_v19  ;;  %v16650_v14 = vand.u32 4294901760, %v15851_v25 }
 0xc9f   :  { %12153 = vmatprep.subr.bf16.mxu1 %v15439_v49  ;;  %12167 = vmatpush3.bf16.msra.mxu0 %v15746_v16 }
 0xca0   :  { %v6374_v9 = vsub.f32 %v15800_v11, %v16655_v7  ;;  %v6409_v1 = vsub.f32 %v15851_v25, %v16650_v14 }
 0xca2   :  { %12155 = vmatpush3.bf16.msra.mxu1 %v15439_v49  ;;  %v6269_v49 = vand.u32 4294901760, %v6243_v45  ;;  %v6375_v23 = vand.u32 4294901760, %v6374_v9  ;;  %v6410_v39 = vand.u32 4294901760, %v6409_v1 }
 0xca3   :  { %12157 = vmatprep.subr.bf16.mxu1 %v15453_v10 }
 0xca4   :  { %v15821_v38 = vsub.f32 %v6243_v45, %v6269_v49  ;;  %v15828_v3 = vpack.c.bf16 %v6375_v23, %v6368_v58 }
 0xca6   :  { %12159 = vmatpush3.bf16.msra.mxu1 %v15453_v10  ;;  %v15750_v10 = vpack.c.bf16 %v6272_v52, %v6269_v49  ;;  %v16654_v35 = vand.u32 4294901760, %v15821_v38  ;;  %v16649_v49 = vand.u32 4294901760, %v15853_v62 }
 0xca7   :  { %12161 = vmatprep.subr.bf16.mxu1 %v15473_v59 }
 0xca8   :  { %12169 = vmatprep.subr.bf16.mxu0 %v15750_v10  ;;  %v6381_v63 = vsub.f32 %v15821_v38, %v16654_v35 }
 0xca9   :  { %12171 = vmatpush3.bf16.msra.mxu0 %v15750_v10 }
 0xcaa   :  { %12163 = vmatpush3.bf16.msra.mxu1 %v15473_v59  ;;  %v6246_v59 = vld [vmem:[#allocation5 + $0x200] sm:$0xff]  ;;  %v6382_v56 = vand.u32 4294901760, %v6381_v63 }
 0xcab   :  { %v6278_v29 = vand.u32 4294901760, %v6246_v59 }
 0xcac   :  { %v15843_v26 = vpack.c.bf16 %v6389_v47, %v6382_v56 }
 0xcad   :  { %10206 = vmatmul.mubr.f32.vlgmr.msra.gmra.mrb[6].mxu1 %v15636_v28  ;;  %v15754_v46 = vpack.c.bf16 %v6278_v29, %v6275_v20  ;;  %v6296_v28 = vand.u32 4294901760, %v15772_v5  ;;  %v15838_v60 = vsub.f32 %v6246_v59, %v6278_v29  ;;  %v15863_v59 = vsub.f32 %v15760_v30, %v6287_v6 }
 0xcae   :  { %v15866_v20 = vsub.f32 %v15762_v55, %v6290_v44  ;;  %v6416_v29 = vsub.f32 %v15853_v62, %v16649_v49  ;;  %v15880_v55 = vsub.f32 %v15770_v43, %v6293_v31 }
 0xcaf   :  { %12173 = vmatprep.subr.bf16.mxu0 %v15754_v46  ;;  %v15778_v61 = vpack.c.bf16 %v6296_v28, %v6293_v31  ;;  %v16651_v4 = vand.u32 4294901760, %v15838_v60  ;;  %v16648_v12 = vand.u32 4294901760, %v15863_v59  ;;  %v15883_v6 = vsub.f32 %v15772_v5, %v6296_v28 }
 0xcb0   :  { %12175 = vmatpush3.bf16.msra.mxu0 %v15754_v46  ;;  %v16647_v40 = vand.u32 4294901760, %v15866_v20  ;;  %v6417_v50 = vand.u32 4294901760, %v6416_v29  ;;  %v16646_v23 = vand.u32 4294901760, %v15880_v55  ;;  %v15900_v5 = vsub.f32 %v15780_v37, %v6299_v17 }
 0xcb1   :  { %12177 = vmatprep.subr.bf16.mxu0 %v15758_v0  ;;  %v6402_v21 = vsub.f32 %v15838_v60, %v16651_v4  ;;  %v6423_v19 = vsub.f32 %v15863_v59, %v16648_v12  ;;  %v16645_v63 = vand.u32 4294901760, %v15883_v6  ;;  %v15905_v31 = vsub.f32 %v15782_v33, %v6302_v22 }
 0xcb2   :  { %v6430_v30 = vsub.f32 %v15866_v20, %v16647_v40  ;;  %v15885_v44 = vpack.c.bf16 %v6417_v50, %v6410_v39  ;;  %v6437_v56 = vsub.f32 %v15880_v55, %v16646_v23  ;;  %v16644_v41 = vand.u32 4294901760, %v15900_v5 }
 0xcb3   :  { %v6403_v45 = vand.u32 4294901760, %v6402_v21  ;;  %v6424_v9 = vand.u32 4294901760, %v6423_v19  ;;  %v6444_v43 = vsub.f32 %v15883_v6, %v16645_v63  ;;  %v16643_v21 = vand.u32 4294901760, %v15905_v31 }
 0xcb4   :  { %12179 = vmatpush3.bf16.msra.mxu0 %v15758_v0  ;;  %v6431_v58 = vand.u32 4294901760, %v6430_v30  ;;  %v6438_v28 = vand.u32 4294901760, %v6437_v56  ;;  %v15917_v37 = vsub.f32 %v15794_v42, %v6305_v2  ;;  %v15922_v33 = vsub.f32 %v15796_v51, %v6308_v53 }
 0xcb5   :  { %12181 = vmatprep.subr.bf16.mxu0 %v15768_v18  ;;  %v15857_v52 = vpack.c.bf16 %v6403_v45, %v6396_v54  ;;  %v6445_v47 = vand.u32 4294901760, %v6444_v43  ;;  %v6451_v45 = vsub.f32 %v15900_v5, %v16644_v41  ;;  %v6458_v17 = vsub.f32 %v15905_v31, %v16643_v21 }
 0xcb6   :  { %v15889_v13 = vpack.c.bf16 %v6431_v58, %v6424_v9  ;;  %16902 = vst [vmem:[#allocation30_spill] sm:$0xff] %v15917_v37  ;;  %16903 = vst [vmem:[#allocation34_spill] sm:$0xff] %v15922_v33  ;;  %v16642_v1 = vand.u32 4294901760, %v15917_v37  ;;  %v16641_v29 = vand.u32 4294901760, %v15922_v33  ;;  %v15941_v30 = vpack.c.bf16 %v15800_v11, %v15798_v24 }
 0xcb7   :  { %v15909_v54 = vpack.c.bf16 %v6445_v47, %v6438_v28  ;;  %v6452_v22 = vand.u32 4294901760, %v6451_v45  ;;  %v6459_v39 = vand.u32 4294901760, %v6458_v17  ;;  %v15945_v9 = vpack.c.bf16 %v15823_v48, %v15821_v38  ;;  %v7763_v17 = vld [vmem:[#allocation7 + $0x20] ss:$0 sm:$0xff] }
 0xcb8   :  { %12183 = vmatpush3.bf16.msra.mxu0 %v15768_v18  ;;  %v6465_v42 = vsub.f32 %v15917_v37, %v16642_v1  ;;  %v6472_v2 = vsub.f32 %v15922_v33, %v16641_v29  ;;  %v15949_v58 = vpack.c.bf16 %v15838_v60, %v15836_v57  ;;  %v15953_v56 = vpack.c.bf16 %v15853_v62, %v15851_v25 }
 0xcb9   :  { %12185 = vmatprep.subr.bf16.mxu0 %v15778_v61  ;;  %v15935_v51 = vpack.c.bf16 %v6459_v39, %v6452_v22  ;;  %v15957_v43 = vpack.c.bf16 %v15866_v20, %v15863_v59  ;;  %v15961_v28 = vpack.c.bf16 %v15883_v6, %v15880_v55  ;;  %v15965_v47 = vpack.c.bf16 %v15905_v31, %v15900_v5 }
 0xcba   :  { %v6466_v53 = vand.u32 4294901760, %v6465_v42  ;;  %v6473_v50 = vand.u32 4294901760, %v6472_v2  ;;  %v15969_v45 = vpack.c.bf16 %v15922_v33, %v15917_v37  ;;  %v6222_v33 = vld [vmem:[#allocation7 + $0x21] sm:$0x1] }
 0xcbc   :  { %12187 = vmatpush3.bf16.msra.mxu0 %v15778_v61  ;;  %v15937_v19 = vpack.c.bf16 %v6473_v50, %v6466_v53 }
 0xcbd   :  { %12189 = vmatprep.subr.bf16.mxu0 %v15792_v27 }
 0xcc0   :  { %12191 = vmatpush3.bf16.msra.mxu0 %v15792_v27 }
 0xcc1   :  { %12193 = vmatprep.subr.bf16.mxu0 %v15812_v32 }
 0xcc4   :  { %12195 = vmatpush3.bf16.msra.mxu0 %v15812_v32 }
 0xcc5   :  { %12197 = vmatprep.subr.bf16.mxu0 %v15828_v3 }
 0xd80   :  { %v10207_v22 = vpop.f32.mrb[6].mxu1 }
 0xd81   :  { %v12564_v39 = vadd.f32 %v10207_v22, %v7763_v17  ;;  %v6190_v42 = vpop.f32.mrb[7].mxu1 }
 0xd82   :  { %v12565_v2 = vadd.f32 %v7763_v17, %v6190_v42 }
 0xd83   :  { %v6209_v53 = vmul.f32 %v12564_v39, %v12564_v39 }
 0xd84   :  { %v6200_v50 = vadd.f32 %v12565_v2, %v12564_v39  ;;  %v6208_v29 = vmul.f32 %v12565_v2, %v12565_v2 }
 0xd86   :  { %v6201_v1 = vrot.slane %v6200_v50, 4  ;;  %v6210_v21 = vadd.f32 %v6209_v53, %v6208_v29 }
 0xd88   :  { %v6202_v41 = vadd.f32 %v6201_v1, %v6200_v50  ;;  %v6211_v63 = vrot.slane %v6210_v21, 4  ;;  %v6224_v1 = vld [vmem:[#allocation7 + $0x22] sm:$0x1] }
 0xd8a   :  { %v6203_v23 = vrot.slane %v6202_v41, 2  ;;  %v6212_v40 = vadd.f32 %v6211_v63, %v6210_v21 }
 0xd8c   :  { %v6204_v12 = vadd.f32 %v6203_v23, %v6202_v41  ;;  %v6213_v49 = vrot.slane %v6212_v40, 2 }
 0xd8e   :  { %v6205_v14 = vrot.slane %v6204_v12, 1  ;;  %v6214_v4 = vadd.f32 %v6213_v49, %v6212_v40 }
 0xd90   :  { %v6206_v34 = vadd.f32 %v6205_v14, %v6204_v12  ;;  %v6215_v36 = vrot.slane %v6214_v4, 1 }
 0xd92   :  { %v6207_v35 = vmul.f32 0.0625, %v6206_v34  ;;  %v6216_v7 = vadd.f32 %v6215_v36, %v6214_v4 }
 0xd94   :  { %v6217_v22 = vmul.f32 0.0625, %v6216_v7  ;;  %v6218_v8 = vmul.f32 %v6207_v35, %v6207_v35 }
 0xd96   :  { %v6219_v17 = vsub.f32 %v6217_v22, %v6218_v8 }
 0xd98   :  { %v6220_v42 = vadd.f32 1e-05, %v6219_v17 }
 0xd9a   :  { %12705 = vrsqrt.f32 %v6220_v42 }
 0xda4   :  { %v12706_v37 = vpop.eup %12705 }
 0xda5   :  { %v6223_v29 = vmul.f32 %v12706_v37, %v6222_v33 }
 0xda7   :  { %v6225_v53 = vmul.f32 %v6223_v29, %v6207_v35  ;;  %v6230_v63 = vrot.slane %v6223_v29, %v13315_v15  ;;  %v6993_v29 = vld [vmem:[#allocation5 + $0x260] sm:$0xff] }
 0xda9   :  { %v6226_v23 = vsub.f32 %v6224_v1, %v6225_v53  ;;  %v6231_v41 = vmul.f32 %v12565_v2, %v6230_v63  ;;  %v6232_v21 = vmul.f32 %v12564_v39, %v6230_v63  ;;  %v6994_v1 = vld [vmem:[#allocation5 + $0x2b8] sm:$0xff]  ;;  %v7027_v53 = vand.u32 4294901760, %v6993_v29 }
 0xdaa   :  { %v7030_v63 = vand.u32 4294901760, %v6994_v1 }
 0xdab   :  { %v6236_v14 = vrot.slane %v6226_v23, %v13315_v15 }
 0xdac   :  { %v16097_v23 = vpack.c.bf16 %v7030_v63, %v7027_v53 }
 0xdad   :  { %v6237_v49 = vadd.f32 %v6236_v14, %v6231_v41  ;;  %v6238_v34 = vadd.f32 %v6236_v14, %v6232_v21  ;;  %v16099_v41 = vld [vmem:[#allocation5 + $0x310] sm:$0xff]  ;;  %v16101_v21 = vld [vmem:[#allocation5 + $0x368] sm:$0xff] }
 0xdae   :  { %v7033_v14 = vand.u32 4294901760, %v16099_v41 }
 0xdaf   :  { %v6239_v36 = vmax.f32 %v6237_v49, 0.0  ;;  %v6240_v7 = vmax.f32 %v6238_v34, 0.0  ;;  %v7036_v49 = vand.u32 4294901760, %v16101_v21 }
 0xdb1   :  { %v15973_v4 = vand.u32 4294901760, %v6239_v36  ;;  %v15975_v8 = vand.u32 4294901760, %v6240_v7  ;;  %v16107_v34 = vpack.c.bf16 %v7036_v49, %v7033_v14 }
 0xdb3   :  { %v6344_v12 = vsub.f32 %v6239_v36, %v15973_v4  ;;  %v15979_v40 = vsub.f32 %v6240_v7, %v15975_v8  ;;  %v16109_v36 = vld [vmem:[#allocation5 + $0x3c0] sm:$0xff]  ;;  %v16111_v7 = vld [vmem:[#allocation5 + $0x418] sm:$0xff] }
 0xdb5   :  { %v6345_v35 = vand.u32 4294901760, %v6344_v12  ;;  %v6355_v37 = vand.u32 4294901760, %v15979_v40 }
 0xdb7   :  { %v6346_v33 = vsub.f32 %v6344_v12, %v6345_v35  ;;  %v6356_v39 = vsub.f32 %v15979_v40, %v6355_v37 }
 0xdb9   :  { %v6347_v2 = vand.u32 4294901760, %v6346_v33  ;;  %v6357_v50 = vand.u32 4294901760, %v6356_v39 }
 0xdbb   :  { %10240 = vmatprep.mubr.f32.mxu0 %v6347_v2  ;;  %v16133_v2 = vld [vmem:[#allocation5 + $0x520] sm:$0xff] }
 0xdbc   :  { %10241 = vmatmul.mubr.f32.vlgmr.msra.gmra.mrb[10].mxu0 %v6357_v50  ;;  %v16135_v50 = vld [vmem:[#allocation5 + $0x578] sm:$0xff] }
 0xdbd   :  { %12199 = vmatpush3.bf16.msra.mxu0 %v15828_v3  ;;  %10275 = vmatprep.mubr.f32.mxu0 %v15973_v4  ;;  %v16904_v3 = vand.u32 4294901760, %v15798_v24  ;;  %v16909_v24 = vand.u32 4294901760, %v15838_v60  ;;  %v16915_v60 = vand.u32 4294901760, %v15883_v6  ;;  %v6990_v6 = vld [vmem:[#allocation5 + $0x158] sm:$0xff] }
 0xdbe   :  { %12201 = vmatprep.subr.bf16.mxu0 %v15843_v26 }
 0xdc1   :  { %12203 = vmatpush3.bf16.msra.mxu0 %v15843_v26  ;;  %v16905_v26 = vand.u32 4294901760, %v15800_v11  ;;  %v16910_v11 = vand.u32 4294901760, %v15851_v25  ;;  %v16916_v25 = vand.u32 4294901760, %v15900_v5  ;;  %v7018_v5 = vand.u32 4294901760, %v6990_v6 }
 0xdc2   :  { %12205 = vmatprep.subr.bf16.mxu0 %v15857_v52 }
 0xdc5   :  { %12207 = vmatpush3.bf16.msra.mxu0 %v15857_v52  ;;  %v12292_v52 = vpack.c.bf16 %v16905_v26, %v16904_v3 }
 0xdc6   :  { %12209 = vmatprep.subr.bf16.mxu0 %v15885_v44 }
 0xdc9   :  { %12211 = vmatpush3.bf16.msra.mxu0 %v15885_v44  ;;  %v16906_v44 = vand.u32 4294901760, %v15821_v38 }
 0xdca   :  { %12213 = vmatprep.subr.bf16.mxu0 %v15889_v13 }
 0xdcd   :  { %12215 = vmatpush3.bf16.msra.mxu0 %v15889_v13  ;;  %v16907_v13 = vand.u32 4294901760, %v15823_v48  ;;  %v16912_v48 = vand.u32 4294901760, %v15863_v59  ;;  %v16918_v59 = vld [vmem:[#allocation30_spill] sm:$0xff] }
 0xdce   :  { %12217 = vmatprep.subr.bf16.mxu0 %v15909_v54 }
 0xdd1   :  { %12219 = vmatpush3.bf16.msra.mxu0 %v15909_v54  ;;  %v12296_v54 = vpack.c.bf16 %v16907_v13, %v16906_v44  ;;  %v7054_v44 = vand.u32 4294901760, %v16135_v50 }
 0xdd2   :  { %12221 = vmatprep.subr.bf16.mxu0 %v15935_v51 }
 0xdd5   :  { %12223 = vmatpush3.bf16.msra.mxu0 %v15935_v51  ;;  %v16908_v51 = vand.u32 4294901760, %v15836_v57  ;;  %v16914_v57 = vand.u32 4294901760, %v15880_v55 }
 0xdd6   :  { %12225 = vmatprep.subr.bf16.mxu0 %v15937_v19 }
 0xdd9   :  { %12227 = vmatpush3.bf16.msra.mxu0 %v15937_v19  ;;  %v12300_v19 = vpack.c.bf16 %v16909_v24, %v16908_v51 }
 0xdda   :  { %12229 = vmatprep.subr.bf16.mxu0 %v15941_v30 }
 0xddc   :  { %10276 = vmatmul.mubr.f32.vlgmr.msra.gmra.mrb[10].mxu0 %v15975_v8 }
 0xddd   :  { %12231 = vmatpush3.bf16.msra.mxu0 %v15941_v30  ;;  %10310 = vmatprep.mubr.f32.mxu0 %v6344_v12  ;;  %v16911_v30 = vand.u32 4294901760, %v15853_v62  ;;  %v16917_v62 = vand.u32 4294901760, %v15905_v31  ;;  %v6991_v31 = vld [vmem:[#allocation5 + $0x1b0] sm:$0xff] }
 0xdde   :  { %12233 = vmatprep.subr.bf16.mxu0 %v15945_v9  ;;  %v7021_v22 = vand.u32 4294901760, %v6991_v31 }
 0xddf   :  { %v12304_v38 = vpack.c.bf16 %v16911_v30, %v16910_v11  ;;  %v16162_v30 = vsub.f32 %v6990_v6, %v7018_v5 }
 0xde1   :  { %12235 = vmatpush3.bf16.msra.mxu0 %v15945_v9  ;;  %v16913_v9 = vand.u32 4294901760, %v15866_v20  ;;  %v16920_v20 = vld [vmem:[#allocation34_spill] sm:$0xff] }
 0xde2   :  { %12237 = vmatprep.subr.bf16.mxu0 %v15949_v58 }
 0xde5   :  { %12239 = vmatpush3.bf16.msra.mxu0 %v15949_v58  ;;  %v12308_v58 = vpack.c.bf16 %v16913_v9, %v16912_v48 }
 0xde6   :  { %12241 = vmatprep.subr.bf16.mxu0 %v15953_v56 }
 0xde9   :  { %12243 = vmatpush3.bf16.msra.mxu0 %v15953_v56  ;;  %v12312_v56 = vpack.c.bf16 %v16915_v60, %v16914_v57 }
 0xdea   :  { %12245 = vmatprep.subr.bf16.mxu0 %v15957_v43 }
 0xded   :  { %12247 = vmatpush3.bf16.msra.mxu0 %v15957_v43  ;;  %v12316_v43 = vpack.c.bf16 %v16917_v62, %v16916_v25  ;;  %v16175_v25 = vsub.f32 %v6991_v31, %v7021_v22 }
 0xdee   :  { %12249 = vmatprep.subr.bf16.mxu0 %v15961_v28 }
 0xdf1   :  { %12251 = vmatpush3.bf16.msra.mxu0 %v15961_v28  ;;  %v16919_v28 = vand.u32 4294901760, %v16918_v59 }
 0xdf2   :  { %12253 = vmatprep.subr.bf16.mxu0 %v15965_v47 }
 0xdf5   :  { %12255 = vmatpush3.bf16.msra.mxu0 %v15965_v47  ;;  %v16921_v47 = vand.u32 4294901760, %v16920_v20 }
 0xdf6   :  { %12257 = vmatprep.subr.bf16.mxu0 %v15969_v45 }
 0xdf9   :  { %12259 = vmatpush3.bf16.msra.mxu0 %v15969_v45  ;;  %v12320_v45 = vpack.c.bf16 %v16921_v47, %v16919_v28  ;;  %v16670_v28 = vand.u32 4294901760, %v16175_v25 }
 0xdfa   :  { %12261 = vmatprep.subr.bf16.mxu0 %v15746_v16 }
 0xdfc   :  { %10311 = vmatmul.mubr.f32.vlgmr.msra.gmra.mrb[10].mxu0 %v15979_v40  ;;  %v16119_v40 = vld [vmem:[#allocation5 + $0x470] sm:$0xff] }
 0xdfd   :  { %12263 = vmatpush3.bf16.msra.mxu0 %v15746_v16  ;;  %10345 = vmatprep.mubr.f32.mxu0 %v6345_v35  ;;  %v16121_v35 = vld [vmem:[#allocation5 + $0x4c8] sm:$0xff] }
 0xdfe   :  { %12265 = vmatprep.subr.bf16.mxu0 %v15750_v10  ;;  %v7048_v33 = vand.u32 4294901760, %v16121_v35 }
 0xe01   :  { %12267 = vmatpush3.bf16.msra.mxu0 %v15750_v10 }
 0xe02   :  { %12269 = vmatprep.subr.bf16.mxu0 %v15754_v46 }
 0xe05   :  { %12271 = vmatpush3.bf16.msra.mxu0 %v15754_v46 }
 0xe06   :  { %12273 = vmatprep.subr.bf16.mxu0 %v15758_v0 }
 0xe09   :  { %12275 = vmatpush3.bf16.msra.mxu0 %v15758_v0 }
 0xe0a   :  { %12277 = vmatprep.subr.bf16.mxu0 %v15768_v18 }
 0xe0d   :  { %12279 = vmatpush3.bf16.msra.mxu0 %v15768_v18 }
 0xe0e   :  { %12281 = vmatprep.subr.bf16.mxu0 %v15778_v61 }
 0xe11   :  { %12283 = vmatpush3.bf16.msra.mxu0 %v15778_v61 }
 0xe12   :  { %12285 = vmatprep.subr.bf16.mxu0 %v15792_v27 }
 0xe15   :  { %12287 = vmatpush3.bf16.msra.mxu0 %v15792_v27 }
 0xe16   :  { %12289 = vmatprep.subr.bf16.mxu0 %v15812_v32 }
 0xe19   :  { %12291 = vmatpush3.bf16.msra.mxu0 %v15812_v32 }
 0xe1a   :  { %12293 = vmatprep.subr.bf16.mxu0 %v12292_v52 }
 0xe1c   :  { %10346 = vmatmul.mubr.f32.vlgmr.msra.gmra.mrb[10].mxu0 %v6355_v37  ;;  %v7045_v37 = vand.u32 4294901760, %v16119_v40 }
 0xe1d   :  { %12295 = vmatpush3.bf16.msra.mxu0 %v12292_v52  ;;  %10380 = vmatprep.mubr.f32.mxu0 %v15973_v4  ;;  %v7051_v52 = vand.u32 4294901760, %v16133_v2 }
 0xe1e   :  { %12297 = vmatprep.subr.bf16.mxu0 %v12296_v54  ;;  %v16131_v39 = vpack.c.bf16 %v7048_v33, %v7045_v37 }
 0xe1f   :  { %v16151_v51 = vpack.c.bf16 %v7054_v44, %v7051_v52 }
 0xe21   :  { %12299 = vmatpush3.bf16.msra.mxu0 %v12296_v54 }
 0xe22   :  { %12301 = vmatprep.subr.bf16.mxu0 %v12300_v19 }
 0xe25   :  { %12303 = vmatpush3.bf16.msra.mxu0 %v12300_v19 }
 0xe26   :  { %12305 = vmatprep.subr.bf16.mxu0 %v12304_v38 }
 0xe29   :  { %12307 = vmatpush3.bf16.msra.mxu0 %v12304_v38 }
 0xe2a   :  { %12309 = vmatprep.subr.bf16.mxu0 %v12308_v58 }
 0xe2d   :  { %12311 = vmatpush3.bf16.msra.mxu0 %v12308_v58  ;;  %v16671_v58 = vand.u32 4294901760, %v16162_v30 }
 0xe2e   :  { %12313 = vmatprep.subr.bf16.mxu0 %v12312_v56 }
 0xe31   :  { %12315 = vmatpush3.bf16.msra.mxu0 %v12312_v56  ;;  %v7134_v56 = vsub.f32 %v16162_v30, %v16671_v58 }
 0xe32   :  { %12317 = vmatprep.subr.bf16.mxu0 %v12316_v43 }
 0xe33   :  { %v7135_v59 = vand.u32 4294901760, %v7134_v56 }
 0xe35   :  { %12319 = vmatpush3.bf16.msra.mxu0 %v12316_v43 }
 0xe36   :  { %12321 = vmatprep.subr.bf16.mxu0 %v12320_v45 }
 0xe39   :  { %12323 = vmatpush3.bf16.msra.mxu0 %v12320_v45  ;;  %v7141_v45 = vsub.f32 %v16175_v25, %v16670_v28 }
 0xe3a   :  { %12325 = vmatprep.subr.bf16.mxu0 %v15746_v16 }
 0xe3c   :  { %10381 = vmatmul.mubr.f32.vlgmr.msra.gmra.mrb[10].mxu0 %v15975_v8 }
 0xe3d   :  { %12327 = vmatpush3.bf16.msra.mxu0 %v15746_v16  ;;  %10415 = vmatprep.mubr.f32.mxu0 %v15973_v4  ;;  %v6987_v16 = vld [vmem:[#allocation5 + $0x50] sm:$0xff]  ;;  %v7039_v4 = vand.u32 4294901760, %v16109_v36 }
 0xe3e   :  { %12329 = vmatprep.subr.bf16.mxu0 %v15750_v10 }
 0xe41   :  { %12331 = vmatpush3.bf16.msra.mxu0 %v15750_v10  ;;  %v6988_v10 = vld [vmem:[#allocation5 + $0xa8] sm:$0xff] }
 0xe42   :  { %12333 = vmatprep.subr.bf16.mxu0 %v15754_v46 }
 0xe45   :  { %12335 = vmatpush3.bf16.msra.mxu0 %v15754_v46  ;;  %v7009_v46 = vand.u32 4294901760, %v6987_v16 }
 0xe46   :  { %12337 = vmatprep.subr.bf16.mxu0 %v15758_v0 }
 0xe47   :  { %v16137_v3 = vsub.f32 %v6987_v16, %v7009_v46 }
 0xe49   :  { %12339 = vmatpush3.bf16.msra.mxu0 %v15758_v0  ;;  %v7012_v0 = vand.u32 4294901760, %v6988_v10  ;;  %v16674_v13 = vand.u32 4294901760, %v16137_v3 }
 0xe4a   :  { %12341 = vmatprep.subr.bf16.mxu0 %v15768_v18 }
 0xe4b   :  { %v16085_v55 = vpack.c.bf16 %v7012_v0, %v7009_v46  ;;  %v16139_v26 = vsub.f32 %v6988_v10, %v7012_v0  ;;  %v7113_v24 = vsub.f32 %v16137_v3, %v16674_v13  ;;  %v16190_v10 = vsub.f32 %v6993_v29, %v7027_v53 }
 0xe4c   :  { %v16192_v46 = vsub.f32 %v6994_v1, %v7030_v63  ;;  %v7142_v0 = vand.u32 4294901760, %v7141_v45 }
 0xe4d   :  { %12343 = vmatpush3.bf16.msra.mxu0 %v15768_v18  ;;  %v6989_v18 = vld [vmem:[#allocation5 + $0x100] sm:$0xff]  ;;  %12357 = vmatprep.subr.bf16.mxu1 %v16085_v55  ;;  %v16673_v54 = vand.u32 4294901760, %v16139_v26  ;;  %v7114_v38 = vand.u32 4294901760, %v7113_v24  ;;  %v16668_v6 = vand.u32 4294901760, %v16190_v10 }
 0xe4e   :  { %12345 = vmatprep.subr.bf16.mxu0 %v15778_v61  ;;  %12359 = vmatpush3.bf16.msra.mxu1 %v16085_v55 }
 0xe4f   :  { %v7120_v19 = vsub.f32 %v16139_v26, %v16673_v54  ;;  %v7155_v31 = vsub.f32 %v16190_v10, %v16668_v6 }
 0xe51   :  { %12347 = vmatpush3.bf16.msra.mxu0 %v15778_v61  ;;  %v7015_v61 = vand.u32 4294901760, %v6989_v18  ;;  %v7121_v48 = vand.u32 4294901760, %v7120_v19  ;;  %v7156_v29 = vand.u32 4294901760, %v7155_v31 }
 0xe52   :  { %12349 = vmatprep.subr.bf16.mxu0 %v15792_v27 }
 0xe53   :  { %v16160_v11 = vsub.f32 %v6989_v18, %v7015_v61  ;;  %v16167_v57 = vpack.c.bf16 %v7121_v48, %v7114_v38 }
 0xe55   :  { %12351 = vmatpush3.bf16.msra.mxu0 %v15792_v27  ;;  %v16089_v27 = vpack.c.bf16 %v7018_v5, %v7015_v61  ;;  %v16672_v9 = vand.u32 4294901760, %v16160_v11  ;;  %v16667_v61 = vand.u32 4294901760, %v16192_v46 }
 0xe56   :  { %12353 = vmatprep.subr.bf16.mxu0 %v15812_v32 }
 0xe57   :  { %12361 = vmatprep.subr.bf16.mxu1 %v16089_v27  ;;  %v7127_v60 = vsub.f32 %v16160_v11, %v16672_v9 }
 0xe58   :  { %12363 = vmatpush3.bf16.msra.mxu1 %v16089_v27 }
 0xe59   :  { %12355 = vmatpush3.bf16.msra.mxu0 %v15812_v32  ;;  %v6992_v32 = vld [vmem:[#allocation5 + $0x208] sm:$0xff]  ;;  %v7128_v43 = vand.u32 4294901760, %v7127_v60 }
 0xe5a   :  { %v7024_v17 = vand.u32 4294901760, %v6992_v32 }
 0xe5b   :  { %v16182_v47 = vpack.c.bf16 %v7135_v59, %v7128_v43 }
 0xe5c   :  { %10416 = vmatmul.mubr.f32.vlgmr.msra.gmra.mrb[10].mxu0 %v15975_v8  ;;  %v16093_v42 = vpack.c.bf16 %v7024_v17, %v7021_v22  ;;  %v7042_v8 = vand.u32 4294901760, %v16111_v7  ;;  %v16177_v62 = vsub.f32 %v6992_v32, %v7024_v17  ;;  %v16202_v32 = vsub.f32 %v16099_v41, %v7033_v14 }
 0xe5d   :  { %v16205_v22 = vsub.f32 %v16101_v21, %v7036_v49  ;;  %v7162_v17 = vsub.f32 %v16192_v46, %v16667_v61  ;;  %v16219_v21 = vsub.f32 %v16109_v36, %v7039_v4 }
 0xe5e   :  { %12365 = vmatprep.subr.bf16.mxu1 %v16093_v42  ;;  %v16117_v12 = vpack.c.bf16 %v7042_v8, %v7039_v4  ;;  %v16669_v20 = vand.u32 4294901760, %v16177_v62  ;;  %v16666_v1 = vand.u32 4294901760, %v16202_v32  ;;  %v16222_v14 = vsub.f32 %v16111_v7, %v7042_v8 }
 0xe5f   :  { %12367 = vmatpush3.bf16.msra.mxu1 %v16093_v42  ;;  %v16665_v53 = vand.u32 4294901760, %v16205_v22  ;;  %v7163_v63 = vand.u32 4294901760, %v7162_v17  ;;  %v16664_v48 = vand.u32 4294901760, %v16219_v21  ;;  %v16239_v7 = vsub.f32 %v16119_v40, %v7045_v37 }
 0xe60   :  { %12369 = vmatprep.subr.bf16.mxu1 %v16097_v23  ;;  %v7148_v16 = vsub.f32 %v16177_v62, %v16669_v20  ;;  %v7169_v24 = vsub.f32 %v16202_v32, %v16666_v1  ;;  %v16663_v60 = vand.u32 4294901760, %v16222_v14  ;;  %v16244_v4 = vsub.f32 %v16121_v35, %v7048_v33 }
 0xe61   :  { %v7176_v41 = vsub.f32 %v16205_v22, %v16665_v53  ;;  %v16224_v49 = vpack.c.bf16 %v7163_v63, %v7156_v29  ;;  %v7183_v43 = vsub.f32 %v16219_v21, %v16664_v48  ;;  %v16662_v45 = vand.u32 4294901760, %v16239_v7 }
 0xe62   :  { %v7149_v18 = vand.u32 4294901760, %v7148_v16  ;;  %v7170_v19 = vand.u32 4294901760, %v7169_v24  ;;  %v7190_v36 = vsub.f32 %v16222_v14, %v16663_v60  ;;  %v16661_v16 = vand.u32 4294901760, %v16244_v4 }
 0xe63   :  { %12371 = vmatpush3.bf16.msra.mxu1 %v16097_v23  ;;  %v7177_v38 = vand.u32 4294901760, %v7176_v41  ;;  %v7184_v8 = vand.u32 4294901760, %v7183_v43  ;;  %v16256_v40 = vsub.f32 %v16133_v2, %v7051_v52  ;;  %v16261_v35 = vsub.f32 %v16135_v50, %v7054_v44 }
 0xe64   :  { %12373 = vmatprep.subr.bf16.mxu1 %v16107_v34  ;;  %v16196_v5 = vpack.c.bf16 %v7149_v18, %v7142_v0  ;;  %v7191_v59 = vand.u32 4294901760, %v7190_v36  ;;  %v7197_v18 = vsub.f32 %v16239_v7, %v16662_v45  ;;  %v7204_v37 = vsub.f32 %v16244_v4, %v16661_v16 }
 0xe65   :  { %v16228_v56 = vpack.c.bf16 %v7177_v38, %v7170_v19  ;;  %16922 = vst [vmem:[#allocation33_spill] sm:$0xff] %v16256_v40  ;;  %16923 = vst [vmem:[#allocation37_spill] sm:$0xff] %v16261_v35  ;;  %v16660_v31 = vand.u32 4294901760, %v16256_v40  ;;  %v16659_v17 = vand.u32 4294901760, %v16261_v35  ;;  %v16280_v41 = vpack.c.bf16 %v16139_v26, %v16137_v3 }
 0xe66   :  { %v16248_v0 = vpack.c.bf16 %v7191_v59, %v7184_v8  ;;  %v7198_v33 = vand.u32 4294901760, %v7197_v18  ;;  %v7205_v29 = vand.u32 4294901760, %v7204_v37  ;;  %v16284_v19 = vpack.c.bf16 %v16162_v30, %v16160_v11  ;;  %v7764_v37 = vld [vmem:[#allocation7 + $0x24] ss:$0 sm:$0xff] }
 0xe67   :  { %12375 = vmatpush3.bf16.msra.mxu1 %v16107_v34  ;;  %v7211_v2 = vsub.f32 %v16256_v40, %v16660_v31  ;;  %v7218_v52 = vsub.f32 %v16261_v35, %v16659_v17  ;;  %v16288_v38 = vpack.c.bf16 %v16177_v62, %v16175_v25  ;;  %v16292_v43 = vpack.c.bf16 %v16192_v46, %v16190_v10 }
 0xe68   :  { %12377 = vmatprep.subr.bf16.mxu1 %v16117_v12  ;;  %v16274_v50 = vpack.c.bf16 %v7205_v29, %v7198_v33  ;;  %v16296_v36 = vpack.c.bf16 %v16205_v22, %v16202_v32  ;;  %v16300_v8 = vpack.c.bf16 %v16222_v14, %v16219_v21  ;;  %v16304_v59 = vpack.c.bf16 %v16244_v4, %v16239_v7 }
 0xe69   :  { %v7212_v44 = vand.u32 4294901760, %v7211_v2  ;;  %v7219_v63 = vand.u32 4294901760, %v7218_v52  ;;  %v16308_v18 = vpack.c.bf16 %v16261_v35, %v16256_v40  ;;  %v6968_v35 = vld [vmem:[#allocation7 + $0x25] sm:$0x1] }
 0xe6b   :  { %12379 = vmatpush3.bf16.msra.mxu1 %v16117_v12  ;;  %v16276_v24 = vpack.c.bf16 %v7219_v63, %v7212_v44 }
 0xe6c   :  { %12381 = vmatprep.subr.bf16.mxu1 %v16131_v39 }
 0xe6f   :  { %12383 = vmatpush3.bf16.msra.mxu1 %v16131_v39 }
 0xe70   :  { %12385 = vmatprep.subr.bf16.mxu1 %v16151_v51 }
 0xe73   :  { %12387 = vmatpush3.bf16.msra.mxu1 %v16151_v51 }
 0xe74   :  { %12389 = vmatprep.subr.bf16.mxu1 %v16167_v57 }
 0xf2f   :  { %v10417_v33 = vpop.f32.mrb[10].mxu0 }
 0xf30   :  { %v12566_v29 = vadd.f32 %v10417_v33, %v7764_v37  ;;  %v6936_v2 = vpop.f32.mrb[11].mxu0 }
 0xf31   :  { %v12567_v52 = vadd.f32 %v7764_v37, %v6936_v2 }
 0xf32   :  { %v6955_v44 = vmul.f32 %v12566_v29, %v12566_v29 }
 0xf33   :  { %v6946_v63 = vadd.f32 %v12567_v52, %v12566_v29  ;;  %v6954_v17 = vmul.f32 %v12567_v52, %v12567_v52 }
 0xf35   :  { %v6947_v31 = vrot.slane %v6946_v63, 4  ;;  %v6956_v16 = vadd.f32 %v6955_v44, %v6954_v17 }
 0xf37   :  { %v6948_v45 = vadd.f32 %v6947_v31, %v6946_v63  ;;  %v6957_v60 = vrot.slane %v6956_v16, 4  ;;  %v6970_v31 = vld [vmem:[#allocation7 + $0x26] sm:$0x1] }
 0xf39   :  { %v6949_v48 = vrot.slane %v6948_v45, 2  ;;  %v6958_v53 = vadd.f32 %v6957_v60, %v6956_v16 }
 0xf3b   :  { %v6950_v1 = vadd.f32 %v6949_v48, %v6948_v45  ;;  %v6959_v61 = vrot.slane %v6958_v53, 2 }
 0xf3d   :  { %v6951_v6 = vrot.slane %v6950_v1, 1  ;;  %v6960_v20 = vadd.f32 %v6959_v61, %v6958_v53 }
 0xf3f   :  { %v6952_v28 = vadd.f32 %v6951_v6, %v6950_v1  ;;  %v6961_v58 = vrot.slane %v6960_v20, 1 }
 0xf41   :  { %v6953_v9 = vmul.f32 0.0625, %v6952_v28  ;;  %v6962_v54 = vadd.f32 %v6961_v58, %v6960_v20 }
 0xf43   :  { %v6963_v33 = vmul.f32 0.0625, %v6962_v54  ;;  %v6964_v13 = vmul.f32 %v6953_v9, %v6953_v9 }
 0xf45   :  { %v6965_v37 = vsub.f32 %v6963_v33, %v6964_v13 }
 0xf47   :  { %v6966_v2 = vadd.f32 1e-05, %v6965_v37 }
 0xf49   :  { %12707 = vrsqrt.f32 %v6966_v2 }
 0xf53   :  { %v12708_v40 = vpop.eup %12707 }
 0xf54   :  { %v6969_v17 = vmul.f32 %v12708_v40, %v6968_v35 }
 0xf56   :  { %v6971_v44 = vmul.f32 %v6969_v17, %v6953_v9  ;;  %v6976_v60 = vrot.slane %v6969_v17, %v13315_v15 }
 0xf58   :  { %v6972_v48 = vsub.f32 %v6970_v31, %v6971_v44  ;;  %v6977_v45 = vmul.f32 %v12567_v52, %v6976_v60  ;;  %v6978_v16 = vmul.f32 %v12566_v29, %v6976_v60 }
 0xf5a   :  { %v6982_v6 = vrot.slane %v6972_v48, %v13315_v15 }
 0xf5c   :  { %v6983_v61 = vadd.f32 %v6982_v6, %v6977_v45  ;;  %v6984_v28 = vadd.f32 %v6982_v6, %v6978_v16 }
 0xf5e   :  { %v6985_v58 = vmax.f32 %v6983_v61, 0.0  ;;  %v6986_v54 = vmax.f32 %v6984_v28, 0.0 }
 0xf60   :  { %v16312_v20 = vand.u32 4294901760, %v6985_v58  ;;  %v16314_v13 = vand.u32 4294901760, %v6986_v54 }
 0xf62   :  { %v7090_v1 = vsub.f32 %v6985_v58, %v16312_v20  ;;  %v16318_v53 = vsub.f32 %v6986_v54, %v16314_v13  ;;  %v7714_v54 = vld [vmem:[#allocation7 + $0x29] sm:$0x1] }
 0xf64   :  { %v7091_v9 = vand.u32 4294901760, %v7090_v1  ;;  %v7101_v40 = vand.u32 4294901760, %v16318_v53 }
 0xf66   :  { %v7092_v35 = vsub.f32 %v7090_v1, %v7091_v9  ;;  %v7102_v29 = vsub.f32 %v16318_v53, %v7101_v40 }
 0xf68   :  { %v7093_v52 = vand.u32 4294901760, %v7092_v35  ;;  %v7103_v63 = vand.u32 4294901760, %v7102_v29 }
 0xf6a   :  { %10450 = vmatprep.mubr.f32.mxu1 %v7093_v52 }
 0xf6b   :  { %10451 = vmatmul.mubr.f32.vlgmr.msra.gmra.mrb[8].mxu1 %v7103_v63 }
 0xf6c   :  { %12391 = vmatpush3.bf16.msra.mxu1 %v16167_v57  ;;  %10485 = vmatprep.mubr.f32.mxu1 %v16312_v20  ;;  %v16924_v57 = vand.u32 4294901760, %v16137_v3  ;;  %v16929_v3 = vand.u32 4294901760, %v16177_v62  ;;  %v16935_v62 = vand.u32 4294901760, %v16222_v14 }
 0xf6d   :  { %12393 = vmatprep.subr.bf16.mxu1 %v16182_v47 }
 0xf70   :  { %12395 = vmatpush3.bf16.msra.mxu1 %v16182_v47  ;;  %v16925_v47 = vand.u32 4294901760, %v16139_v26  ;;  %v16930_v26 = vand.u32 4294901760, %v16190_v10  ;;  %v16936_v10 = vand.u32 4294901760, %v16239_v7 }
 0xf71   :  { %12397 = vmatprep.subr.bf16.mxu1 %v16196_v5 }
 0xf74   :  { %12399 = vmatpush3.bf16.msra.mxu1 %v16196_v5  ;;  %v12484_v5 = vpack.c.bf16 %v16925_v47, %v16924_v57 }
 0xf75   :  { %12401 = vmatprep.subr.bf16.mxu1 %v16224_v49 }
 0xf78   :  { %12403 = vmatpush3.bf16.msra.mxu1 %v16224_v49  ;;  %v16926_v49 = vand.u32 4294901760, %v16160_v11 }
 0xf79   :  { %12405 = vmatprep.subr.bf16.mxu1 %v16228_v56 }
 0xf7c   :  { %12407 = vmatpush3.bf16.msra.mxu1 %v16228_v56  ;;  %v16927_v56 = vand.u32 4294901760, %v16162_v30  ;;  %v16932_v30 = vand.u32 4294901760, %v16202_v32  ;;  %v16938_v32 = vld [vmem:[#allocation33_spill] sm:$0xff] }
 0xf7d   :  { %12409 = vmatprep.subr.bf16.mxu1 %v16248_v0 }
 0xf80   :  { %12411 = vmatpush3.bf16.msra.mxu1 %v16248_v0  ;;  %v12488_v0 = vpack.c.bf16 %v16927_v56, %v16926_v49 }
 0xf81   :  { %12413 = vmatprep.subr.bf16.mxu1 %v16274_v50 }
 0xf84   :  { %12415 = vmatpush3.bf16.msra.mxu1 %v16274_v50  ;;  %v16928_v50 = vand.u32 4294901760, %v16175_v25  ;;  %v16934_v25 = vand.u32 4294901760, %v16219_v21 }
 0xf85   :  { %12417 = vmatprep.subr.bf16.mxu1 %v16276_v24 }
 0xf88   :  { %12419 = vmatpush3.bf16.msra.mxu1 %v16276_v24  ;;  %v12492_v24 = vpack.c.bf16 %v16929_v3, %v16928_v50 }
 0xf89   :  { %12421 = vmatprep.subr.bf16.mxu1 %v16280_v41 }
 0xf8b   :  { %10486 = vmatmul.mubr.f32.vlgmr.msra.gmra.mrb[8].mxu1 %v16314_v13 }
 0xf8c   :  { %12423 = vmatpush3.bf16.msra.mxu1 %v16280_v41  ;;  %10520 = vmatprep.mubr.f32.mxu1 %v7090_v1  ;;  %v16931_v41 = vand.u32 4294901760, %v16192_v46  ;;  %v16937_v46 = vand.u32 4294901760, %v16244_v4  ;;  %v7716_v1 = vld [vmem:[#allocation7 + $0x2a] sm:$0x1] }
 0xf8d   :  { %12425 = vmatprep.subr.bf16.mxu1 %v16284_v19 }
 0xf8e   :  { %v12496_v11 = vpack.c.bf16 %v16931_v41, %v16930_v26 }
 0xf90   :  { %12427 = vmatpush3.bf16.msra.mxu1 %v16284_v19  ;;  %v16933_v19 = vand.u32 4294901760, %v16205_v22  ;;  %v16940_v22 = vld [vmem:[#allocation37_spill] sm:$0xff] }
 0xf91   :  { %12429 = vmatprep.subr.bf16.mxu1 %v16288_v38 }
 0xf94   :  { %12431 = vmatpush3.bf16.msra.mxu1 %v16288_v38  ;;  %v12500_v38 = vpack.c.bf16 %v16933_v19, %v16932_v30 }
 0xf95   :  { %12433 = vmatprep.subr.bf16.mxu1 %v16292_v43 }
 0xf98   :  { %12435 = vmatpush3.bf16.msra.mxu1 %v16292_v43  ;;  %v12504_v43 = vpack.c.bf16 %v16935_v62, %v16934_v25 }
 0xf99   :  { %12437 = vmatprep.subr.bf16.mxu1 %v16296_v36 }
 0xf9c   :  { %12439 = vmatpush3.bf16.msra.mxu1 %v16296_v36  ;;  %v12508_v36 = vpack.c.bf16 %v16937_v46, %v16936_v10 }
 0xf9d   :  { %12441 = vmatprep.subr.bf16.mxu1 %v16300_v8 }
 0xfa0   :  { %12443 = vmatpush3.bf16.msra.mxu1 %v16300_v8  ;;  %v16939_v8 = vand.u32 4294901760, %v16938_v32 }
 0xfa1   :  { %12445 = vmatprep.subr.bf16.mxu1 %v16304_v59 }
 0xfa4   :  { %12447 = vmatpush3.bf16.msra.mxu1 %v16304_v59  ;;  %v16941_v59 = vand.u32 4294901760, %v16940_v22 }
 0xfa5   :  { %12449 = vmatprep.subr.bf16.mxu1 %v16308_v18 }
 0xfa8   :  { %12451 = vmatpush3.bf16.msra.mxu1 %v16308_v18  ;;  %v12512_v18 = vpack.c.bf16 %v16941_v59, %v16939_v8 }
 0xfa9   :  { %12453 = vmatprep.subr.bf16.mxu1 %v16085_v55 }
 0xfab   :  { %10521 = vmatmul.mubr.f32.vlgmr.msra.gmra.mrb[8].mxu1 %v16318_v53 }
 0xfac   :  { %12455 = vmatpush3.bf16.msra.mxu1 %v16085_v55  ;;  %10555 = vmatprep.mubr.f32.mxu1 %v7091_v9 }
 0xfad   :  { %12457 = vmatprep.subr.bf16.mxu1 %v16089_v27 }
 0xfb0   :  { %12459 = vmatpush3.bf16.msra.mxu1 %v16089_v27 }
 0xfb1   :  { %12461 = vmatprep.subr.bf16.mxu1 %v16093_v42 }
 0xfb4   :  { %12463 = vmatpush3.bf16.msra.mxu1 %v16093_v42 }
 0xfb5   :  { %12465 = vmatprep.subr.bf16.mxu1 %v16097_v23 }
 0xfb8   :  { %12467 = vmatpush3.bf16.msra.mxu1 %v16097_v23 }
 0xfb9   :  { %12469 = vmatprep.subr.bf16.mxu1 %v16107_v34 }
 0xfbc   :  { %12471 = vmatpush3.bf16.msra.mxu1 %v16107_v34 }
 0xfbd   :  { %12473 = vmatprep.subr.bf16.mxu1 %v16117_v12 }
 0xfc0   :  { %12475 = vmatpush3.bf16.msra.mxu1 %v16117_v12 }
 0xfc1   :  { %12477 = vmatprep.subr.bf16.mxu1 %v16131_v39 }
 0xfc4   :  { %12479 = vmatpush3.bf16.msra.mxu1 %v16131_v39 }
 0xfc5   :  { %12481 = vmatprep.subr.bf16.mxu1 %v16151_v51 }
 0xfc8   :  { %12483 = vmatpush3.bf16.msra.mxu1 %v16151_v51 }
 0xfc9   :  { %12485 = vmatprep.subr.bf16.mxu1 %v12484_v5 }
 0xfcb   :  { %10556 = vmatmul.mubr.f32.vlgmr.msra.gmra.mrb[8].mxu1 %v7101_v40 }
 0xfcc   :  { %12487 = vmatpush3.bf16.msra.mxu1 %v12484_v5  ;;  %10590 = vmatprep.mubr.f32.mxu1 %v16312_v20 }
 0xfcd   :  { %12489 = vmatprep.subr.bf16.mxu1 %v12488_v0 }
 0xfd0   :  { %12491 = vmatpush3.bf16.msra.mxu1 %v12488_v0 }
 0xfd1   :  { %12493 = vmatprep.subr.bf16.mxu1 %v12492_v24 }
 0xfd4   :  { %12495 = vmatpush3.bf16.msra.mxu1 %v12492_v24 }
 0xfd5   :  { %12497 = vmatprep.subr.bf16.mxu1 %v12496_v11 }
 0xfd8   :  { %12499 = vmatpush3.bf16.msra.mxu1 %v12496_v11 }
 0xfd9   :  { %12501 = vmatprep.subr.bf16.mxu1 %v12500_v38 }
 0xfdc   :  { %12503 = vmatpush3.bf16.msra.mxu1 %v12500_v38 }
 0xfdd   :  { %12505 = vmatprep.subr.bf16.mxu1 %v12504_v43 }
 0xfe0   :  { %12507 = vmatpush3.bf16.msra.mxu1 %v12504_v43 }
 0xfe1   :  { %12509 = vmatprep.subr.bf16.mxu1 %v12508_v36 }
 0xfe4   :  { %12511 = vmatpush3.bf16.msra.mxu1 %v12508_v36 }
 0xfe5   :  { %12513 = vmatprep.subr.bf16.mxu1 %v12512_v18 }
 0xfe8   :  { %12515 = vmatpush3.bf16.msra.mxu1 %v12512_v18 }
 0xfe9   :  { %12517 = vmatprep.subr.bf16.mxu1 %v16085_v55 }
 0xfeb   :  { %10591 = vmatmul.mubr.f32.vlgmr.msra.gmra.mrb[8].mxu1 %v16314_v13 }
 0xfec   :  { %12519 = vmatpush3.bf16.msra.mxu1 %v16085_v55  ;;  %10625 = vmatprep.mubr.f32.mxu1 %v16312_v20  ;;  %v7765_v55 = vld [vmem:[#allocation7 + $0x28] ss:$0 sm:$0xff] }
 0xfed   :  { %12521 = vmatprep.subr.bf16.mxu1 %v16089_v27 }
 0xff0   :  { %12523 = vmatpush3.bf16.msra.mxu1 %v16089_v27 }
 0xff1   :  { %12525 = vmatprep.subr.bf16.mxu1 %v16093_v42 }
 0xff4   :  { %12527 = vmatpush3.bf16.msra.mxu1 %v16093_v42 }
 0xff5   :  { %12529 = vmatprep.subr.bf16.mxu1 %v16097_v23 }
 0xff8   :  { %12531 = vmatpush3.bf16.msra.mxu1 %v16097_v23 }
 0xff9   :  { %12533 = vmatprep.subr.bf16.mxu1 %v16107_v34 }
 0xffc   :  { %12535 = vmatpush3.bf16.msra.mxu1 %v16107_v34 }
 0xffd   :  { %12537 = vmatprep.subr.bf16.mxu1 %v16117_v12 }
0x1000   :  { %12539 = vmatpush3.bf16.msra.mxu1 %v16117_v12 }
0x1001   :  { %12541 = vmatprep.subr.bf16.mxu1 %v16131_v39 }
0x1004   :  { %12543 = vmatpush3.bf16.msra.mxu1 %v16131_v39 }
0x1005   :  { %12545 = vmatprep.subr.bf16.mxu1 %v16151_v51 }
0x1008   :  { %12547 = vmatpush3.bf16.msra.mxu1 %v16151_v51 }
0x100b   :  { %10626 = vmatmul.mubr.f32.vlgmr.msra.gmra.mrb[8].mxu1 %v16314_v13 }
0x10de   :  { %v10627_v27 = vpop.f32.mrb[8].mxu1 }
0x10df   :  { %v12568_v42 = vadd.f32 %v10627_v27, %v7765_v55  ;;  %v7682_v23 = vpop.f32.mrb[9].mxu1 }
0x10e0   :  { %v12569_v21 = vadd.f32 %v7765_v55, %v7682_v23 }
0x10e1   :  { %v7701_v34 = vmul.f32 %v12568_v42, %v12568_v42 }
0x10e2   :  { %v7692_v14 = vadd.f32 %v12569_v21, %v12568_v42  ;;  %v7700_v7 = vmul.f32 %v12569_v21, %v12569_v21 }
0x10e4   :  { %v7693_v4 = vrot.slane %v7692_v14, 4  ;;  %v7702_v12 = vadd.f32 %v7701_v34, %v7700_v7 }
0x10e6   :  { %v7694_v33 = vadd.f32 %v7693_v4, %v7692_v14  ;;  %v7703_v37 = vrot.slane %v7702_v12, 4 }
0x10e8   :  { %v7695_v2 = vrot.slane %v7694_v33, 2  ;;  %v7704_v39 = vadd.f32 %v7703_v37, %v7702_v12 }
0x10ea   :  { %v7696_v17 = vadd.f32 %v7695_v2, %v7694_v33  ;;  %v7705_v31 = vrot.slane %v7704_v39, 2 }
0x10ec   :  { %v7697_v44 = vrot.slane %v7696_v17, 1  ;;  %v7706_v51 = vadd.f32 %v7705_v31, %v7704_v39 }
0x10ee   :  { %v7698_v60 = vadd.f32 %v7697_v44, %v7696_v17  ;;  %v7707_v48 = vrot.slane %v7706_v51, 1 }
0x10f0   :  { %v7699_v45 = vmul.f32 0.0625, %v7698_v60  ;;  %v7708_v16 = vadd.f32 %v7707_v48, %v7706_v51 }
0x10f2   :  { %v7709_v6 = vmul.f32 0.0625, %v7708_v16  ;;  %v7710_v61 = vmul.f32 %v7699_v45, %v7699_v45 }
0x10f4   :  { %v7711_v28 = vsub.f32 %v7709_v6, %v7710_v61 }
0x10f6   :  { %v7712_v58 = vadd.f32 1e-05, %v7711_v28 }
0x10f8   :  { %12709 = vrsqrt.f32 %v7712_v58 }
0x1102   :  { %v12710_v20 = vpop.eup %12709 }
0x1103   :  { %v7715_v13 = vmul.f32 %v12710_v20, %v7714_v54 }
0x1105   :  { %v7717_v53 = vmul.f32 %v7715_v13, %v7699_v45  ;;  %v7722_v9 = vrot.slane %v7715_v13, %v13315_v15 }
0x1107   :  { %v7718_v40 = vsub.f32 %v7716_v1, %v7717_v53  ;;  %v7723_v35 = vmul.f32 %v12569_v21, %v7722_v9  ;;  %v7724_v29 = vmul.f32 %v12568_v42, %v7722_v9 }
0x1109   :  { %v7728_v52 = vrot.slane %v7718_v40, %v13315_v15 }
0x110b   :  { %v7729_v63 = vadd.f32 %v7728_v52, %v7723_v35  ;;  %v7730_v57 = vadd.f32 %v7728_v52, %v7724_v29 }
0x110d   :  { %7731 = vst [vmem:[#allocation8] sm:$0xff] %v7729_v63  ;;  %7732 = vst [vmem:[#allocation8 + $0x8] sm:$0xff] %v7730_v57 }
0x110e   :  { %12788 = shalt.err (!%p12785_p0)
}
0x110f   :  { %s12789_s27 = scalar_lea.hbm %s16444_s3, 768 }
0x1110   :  { %p12790_p1 = scmp.ne.s32.totalorder %s16444_s3, %s12789_s27  ;;  %p12793_p2 = scmp.lt.u32.totalorder %s12789_s27, %s16444_s3 }
0x1112   :  { %p12795_p3 = pnand %p12793_p2, %p12790_p1 }
0x1114   :  { %12798 = shalt.err (!%p12795_p3)
}
0x1115   :  { %7750 = dma.vmem_to_hbm [thread:$0]  %s7745_s23, 768, %s16444_s3, [#allocation4], %s12809_s1, %s12809_s1, %s12810_s9  }
0x1116   :  { %12803 = dma.done.wait [#allocation4], 768  }
0x1117   :  { %12804 = vsyncadd [#allocation4], 4294966528 }
0x1118   :  { %7754 = vsyncpa [#allocation3], 1 }
0x1119   :  { %7755 = vsyncpa [#allocation6], 1 }
0x111a   :  { %7756 = vsyncpa [#allocation4], 1 }

</bundles_post_ra>
